<compile_context>
chip_gen: v5e
topology: v5e:2x2
jax: 0.10.0
libtpu: 0.0.40
codegen_flags: <defaults>
</compile_context>

<pallas_src>
import jax
import jax.numpy as jnp
from jax import lax
from jax.experimental import pallas as pl
from jax.experimental.pallas import tpu as pltpu


def _pick_depth_tile(n, d, c_in, c_out, lane):
    """Pick the input-depth tile td (rows per grid step) and the weight sublane period S."""
    # Conservative budget valid on v5e (16 MiB scoped default), v6e and v7x (32 MiB scoped,
    # 64 MiB physical on v7x) -- no vmem_limit_bytes override needed.
    budget = 12 * 1024 * 1024
    # Keep the in-kernel f32 accumulator (== output block) modest to avoid spill churn while
    # each block stays large enough to amortize the ~0.35us per-grid-step overhead.
    acc_cap = 512 * 1024

    divisors = [t for t in range(d, 0, -1) if d % t == 0]
    # Prefer tiles whose output-depth extent (2*td) is sublane-aligned (multiple of 8).
    preferred = [t for t in divisors if (2 * t) % 8 == 0] or divisors

    def s_of(t):
        return 8 if (2 * t) % 8 == 0 else 2 * t

    def fits(t):
        blocks = 4 * lane * 2 * t * (c_in + c_out) * 2      # double-buffered in+out blocks
        weights = 4 * lane * c_out * c_in * s_of(t) * 2     # constant tiled-weight block
        return (blocks + weights <= budget) and (4 * lane * 2 * t * c_out <= acc_cap)

    cands = [t for t in preferred if fits(t)] or [preferred[-1]]
    # v7x has two TensorCores: make sure the ("parallel","parallel") grid has >= 2 steps.
    td = next((t for t in cands if n * (d // t) >= 2), cands[0])
    return td, s_of(td)


def _deconv_fused_kernel(x_ref, w_ref, b_ref, o_ref):
    # x_ref: (1, Cin, 2*td, LANE) f32  nearest-neighbour-upsampled input block (LANE = 2H*2W)
    # w_ref: (Cout, Cin, S, LANE) f32  weights tiled to the periodic (kd | kh,kw) pattern
    # b_ref: (Cout, 1)            f32
    # o_ref: (1, Cout, 2*td, LANE) f32 final NCDHW output block (lane-dense store)
    c_out, c_in, s, lane = w_ref.shape
    two_td = x_ref.shape[2]
    g = two_td // s

    # Free reshape: splits the sublane dim on an 8-aligned boundary (s == 8 for normal tiles).
    x = x_ref[0].reshape(c_in, g, s, lane)
    wv = w_ref[...]

    # Cin is tiny for this module: exact f32 channel contraction on the VPU (hidden under the
    # HBM DMA).  TODO(synk): large-Cin/Cout configs should use an MXU GEMM formulation instead.
    acc = None
    for ci in range(c_in):
        term = x[ci][None] * wv[:, ci][:, None]            # (Cout, g, S, LANE), f32
        acc = term if acc is None else acc + term
    acc = acc + b_ref[...].reshape(c_out, 1, 1, 1)

    # Free merge back to (Cout, 2*td, LANE): dense, unmasked, lane-aligned store.
    o_ref[0] = acc.reshape(c_out, two_td, lane)


@jax.jit
def deconv3d_forward(x, weight, bias):
    """ConvTranspose3d(kernel=2, stride=2, pad=0), PyTorch layouts.

    x:      (N, c_in, D, H, W)
    weight: (c_in, c_out, 2, 2, 2)
    bias:   (c_out,)
    returns (N, c_out, 2D, 2H, 2W) float32
    """
    n, c_in, d, h, w = x.shape
    c_out = weight.shape[1]
    lane = 4 * h * w                     # one full (2H, 2W) output plane per sublane row
    td, s = _pick_depth_tile(n, d, c_in, c_out, lane)
    n_d = d // td

    x = x.astype(jnp.float32)
    # Cheap XLA nearest-neighbour 2x2x2 upsample of the SMALL input.  This pre-resolves the
    # stride-2 (kd,kh,kw) scatter so the Pallas output block is already a dense slab of the
    # final NCDHW tensor and no XLA epilogue pass over the (8x larger) output is needed.
    x_nn = jnp.broadcast_to(
        x[:, :, :, None, :, None, :, None], (n, c_in, d, 2, h, 2, w, 2)
    ).reshape(n, c_in, 2 * d, lane)

    # Tiny one-off weight relayout: wtile[co, ci, s_, l] = W[ci, co, s_ % 2, kh(l), kw(l)],
    # i.e. the periodic per-sublane (kd) / per-lane (kh, kw) pattern inside one output block.
    wt = jnp.transpose(weight.astype(jnp.float32), (1, 0, 2, 3, 4))   # (Cout, Cin, 2, 2, 2)
    wtile = jnp.tile(wt, (1, 1, s // 2, h, w)).reshape(c_out, c_in, s, lane)

    b_col = bias.astype(jnp.float32).reshape(c_out, 1)

    out_elems = n * c_out * 2 * d * lane
    cost = pl.CostEstimate(
        flops=2 * c_in * out_elems,
        transcendentals=0,
        bytes_accessed=4 * (x_nn.size + wtile.size + b_col.size + out_elems),
    )

    out = pl.pallas_call(
        _deconv_fused_kernel,
        out_shape=jax.ShapeDtypeStruct((n, c_out, 2 * d, lane), jnp.float32),
        grid_spec=pltpu.PrefetchScalarGridSpec(
            num_scalar_prefetch=0,
            grid=(n, n_d),
            in_specs=[
                pl.BlockSpec((1, c_in, 2 * td, lane), lambda b, i: (b, 0, i, 0)),
                pl.BlockSpec((c_out, c_in, s, lane), lambda b, i: (0, 0, 0, 0)),  # fetched once
                pl.BlockSpec((c_out, 1), lambda b, i: (0, 0)),                    # fetched once
            ],
            out_specs=pl.BlockSpec((1, c_out, 2 * td, lane), lambda b, i: (b, 0, i, 0)),
        ),
        compiler_params=pltpu.CompilerParams(
            dimension_semantics=("parallel", "parallel"),    # megacore sharding on v7x
        ),
        cost_estimate=cost,
    )(x_nn, wtile, b_col)

    # Free reshape only -- no XLA transpose/interleave pass over the output.
    return out.reshape(n, c_out, 2 * d, 2 * h, 2 * w)


def _init_params(key, c_in, c_out, dtype=jnp.float32):
    """Deterministic xavier_uniform_-style init matching the PyTorch module."""
    kw_, kb = jax.random.split(key)
    rfs = 2 * 2 * 2
    fan_in = c_out * rfs      # torch fan computation on (c_in, c_out, 2, 2, 2)
    fan_out = c_in * rfs
    bound = (6.0 / (fan_in + fan_out)) ** 0.5
    weight = jax.random.uniform(kw_, (c_in, c_out, 2, 2, 2), dtype, minval=-bound, maxval=bound)
    b_bound = 1.0 / (c_in * rfs) ** 0.5
    bias = jax.random.uniform(kb, (c_out,), dtype, minval=-b_bound, maxval=b_bound)
    return weight, bias


def _reference(x, weight, bias):
    # Pure-JAX f32 reference; HIGHEST precision so the reference itself is not bf16-truncated.
    n, c_in, d, h, w = x.shape
    c_out = weight.shape[1]
    o = jnp.einsum("nidhw,iokpq->nodkhpwq", x, weight, precision=lax.Precision.HIGHEST)
    o = o.reshape(n, c_out, 2 * d, 2 * h, 2 * w)
    return o + bias[None, :, None, None, None]


if __name__ == "__main__":
    key = jax.random.PRNGKey(0)
    k_x, k_p = jax.random.split(key)

    n, c_in, c_out = 2, 4, 8
    d = h = w = 16
    x = jax.random.normal(k_x, (n, c_in, d, h, w), jnp.float32)
    weight, bias = _init_params(k_p, c_in, c_out)

    out = jax.block_until_ready(deconv3d_forward(x, weight, bias))

    ref = _reference(x, weight, bias)
    assert out.shape == (n, c_out, 2 * d, 2 * h, 2 * w), out.shape
    # All-f32 compute in the kernel (no bf16 MXU truncation any more) -> tight tolerance.
    err = float(jnp.max(jnp.abs(out - ref)))
    assert jnp.allclose(out, ref, atol=1e-3, rtol=1e-3), err

    print("KERNEL_OK")
</pallas_src>

<mosaic_0001>
module attributes {stable_mosaic.version = 11 : i64} {
  func.func @_deconv_fused_kernel(%arg0: i32, %arg1: i32, %arg2: memref<1x4x16x1024xf32, #tpu.memory_space<vmem>>, %arg3: memref<8x4x8x1024xf32, #tpu.memory_space<vmem>>, %arg4: memref<8x1xf32, #tpu.memory_space<vmem>>, %arg5: memref<1x8x16x1024xf32, #tpu.memory_space<vmem>>) attributes {dimension_semantics = [#tpu.dimension_semantics<parallel>, #tpu.dimension_semantics<parallel>], iteration_bounds = array<i64: 2, 2>, scalar_prefetch = 0 : i64, scratch_operands = 0 : i64, tpu.core_type = #tpu.core_type<tc>, window_params = [{transform_indices = @transform_0, window_bounds = array<i64: 1, 4, 16, 1024>}, {pipeline_mode = #tpu.pipeline_mode<synchronous>, transform_indices = @transform_1, window_bounds = array<i64: 8, 4, 8, 1024>}, {pipeline_mode = #tpu.pipeline_mode<synchronous>, transform_indices = @transform_2, window_bounds = array<i64: 8, 1>}, {transform_indices = @transform_3, window_bounds = array<i64: 1, 8, 16, 1024>}]} {
    %c0 = arith.constant 0 : index
    %c0_0 = arith.constant 0 : index
    %c0_1 = arith.constant 0 : index
    %c0_2 = arith.constant 0 : index
    %0 = vector.load %arg2[%c0, %c0_0, %c0_1, %c0_2] : memref<1x4x16x1024xf32, #tpu.memory_space<vmem>>, vector<1x4x16x1024xf32>
    %1 = vector.shape_cast %0 : vector<1x4x16x1024xf32> to vector<4x16x1024xf32>
    %2 = vector.shape_cast %1 : vector<4x16x1024xf32> to vector<4x2x8x1024xf32>
    %c0_3 = arith.constant 0 : index
    %c0_4 = arith.constant 0 : index
    %c0_5 = arith.constant 0 : index
    %c0_6 = arith.constant 0 : index
    %3 = vector.load %arg3[%c0_3, %c0_4, %c0_5, %c0_6] : memref<8x4x8x1024xf32, #tpu.memory_space<vmem>>, vector<8x4x8x1024xf32>
    %4 = vector.extract_strided_slice %2 {offsets = [0, 0, 0, 0], sizes = [1, 2, 8, 1024], strides = [1, 1, 1, 1]} : vector<4x2x8x1024xf32> to vector<1x2x8x1024xf32>
    %5 = vector.shape_cast %4 : vector<1x2x8x1024xf32> to vector<2x8x1024xf32>
    %6 = vector.shape_cast %5 : vector<2x8x1024xf32> to vector<1x2x8x1024xf32>
    %7 = vector.extract_strided_slice %3 {offsets = [0, 0, 0, 0], sizes = [8, 1, 8, 1024], strides = [1, 1, 1, 1]} : vector<8x4x8x1024xf32> to vector<8x1x8x1024xf32>
    %8 = vector.shape_cast %7 : vector<8x1x8x1024xf32> to vector<8x8x1024xf32>
    %9 = vector.shape_cast %8 : vector<8x8x1024xf32> to vector<8x1x8x1024xf32>
    %10 = vector.broadcast %6 : vector<1x2x8x1024xf32> to vector<8x2x8x1024xf32>
    %11 = vector.broadcast %9 : vector<8x1x8x1024xf32> to vector<8x2x8x1024xf32>
    %12 = arith.mulf %10, %11 : vector<8x2x8x1024xf32>
    %13 = vector.extract_strided_slice %2 {offsets = [1, 0, 0, 0], sizes = [1, 2, 8, 1024], strides = [1, 1, 1, 1]} : vector<4x2x8x1024xf32> to vector<1x2x8x1024xf32>
    %14 = vector.shape_cast %13 : vector<1x2x8x1024xf32> to vector<2x8x1024xf32>
    %15 = vector.shape_cast %14 : vector<2x8x1024xf32> to vector<1x2x8x1024xf32>
    %16 = vector.extract_strided_slice %3 {offsets = [0, 1, 0, 0], sizes = [8, 1, 8, 1024], strides = [1, 1, 1, 1]} : vector<8x4x8x1024xf32> to vector<8x1x8x1024xf32>
    %17 = vector.shape_cast %16 : vector<8x1x8x1024xf32> to vector<8x8x1024xf32>
    %18 = vector.shape_cast %17 : vector<8x8x1024xf32> to vector<8x1x8x1024xf32>
    %19 = vector.broadcast %15 : vector<1x2x8x1024xf32> to vector<8x2x8x1024xf32>
    %20 = vector.broadcast %18 : vector<8x1x8x1024xf32> to vector<8x2x8x1024xf32>
    %21 = arith.mulf %19, %20 : vector<8x2x8x1024xf32>
    %22 = arith.addf %12, %21 : vector<8x2x8x1024xf32>
    %23 = vector.extract_strided_slice %2 {offsets = [2, 0, 0, 0], sizes = [1, 2, 8, 1024], strides = [1, 1, 1, 1]} : vector<4x2x8x1024xf32> to vector<1x2x8x1024xf32>
    %24 = vector.shape_cast %23 : vector<1x2x8x1024xf32> to vector<2x8x1024xf32>
    %25 = vector.shape_cast %24 : vector<2x8x1024xf32> to vector<1x2x8x1024xf32>
    %26 = vector.extract_strided_slice %3 {offsets = [0, 2, 0, 0], sizes = [8, 1, 8, 1024], strides = [1, 1, 1, 1]} : vector<8x4x8x1024xf32> to vector<8x1x8x1024xf32>
    %27 = vector.shape_cast %26 : vector<8x1x8x1024xf32> to vector<8x8x1024xf32>
    %28 = vector.shape_cast %27 : vector<8x8x1024xf32> to vector<8x1x8x1024xf32>
    %29 = vector.broadcast %25 : vector<1x2x8x1024xf32> to vector<8x2x8x1024xf32>
    %30 = vector.broadcast %28 : vector<8x1x8x1024xf32> to vector<8x2x8x1024xf32>
    %31 = arith.mulf %29, %30 : vector<8x2x8x1024xf32>
    %32 = arith.addf %22, %31 : vector<8x2x8x1024xf32>
    %33 = vector.extract_strided_slice %2 {offsets = [3, 0, 0, 0], sizes = [1, 2, 8, 1024], strides = [1, 1, 1, 1]} : vector<4x2x8x1024xf32> to vector<1x2x8x1024xf32>
    %34 = vector.shape_cast %33 : vector<1x2x8x1024xf32> to vector<2x8x1024xf32>
    %35 = vector.shape_cast %34 : vector<2x8x1024xf32> to vector<1x2x8x1024xf32>
    %36 = vector.extract_strided_slice %3 {offsets = [0, 3, 0, 0], sizes = [8, 1, 8, 1024], strides = [1, 1, 1, 1]} : vector<8x4x8x1024xf32> to vector<8x1x8x1024xf32>
    %37 = vector.shape_cast %36 : vector<8x1x8x1024xf32> to vector<8x8x1024xf32>
    %38 = vector.shape_cast %37 : vector<8x8x1024xf32> to vector<8x1x8x1024xf32>
    %39 = vector.broadcast %35 : vector<1x2x8x1024xf32> to vector<8x2x8x1024xf32>
    %40 = vector.broadcast %38 : vector<8x1x8x1024xf32> to vector<8x2x8x1024xf32>
    %41 = arith.mulf %39, %40 : vector<8x2x8x1024xf32>
    %42 = arith.addf %32, %41 : vector<8x2x8x1024xf32>
    %c0_7 = arith.constant 0 : index
    %c0_8 = arith.constant 0 : index
    %43 = vector.load %arg4[%c0_7, %c0_8] : memref<8x1xf32, #tpu.memory_space<vmem>>, vector<8x1xf32>
    %44 = vector.shape_cast %43 : vector<8x1xf32> to vector<8x1x1x1xf32>
    %45 = vector.broadcast %44 : vector<8x1x1x1xf32> to vector<8x2x8x1024xf32>
    %46 = arith.addf %42, %45 : vector<8x2x8x1024xf32>
    %47 = vector.shape_cast %46 : vector<8x2x8x1024xf32> to vector<8x16x1024xf32>
    %c0_9 = arith.constant 0 : index
    %c0_10 = arith.constant 0 : index
    %c0_11 = arith.constant 0 : index
    %c0_12 = arith.constant 0 : index
    %48 = vector.load %arg5[%c0_9, %c0_10, %c0_11, %c0_12] : memref<1x8x16x1024xf32, #tpu.memory_space<vmem>>, vector<1x8x16x1024xf32>
    %49 = vector.shape_cast %48 : vector<1x8x16x1024xf32> to vector<8x16x1024xf32>
    %50 = vector.shape_cast %47 : vector<8x16x1024xf32> to vector<1x8x16x1024xf32>
    tpu.vector_store %arg5[%c0_9, %c0_10, %c0_11, %c0_12], %50 {strides = array<i32>} : memref<1x8x16x1024xf32, #tpu.memory_space<vmem>>, vector<1x8x16x1024xf32>,
    return
  }
  func.func @transform_0(%arg0: i32, %arg1: i32) -> (i32, i32, i32, i32) {
    %c0_i32 = arith.constant 0 : i32
    %c0_i32_0 = arith.constant 0 : i32
    %c0_i32_1 = arith.constant 0 : i32
    return %arg0, %c0_i32, %arg1, %c0_i32_0 : i32, i32, i32, i32
  }
  func.func @transform_1(%arg0: i32, %arg1: i32) -> (i32, i32, i32, i32) {
    %c0_i32 = arith.constant 0 : i32
    %c0_i32_0 = arith.constant 0 : i32
    %c0_i32_1 = arith.constant 0 : i32
    %c0_i32_2 = arith.constant 0 : i32
    %c0_i32_3 = arith.constant 0 : i32
    return %c0_i32, %c0_i32_0, %c0_i32_1, %c0_i32_2 : i32, i32, i32, i32
  }
  func.func @transform_2(%arg0: i32, %arg1: i32) -> (i32, i32) {
    %c0_i32 = arith.constant 0 : i32
    %c0_i32_0 = arith.constant 0 : i32
    %c0_i32_1 = arith.constant 0 : i32
    return %c0_i32, %c0_i32_0 : i32, i32
  }
  func.func @transform_3(%arg0: i32, %arg1: i32) -> (i32, i32, i32, i32) {
    %c0_i32 = arith.constant 0 : i32
    %c0_i32_0 = arith.constant 0 : i32
    %c0_i32_1 = arith.constant 0 : i32
    return %arg0, %c0_i32, %arg1, %c0_i32_0 : i32, i32, i32, i32
  }
}

</mosaic_0001>

<bundles_post_ra>
// kernel: deconv3d_forward.1
= control target key start
LH: loop header
LB: loop body
LE: loop exit
PB: predicated region body
PF: predicated region fallthrough
CT: control target
= control target key end

     0   :  { %s2369_s12 = smov 0   ;;  %s2371_s13 = smov 0   ;;  %s6838_s0 = inlined_call_operand.vmem [shape: f32[2,4,32,1024], index: 0, kind: input, shape index: {}]   ;;  %s6839_s1 = inlined_call_operand.vmem [shape: f32[8,4,8,1024], index: 1, kind: input, shape index: {}]   ;;  %s6840_s2 = inlined_call_operand.vmem [shape: f32[8,1], index: 2, kind: input, shape index: {}]   ;;  %s6841_s3 = inlined_call_operand.vmem [shape: f32[2,8,32,1024], index: 3, kind: output, shape index: {}]  }
   0x1   :  { %s2373_s14 = smov 0   ;;  %s2375_s15 = smov 0  }
   0x2   :  { %s2377_s16 = smov 0   ;;  %s2379_s17 = smov 0  }
   0x3   :  { %s2381_s18 = smov 0  }
   0x4 LB: > { %s22_s19 = sadd.s32 1, %s2338_s16  ;;  %s25_s20 = sadd.s32 1, %s2342_s17  ;;  %s2346_s18 = sphi %s2381_s18, %s13_s18   ;;  %s2342_s17 = sphi %s2379_s17, %s8141_s17   ;;  %s2338_s16 = sphi %s2377_s16, %s8140_s16   ;;  %s2334_s15 = sphi %s2375_s15, %s8139_s15   ;;  %s2330_s14 = sphi %s2373_s14, %s8138_s14   ;;  %s2326_s13 = sphi %s2371_s13, %s8137_s13   ;;  %s2322_s12 = sphi %s2369_s12, %s8136_s12  }
   0x5   : > { %p23_p0 = scmp.ge.s32.totalorder %s22_s19, 2  ;;  %s2211_s21 = sadd.s32 4294967295, %s2346_s18  }
   0x6   : > { %p41_p1 = scmp.ne.s32.totalorder %s2326_s13, %s2322_s12  ;;  %p42_p2 = scmp.eq.s32.totalorder %s2346_s18, 0 }
   0x7   : > { %s8143_s19 = smov (%p23_p0, %s22_s19), 0  ;;  %s8145_s20 = smov (!%p23_p0, %s25_s20), %s2342_s17 }
   0x8   : > { %p27_p3 = scmp.ge.s32.totalorder %s8145_s20, 2  ;;  %p115_p4 = scmp.eq.s32.totalorder %s2211_s21, 3 }
   0x9   : > { %s30_s22 = ssub.s32 %s2338_s16, %s8143_s19  ;;  %p43_p5 = por %p42_p2, %p41_p1 }
   0xa   : > { %s8147_s20 = smov (%p27_p3, %s8145_s20), 0  ;;  %p2417_p6 = por %p115_p4, %p41_p1 }
   0xb   : > { %s29_s24 = ssub.s32 %s2342_s17, %s8147_s20  ;;  %s34_s26 = sadd.s32 1, %s2326_s13 }
   0xc   : > { %s31_s25 = sor.u32 %s30_s22, %s29_s24  ;;  %p2214_p8 = scmp.ge.s32.totalorder %s2346_s18, 4 }
   0xd   : > { %p32_p7 = scmp.eq.s32.totalorder %s31_s25, 0 }
   0xe   : > { %143 = sbr.rel (%p2214_p8) target bundleno = 90 (0x5a), region = 24 }
   0xf   : > { %s2425_s27 = scalar_select %p32_p7, %s2326_s13, %s34_s26  }
  0x13   : > { %146 = sbr.rel (!%p43_p5) target bundleno = 90 (0x5a), region = 28  ;;  %s148_s28 = sand.u32 (%p43_p5), 1, %s2326_s13  }
  0x14   : > { %s2230_s29 = sshll.u32 (%p43_p5), %s2338_s16, 4  ;;  %s2215_s30 = sshll.u32 (%p43_p5), %s148_s28, 9 }
  0x15   : > { %s2218_s4 = sshll.u32 (%p43_p5), %s2342_s17, 7  ;;  %s2439_s10 = scalar_lea.vmem (%p43_p5), [#allocation2], %s2215_s30 }
  0x16   : > { %s154_s5 = sadd.s32 (%p43_p5), %s2230_s29, %s2218_s4 }
  0x17   : > { %s2219_s6 = sshll.u32 (%p43_p5), %s154_s5, 3 }
  0x18   : > { %s2434_s9 = scalar_lea.vmem %s6838_s0, %s2219_s6 }
  0x19   : > { %v169_v0 = vld [vmem:[%s2434_s9] sm:$0xff]  ;;  %v171_v1 = vld [vmem:[%s2434_s9 + $0x8] sm:$0xff]  ;;  %v173_v2 = vld [vmem:[%s2434_s9 + $0x10] sm:$0xff] }
  0x1a   : > { %170 = vst [vmem:[%s2439_s10] sm:$0xff] %v169_v0  ;;  %v175_v3 = vld [vmem:[%s2434_s9 + $0x18] sm:$0xff]  ;;  %v177_v4 = vld [vmem:[%s2434_s9 + $0x20] sm:$0xff]  ;;  %v179_v5 = vld [vmem:[%s2434_s9 + $0x28] sm:$0xff] }
  0x1b   : > { %172 = vst [vmem:[%s2439_s10 + $0x8] sm:$0xff] %v171_v1  ;;  %v181_v6 = vld [vmem:[%s2434_s9 + $0x30] sm:$0xff]  ;;  %v183_v7 = vld [vmem:[%s2434_s9 + $0x38] sm:$0xff]  ;;  %v185_v8 = vld [vmem:[%s2434_s9 + $0x40] sm:$0xff] }
  0x1c   : > { %174 = vst [vmem:[%s2439_s10 + $0x10] sm:$0xff] %v173_v2  ;;  %v187_v9 = vld [vmem:[%s2434_s9 + $0x48] sm:$0xff]  ;;  %v189_v10 = vld [vmem:[%s2434_s9 + $0x50] sm:$0xff]  ;;  %v191_v11 = vld [vmem:[%s2434_s9 + $0x58] sm:$0xff] }
  0x1d   : > { %176 = vst [vmem:[%s2439_s10 + $0x18] sm:$0xff] %v175_v3  ;;  %v193_v12 = vld [vmem:[%s2434_s9 + $0x60] sm:$0xff]  ;;  %v195_v13 = vld [vmem:[%s2434_s9 + $0x68] sm:$0xff]  ;;  %v197_v14 = vld [vmem:[%s2434_s9 + $0x70] sm:$0xff] }
  0x1e   : > { %178 = vst [vmem:[%s2439_s10 + $0x20] sm:$0xff] %v177_v4  ;;  %v199_v15 = vld [vmem:[%s2434_s9 + $0x78] sm:$0xff]  ;;  %v201_v16 = vld [vmem:[%s2434_s9 + $0x100] sm:$0xff]  ;;  %v203_v17 = vld [vmem:[%s2434_s9 + $0x108] sm:$0xff] }
  0x1f   : > { %180 = vst [vmem:[%s2439_s10 + $0x28] sm:$0xff] %v179_v5  ;;  %v205_v18 = vld [vmem:[%s2434_s9 + $0x110] sm:$0xff]  ;;  %v207_v19 = vld [vmem:[%s2434_s9 + $0x118] sm:$0xff]  ;;  %v209_v20 = vld [vmem:[%s2434_s9 + $0x120] sm:$0xff] }
  0x20   : > { %182 = vst [vmem:[%s2439_s10 + $0x30] sm:$0xff] %v181_v6  ;;  %v211_v21 = vld [vmem:[%s2434_s9 + $0x128] sm:$0xff]  ;;  %v213_v22 = vld [vmem:[%s2434_s9 + $0x130] sm:$0xff]  ;;  %v215_v23 = vld [vmem:[%s2434_s9 + $0x138] sm:$0xff] }
  0x21   : > { %184 = vst [vmem:[%s2439_s10 + $0x38] sm:$0xff] %v183_v7  ;;  %v217_v24 = vld [vmem:[%s2434_s9 + $0x140] sm:$0xff]  ;;  %v219_v25 = vld [vmem:[%s2434_s9 + $0x148] sm:$0xff]  ;;  %v221_v26 = vld [vmem:[%s2434_s9 + $0x150] sm:$0xff] }
  0x22   : > { %186 = vst [vmem:[%s2439_s10 + $0x40] sm:$0xff] %v185_v8  ;;  %v223_v27 = vld [vmem:[%s2434_s9 + $0x158] sm:$0xff]  ;;  %v225_v28 = vld [vmem:[%s2434_s9 + $0x160] sm:$0xff]  ;;  %v227_v29 = vld [vmem:[%s2434_s9 + $0x168] sm:$0xff] }
  0x23   : > { %188 = vst [vmem:[%s2439_s10 + $0x48] sm:$0xff] %v187_v9  ;;  %v229_v30 = vld [vmem:[%s2434_s9 + $0x170] sm:$0xff]  ;;  %v231_v31 = vld [vmem:[%s2434_s9 + $0x178] sm:$0xff]  ;;  %v233_v32 = vld [vmem:[%s2434_s9 + $0x200] sm:$0xff] }
  0x24   : > { %190 = vst [vmem:[%s2439_s10 + $0x50] sm:$0xff] %v189_v10  ;;  %v235_v33 = vld [vmem:[%s2434_s9 + $0x208] sm:$0xff]  ;;  %v237_v34 = vld [vmem:[%s2434_s9 + $0x210] sm:$0xff]  ;;  %v239_v35 = vld [vmem:[%s2434_s9 + $0x218] sm:$0xff] }
  0x25   : > { %192 = vst [vmem:[%s2439_s10 + $0x58] sm:$0xff] %v191_v11  ;;  %v241_v36 = vld [vmem:[%s2434_s9 + $0x220] sm:$0xff]  ;;  %v243_v37 = vld [vmem:[%s2434_s9 + $0x228] sm:$0xff]  ;;  %v245_v38 = vld [vmem:[%s2434_s9 + $0x230] sm:$0xff] }
  0x26   : > { %194 = vst [vmem:[%s2439_s10 + $0x60] sm:$0xff] %v193_v12  ;;  %v247_v39 = vld [vmem:[%s2434_s9 + $0x238] sm:$0xff]  ;;  %v249_v40 = vld [vmem:[%s2434_s9 + $0x240] sm:$0xff]  ;;  %v251_v41 = vld [vmem:[%s2434_s9 + $0x248] sm:$0xff] }
  0x27   : > { %196 = vst [vmem:[%s2439_s10 + $0x68] sm:$0xff] %v195_v13  ;;  %v253_v42 = vld [vmem:[%s2434_s9 + $0x250] sm:$0xff]  ;;  %v255_v43 = vld [vmem:[%s2434_s9 + $0x258] sm:$0xff]  ;;  %v257_v44 = vld [vmem:[%s2434_s9 + $0x260] sm:$0xff] }
  0x28   : > { %198 = vst [vmem:[%s2439_s10 + $0x70] sm:$0xff] %v197_v14  ;;  %v259_v45 = vld [vmem:[%s2434_s9 + $0x268] sm:$0xff]  ;;  %v261_v46 = vld [vmem:[%s2434_s9 + $0x270] sm:$0xff]  ;;  %v263_v47 = vld [vmem:[%s2434_s9 + $0x278] sm:$0xff] }
  0x29   : > { %200 = vst [vmem:[%s2439_s10 + $0x78] sm:$0xff] %v199_v15  ;;  %v265_v48 = vld [vmem:[%s2434_s9 + $0x300] sm:$0xff]  ;;  %v267_v49 = vld [vmem:[%s2434_s9 + $0x308] sm:$0xff]  ;;  %v269_v50 = vld [vmem:[%s2434_s9 + $0x310] sm:$0xff] }
  0x2a   : > { %202 = vst [vmem:[%s2439_s10 + $0x80] sm:$0xff] %v201_v16  ;;  %v271_v51 = vld [vmem:[%s2434_s9 + $0x318] sm:$0xff]  ;;  %v273_v52 = vld [vmem:[%s2434_s9 + $0x320] sm:$0xff]  ;;  %v275_v53 = vld [vmem:[%s2434_s9 + $0x328] sm:$0xff] }
  0x2b   : > { %204 = vst [vmem:[%s2439_s10 + $0x88] sm:$0xff] %v203_v17  ;;  %v277_v54 = vld [vmem:[%s2434_s9 + $0x330] sm:$0xff]  ;;  %v279_v55 = vld [vmem:[%s2434_s9 + $0x338] sm:$0xff]  ;;  %v281_v56 = vld [vmem:[%s2434_s9 + $0x340] sm:$0xff] }
  0x2c   : > { %206 = vst [vmem:[%s2439_s10 + $0x90] sm:$0xff] %v205_v18  ;;  %v283_v57 = vld [vmem:[%s2434_s9 + $0x348] sm:$0xff]  ;;  %v285_v58 = vld [vmem:[%s2434_s9 + $0x350] sm:$0xff]  ;;  %v287_v59 = vld [vmem:[%s2434_s9 + $0x358] sm:$0xff] }
  0x2d   : > { %208 = vst [vmem:[%s2439_s10 + $0x98] sm:$0xff] %v207_v19  ;;  %v289_v60 = vld [vmem:[%s2434_s9 + $0x360] sm:$0xff]  ;;  %v291_v61 = vld [vmem:[%s2434_s9 + $0x368] sm:$0xff]  ;;  %v293_v62 = vld [vmem:[%s2434_s9 + $0x370] sm:$0xff] }
  0x2e   : > { %210 = vst [vmem:[%s2439_s10 + $0xa0] sm:$0xff] %v209_v20  ;;  %v295_v63 = vld [vmem:[%s2434_s9 + $0x378] sm:$0xff] }
  0x2f   : > { %212 = vst [vmem:[%s2439_s10 + $0xa8] sm:$0xff] %v211_v21 }
  0x30   : > { %214 = vst [vmem:[%s2439_s10 + $0xb0] sm:$0xff] %v213_v22 }
  0x31   : > { %216 = vst [vmem:[%s2439_s10 + $0xb8] sm:$0xff] %v215_v23 }
  0x32   : > { %218 = vst [vmem:[%s2439_s10 + $0xc0] sm:$0xff] %v217_v24 }
  0x33   : > { %220 = vst [vmem:[%s2439_s10 + $0xc8] sm:$0xff] %v219_v25 }
  0x34   : > { %222 = vst [vmem:[%s2439_s10 + $0xd0] sm:$0xff] %v221_v26 }
  0x35   : > { %224 = vst [vmem:[%s2439_s10 + $0xd8] sm:$0xff] %v223_v27 }
  0x36   : > { %226 = vst [vmem:[%s2439_s10 + $0xe0] sm:$0xff] %v225_v28 }
  0x37   : > { %228 = vst [vmem:[%s2439_s10 + $0xe8] sm:$0xff] %v227_v29 }
  0x38   : > { %230 = vst [vmem:[%s2439_s10 + $0xf0] sm:$0xff] %v229_v30 }
  0x39   : > { %232 = vst [vmem:[%s2439_s10 + $0xf8] sm:$0xff] %v231_v31 }
  0x3a   : > { %234 = vst [vmem:[%s2439_s10 + $0x100] sm:$0xff] %v233_v32 }
  0x3b   : > { %236 = vst [vmem:[%s2439_s10 + $0x108] sm:$0xff] %v235_v33 }
  0x3c   : > { %238 = vst [vmem:[%s2439_s10 + $0x110] sm:$0xff] %v237_v34 }
  0x3d   : > { %240 = vst [vmem:[%s2439_s10 + $0x118] sm:$0xff] %v239_v35 }
  0x3e   : > { %242 = vst [vmem:[%s2439_s10 + $0x120] sm:$0xff] %v241_v36 }
  0x3f   : > { %244 = vst [vmem:[%s2439_s10 + $0x128] sm:$0xff] %v243_v37 }
  0x40   : > { %246 = vst [vmem:[%s2439_s10 + $0x130] sm:$0xff] %v245_v38 }
  0x41   : > { %248 = vst [vmem:[%s2439_s10 + $0x138] sm:$0xff] %v247_v39 }
  0x42   : > { %250 = vst [vmem:[%s2439_s10 + $0x140] sm:$0xff] %v249_v40 }
  0x43   : > { %252 = vst [vmem:[%s2439_s10 + $0x148] sm:$0xff] %v251_v41 }
  0x44   : > { %254 = vst [vmem:[%s2439_s10 + $0x150] sm:$0xff] %v253_v42 }
  0x45   : > { %256 = vst [vmem:[%s2439_s10 + $0x158] sm:$0xff] %v255_v43 }
  0x46   : > { %258 = vst [vmem:[%s2439_s10 + $0x160] sm:$0xff] %v257_v44 }
  0x47   : > { %260 = vst [vmem:[%s2439_s10 + $0x168] sm:$0xff] %v259_v45 }
  0x48   : > { %262 = vst [vmem:[%s2439_s10 + $0x170] sm:$0xff] %v261_v46 }
  0x49   : > { %264 = vst [vmem:[%s2439_s10 + $0x178] sm:$0xff] %v263_v47 }
  0x4a   : > { %266 = vst [vmem:[%s2439_s10 + $0x180] sm:$0xff] %v265_v48 }
  0x4b   : > { %268 = vst [vmem:[%s2439_s10 + $0x188] sm:$0xff] %v267_v49 }
  0x4c   : > { %270 = vst [vmem:[%s2439_s10 + $0x190] sm:$0xff] %v269_v50 }
  0x4d   : > { %272 = vst [vmem:[%s2439_s10 + $0x198] sm:$0xff] %v271_v51 }
  0x4e   : > { %274 = vst [vmem:[%s2439_s10 + $0x1a0] sm:$0xff] %v273_v52 }
  0x4f   : > { %276 = vst [vmem:[%s2439_s10 + $0x1a8] sm:$0xff] %v275_v53 }
  0x50   : > { %278 = vst [vmem:[%s2439_s10 + $0x1b0] sm:$0xff] %v277_v54 }
  0x51   : > { %280 = vst [vmem:[%s2439_s10 + $0x1b8] sm:$0xff] %v279_v55 }
  0x52   : > { %282 = vst [vmem:[%s2439_s10 + $0x1c0] sm:$0xff] %v281_v56 }
  0x53   : > { %284 = vst [vmem:[%s2439_s10 + $0x1c8] sm:$0xff] %v283_v57 }
  0x54   : > { %286 = vst [vmem:[%s2439_s10 + $0x1d0] sm:$0xff] %v285_v58 }
  0x55   : > { %288 = vst [vmem:[%s2439_s10 + $0x1d8] sm:$0xff] %v287_v59 }
  0x56   : > { %290 = vst [vmem:[%s2439_s10 + $0x1e0] sm:$0xff] %v289_v60 }
  0x57   : > { %292 = vst [vmem:[%s2439_s10 + $0x1e8] sm:$0xff] %v291_v61 }
  0x58   : > { %294 = vst [vmem:[%s2439_s10 + $0x1f0] sm:$0xff] %v293_v62 }
  0x59   : > { %296 = vst [vmem:[%s2439_s10 + $0x1f8] sm:$0xff] %v295_v63 }
  0x5a PF: > { %p2220_p9 = scmp.ge.s32.totalorder %s2346_s18, 1  ;;  %p301_p10 = scmp.lt.s32.totalorder %s2346_s18, 5 }
  0x5c   : > { %p302_p11 = pnand %p2220_p9, %p301_p10 }
  0x5e   : > { %305 = sbr.rel (%p302_p11) target bundleno = 962 (0x3c2), region = 51 }
  0x63   : > { %v1548_v0 = vld [vmem:[%s6840_s2] sm:$0xff]  ;;  %v2348_v1 = vmov 0   ;;  %s308_s22 = sand.u32 1, %s2322_s12   ;;  %v397_v26 = vld [vmem:[%s6839_s1 + $0x8] sm:$0xff]  ;;  %v398_v31 = vld [vmem:[%s6839_s1 + $0x10] sm:$0xff]  ;;  %s2226_s26 = sshll.u32 (%p2417_p6), %s2334_s15, 8 }
  0x64   : > { %2289 = vset.pattern.permute.xlu0 %v2348_v1  ;;  %v1557_v2 = vperm.slane %v1548_v0, 0  ;;  %2290 = vset.pattern.permute.xlu1 %v2348_v1  ;;  %v1551_v3 = vrot.slane %v1548_v0, 2  ;;  %v1553_v4 = vrot.slane %v1548_v0, 4  ;;  %v1550_v6 = vrot.slane %v1548_v0, 1  ;;  %s2221_s24 = sshll.u32 %s308_s22, 9  ;;  %v396_v25 = vld [vmem:[%s6839_s1] sm:$0xff] }
  0x65   : > { %2291 = vset.pattern.permute.xlu2 %v2348_v1  ;;  %v1552_v8 = vrot.slane %v1548_v0, 3  ;;  %v1554_v9 = vrot.slane %v1548_v0, 5  ;;  %v1555_v13 = vrot.slane %v1548_v0, 6  ;;  %v1556_v14 = vrot.slane %v1548_v0, 7  ;;  %s2574_s25 = scalar_lea.vmem [#allocation2], %s2221_s24  ;;  %v399_v32 = vld [vmem:[%s6839_s1 + $0x18] sm:$0xff] }
  0x66   : > { %1566 = vperm.xlu0 %2289, %v1557_v2   ;;  %v1559_v5 = vperm.slane %v1551_v3, 0  ;;  %v1561_v7 = vperm.slane %v1553_v4, 0  ;;  %v1558_v10 = vperm.slane %v1550_v6, 0  ;;  %v2577_v17 = vld [vmem:[%s2574_s25] sm:$0xff]  ;;  %v2580_v18 = vld [vmem:[%s2574_s25 + $0x8] sm:$0xff]  ;;  %v2583_v19 = vld [vmem:[%s2574_s25 + $0x10] sm:$0xff] }
  0x67   : > { %v1560_v11 = vperm.slane %v1552_v8, 0  ;;  %v1562_v12 = vperm.slane %v1554_v9, 0  ;;  %v1563_v15 = vperm.slane %v1555_v13, 0  ;;  %v1564_v16 = vperm.slane %v1556_v14, 0  ;;  %6944 = vst [vmem:[#allocation4_spill] sm:$0xff] %v2577_v17  ;;  %v2586_v20 = vld [vmem:[%s2574_s25 + $0x18] sm:$0xff] }
  0x68   : > { %1574 = vperm.xlu1 %2290, %v1559_v5   ;;  %1582 = vperm.xlu2 %2291, %v1561_v7   ;;  %6945 = vst [vmem:[#allocation5_spill] sm:$0xff] %v2580_v18  ;;  %v2589_v21 = vld [vmem:[%s2574_s25 + $0x20] sm:$0xff]  ;;  %v2592_v22 = vld [vmem:[%s2574_s25 + $0x28] sm:$0xff]  ;;  %v2595_v23 = vld [vmem:[%s2574_s25 + $0x30] sm:$0xff]  ;;  %v2659_v43 = vmul.f32 %v396_v25, %v2577_v17  ;;  %v2662_v44 = vmul.f32 %v397_v26, %v2580_v18  ;;  %s2222_s24 = sshll.u32 %s308_s22, 10  ;;  %s2231_s22 = sshll.u32 (%p2417_p6), %s2330_s14, 4 }
  0x69   : > { %6946 = vst [vmem:[#allocation6_spill] sm:$0xff] %v2583_v19  ;;  %v2598_v24 = vld [vmem:[%s2574_s25 + $0x38] sm:$0xff]  ;;  %v2607_v27 = vld [vmem:[%s2574_s25 + $0x40] sm:$0xff]  ;;  %v2610_v28 = vld [vmem:[%s2574_s25 + $0x48] sm:$0xff]  ;;  %v2665_v45 = vmul.f32 %v398_v31, %v2583_v19  ;;  %v2668_v46 = vmul.f32 %v399_v32, %v2586_v20  ;;  %s6024_s12 = scalar_lea.vmem [#allocation3], %s2222_s24  ;;  %s1863_s28 = sadd.s32 (%p2417_p6), %s2231_s22, %s2226_s26 }
  0x6a   : > { %6947 = vst [vmem:[#allocation7_spill] sm:$0xff] %v2586_v20  ;;  %v2613_v29 = vld [vmem:[%s2574_s25 + $0x50] sm:$0xff]  ;;  %v2616_v30 = vld [vmem:[%s2574_s25 + $0x58] sm:$0xff]  ;;  %v400_v33 = vld [vmem:[%s6839_s1 + $0x20] sm:$0xff]  ;;  %v2728_v60 = vmul.f32 %v396_v25, %v2607_v27  ;;  %v2731_v61 = vmul.f32 %v397_v26, %v2610_v28  ;;  %s2227_s29 = sshll.u32 (%p2417_p6), %s1863_s28, 3 }
  0x6b   : > { %6948 = vst [vmem:[#allocation8_spill] sm:$0xff] %v2589_v21  ;;  %v401_v34 = vld [vmem:[%s6839_s1 + $0x28] sm:$0xff]  ;;  %v402_v35 = vld [vmem:[%s6839_s1 + $0x30] sm:$0xff]  ;;  %v403_v36 = vld [vmem:[%s6839_s1 + $0x38] sm:$0xff]  ;;  %v2701_v53 = vmul.f32 %v400_v33, %v2589_v21  ;;  %v2734_v62 = vmul.f32 %v398_v31, %v2613_v29  ;;  %v2737_v63 = vmul.f32 %v399_v32, %v2616_v30  ;;  %s6561_s4 = scalar_lea.vmem (%p2417_p6), %s6841_s3, %s2227_s29 }
  0x6c   : > { %6949 = vst [vmem:[#allocation9_spill] sm:$0xff] %v2592_v22  ;;  %v2637_v37 = vld [vmem:[%s2574_s25 + $0x60] sm:$0xff]  ;;  %v2640_v38 = vld [vmem:[%s2574_s25 + $0x68] sm:$0xff]  ;;  %v2643_v39 = vld [vmem:[%s2574_s25 + $0x70] sm:$0xff]  ;;  %v2704_v54 = vmul.f32 %v401_v34, %v2592_v22  ;;  %v2707_v55 = vmul.f32 %v402_v35, %v2595_v23  ;;  %v2710_v56 = vmul.f32 %v403_v36, %v2598_v24 }
  0x6d   : > { %6950 = vst [vmem:[#allocation10_spill] sm:$0xff] %v2595_v23  ;;  %v2646_v40 = vld [vmem:[%s2574_s25 + $0x78] sm:$0xff]  ;;  %v2651_v41 = vld [vmem:[%s6839_s1 + $0x200] sm:$0xff]  ;;  %v2656_v42 = vld [vmem:[%s6839_s1 + $0x208] sm:$0xff]  ;;  %v2751_v3 = vmul.f32 %v400_v33, %v2637_v37  ;;  %v2754_v4 = vmul.f32 %v401_v34, %v2640_v38  ;;  %v2757_v5 = vmul.f32 %v402_v35, %v2643_v39 }
  0x6e   : > { %1570 = vperm.xlu0 %2289, %v1558_v10   ;;  %6951 = vst [vmem:[#allocation11_spill] sm:$0xff] %v2598_v24  ;;  %v2673_v47 = vld [vmem:[%s6839_s1 + $0x100] sm:$0xff]  ;;  %v2678_v48 = vld [vmem:[%s6839_s1 + $0x108] sm:$0xff]  ;;  %v2683_v49 = vld [vmem:[%s6839_s1 + $0x110] sm:$0xff]  ;;  %v2760_v6 = vmul.f32 %v403_v36, %v2646_v40  ;;  %v2773_v10 = vmul.f32 %v2651_v41, %v2577_v17 }
  0x6f   : > { %6952 = vst [vmem:[#allocation12_spill] sm:$0xff] %v2607_v27  ;;  %v2688_v50 = vld [vmem:[%s6839_s1 + $0x210] sm:$0xff]  ;;  %v2693_v51 = vld [vmem:[%s6839_s1 + $0x218] sm:$0xff]  ;;  %v2698_v52 = vld [vmem:[%s6839_s1 + $0x220] sm:$0xff]  ;;  %v2814_v33 = vmul.f32 %v2673_v47, %v2577_v17  ;;  %v2818_v34 = vmul.f32 %v2678_v48, %v2580_v18  ;;  %v2822_v35 = vmul.f32 %v2683_v49, %v2583_v19 }
  0x70   : > { %1578 = vperm.xlu1 %2290, %v1560_v11   ;;  %1586 = vperm.xlu2 %2291, %v1562_v12   ;;  %6953 = vst [vmem:[#allocation13_spill] sm:$0xff] %v2610_v28  ;;  %v2715_v57 = vld [vmem:[%s6839_s1 + $0x228] sm:$0xff]  ;;  %v2720_v58 = vld [vmem:[%s6839_s1 + $0x230] sm:$0xff]  ;;  %v2725_v59 = vld [vmem:[%s6839_s1 + $0x238] sm:$0xff]  ;;  %v2777_v11 = vmul.f32 %v2656_v42, %v2580_v18  ;;  %v2781_v12 = vmul.f32 %v2688_v50, %v2583_v19 }
  0x71   : > { %6954 = vst [vmem:[#allocation14_spill] sm:$0xff] %v2613_v29  ;;  %v2742_v0 = vld [vmem:[%s6839_s1 + $0x118] sm:$0xff]  ;;  %v524_v1 = vld [vmem:[%s6839_s1 + $0x400] sm:$0xff]  ;;  %v525_v2 = vld [vmem:[%s6839_s1 + $0x408] sm:$0xff]  ;;  %v2785_v13 = vmul.f32 %v2693_v51, %v2586_v20  ;;  %v2798_v25 = vmul.f32 %v2698_v52, %v2589_v21  ;;  %v2802_v26 = vmul.f32 %v2715_v57, %v2592_v22  ;;  %v2806_v31 = vmul.f32 %v2720_v58, %v2595_v23 }
  0x72   : > { %6955 = vst [vmem:[#allocation15_spill] sm:$0xff] %v2616_v30  ;;  %v526_v7 = vld [vmem:[%s6839_s1 + $0x410] sm:$0xff]  ;;  %v527_v8 = vld [vmem:[%s6839_s1 + $0x418] sm:$0xff]  ;;  %v528_v9 = vld [vmem:[%s6839_s1 + $0x420] sm:$0xff]  ;;  %v2810_v32 = vmul.f32 %v2725_v59, %v2598_v24  ;;  %v2826_v36 = vmul.f32 %v2742_v0, %v2586_v20 }
  0x73   : > { %6956 = vst [vmem:[#allocation16_spill] sm:$0xff] %v2637_v37  ;;  %v529_v14 = vld [vmem:[%s6839_s1 + $0x428] sm:$0xff] }
  0x74   : > { %6957 = vst [vmem:[#allocation17_spill] sm:$0xff] %v2640_v38 }
  0x75   : > { %6958 = vst [vmem:[#allocation18_spill] sm:$0xff] %v2643_v39 }
  0x76   : > { %1590 = vperm.xlu0 %2289, %v1563_v15   ;;  %6959 = vst [vmem:[#allocation19_spill] sm:$0xff] %v2646_v40  ;;  %v530_v15 = vld [vmem:[%s6839_s1 + $0x430] sm:$0xff] }
  0x77   : > { %6960 = vst [vmem:[#allocation20_spill] sm:$0xff] %v2651_v41 }
  0x78   : > { %1594 = vperm.xlu1 %2290, %v1564_v16   ;;  %6961 = vst [vmem:[#allocation21_spill] sm:$0xff] %v2656_v42  ;;  %v531_v16 = vld [vmem:[%s6839_s1 + $0x438] sm:$0xff] }
  0x79   : > { %6962 = vst [vmem:[#allocation22_spill] sm:$0xff] %v2659_v43  ;;  %v592_v43 = vld [vmem:[%s6839_s1 + $0x620] sm:$0xff] }
  0x7a   : > { %6963 = vst [vmem:[#allocation23_spill] sm:$0xff] %v2662_v44  ;;  %v591_v44 = vld [vmem:[%s6839_s1 + $0x618] sm:$0xff] }
  0x7b   : > { %6964 = vst [vmem:[#allocation24_spill] sm:$0xff] %v2665_v45  ;;  %v590_v45 = vld [vmem:[%s6839_s1 + $0x610] sm:$0xff] }
  0x7c   : > { %6965 = vst [vmem:[#allocation25_spill] sm:$0xff] %v2668_v46 }
  0x7d   : > { %6966 = vst [vmem:[#allocation26_spill] sm:$0xff] %v2673_v47  ;;  %v2994_v47 = vmul.f32 %v590_v45, %v2583_v19 }
  0x7e   : > { %6967 = vst [vmem:[#allocation27_spill] sm:$0xff] %v2678_v48 }
  0x7f   : > { %6968 = vst [vmem:[#allocation28_spill] sm:$0xff] %v2683_v49 }
  0x80   : > { %6969 = vst [vmem:[#allocation29_spill] sm:$0xff] %v2688_v50  ;;  %v595_v50 = vld [vmem:[%s6839_s1 + $0x638] sm:$0xff] }
  0x81   : > { %6970 = vst [vmem:[#allocation30_spill] sm:$0xff] %v2693_v51  ;;  %v594_v51 = vld [vmem:[%s6839_s1 + $0x630] sm:$0xff] }
  0x82   : > { %6971 = vst [vmem:[#allocation31_spill] sm:$0xff] %v2698_v52  ;;  %v593_v52 = vld [vmem:[%s6839_s1 + $0x628] sm:$0xff] }
  0x83   : > { %6972 = vst [vmem:[#allocation32_spill] sm:$0xff] %v2701_v53 }
  0x84   : > { %6973 = vst [vmem:[#allocation33_spill] sm:$0xff] %v2704_v54 }
  0x85   : > { %6974 = vst [vmem:[#allocation34_spill] sm:$0xff] %v2707_v55 }
  0x86   : > { %6975 = vst [vmem:[#allocation35_spill] sm:$0xff] %v2710_v56 }
  0x87   : > { %6976 = vst [vmem:[#allocation36_spill] sm:$0xff] %v2715_v57 }
  0x88   : > { %6977 = vst [vmem:[#allocation37_spill] sm:$0xff] %v2720_v58 }
  0x89   : > { %6978 = vst [vmem:[#allocation38_spill] sm:$0xff] %v2725_v59 }
  0x8a   : > { %6979 = vst [vmem:[#allocation39_spill] sm:$0xff] %v2728_v60  ;;  %v563_v60 = vld [vmem:[%s6839_s1 + $0x538] sm:$0xff] }
  0x8b   : > { %6980 = vst [vmem:[#allocation40_spill] sm:$0xff] %v2731_v61  ;;  %v562_v61 = vld [vmem:[%s6839_s1 + $0x530] sm:$0xff]  ;;  %v2943_v58 = vmul.f32 %v563_v60, %v2598_v24  ;;  %v2970_v41 = vmul.f32 %v563_v60, %v2646_v40  ;;  %v621_v60 = vld [vmem:[%s6839_s1 + $0x708] sm:$0xff] }
  0x8c   : > { %6981 = vst [vmem:[#allocation41_spill] sm:$0xff] %v2734_v62  ;;  %v2880_v62 = vmul.f32 %v527_v8, %v2616_v30  ;;  %v2940_v59 = vmul.f32 %v562_v61, %v2595_v23 }
  0x8d   : > { %6982 = vst [vmem:[#allocation42_spill] sm:$0xff] %v2737_v63  ;;  %v2877_v63 = vmul.f32 %v526_v7, %v2613_v29 }
  0x8e   : > { %6983 = vst [vmem:[#allocation43_spill] sm:$0xff] %v2742_v0 }
  0x8f   : > { %6984 = vst [vmem:[#allocation44_spill] sm:$0xff] %v2751_v3  ;;  %v2874_v3 = vmul.f32 %v525_v2, %v2610_v28 }
  0x90   : > { %6985 = vst [vmem:[#allocation45_spill] sm:$0xff] %v2754_v4  ;;  %v2871_v4 = vmul.f32 %v524_v1, %v2607_v27 }
  0x91   : > { %6986 = vst [vmem:[#allocation46_spill] sm:$0xff] %v2757_v5  ;;  %v561_v5 = vld [vmem:[%s6839_s1 + $0x528] sm:$0xff] }
  0x92   : > { %6987 = vst [vmem:[#allocation47_spill] sm:$0xff] %v2760_v6  ;;  %v560_v6 = vld [vmem:[%s6839_s1 + $0x520] sm:$0xff]  ;;  %v2925_v46 = vmul.f32 %v561_v5, %v2592_v22 }
  0x93   : > { %6988 = vst [vmem:[#allocation48_spill] sm:$0xff] %v2773_v10  ;;  %v2850_v10 = vmul.f32 %v528_v9, %v2589_v21  ;;  %v2922_v53 = vmul.f32 %v560_v6, %v2589_v21  ;;  %v2961_v42 = vmul.f32 %v560_v6, %v2637_v37 }
  0x94   : > { %6989 = vst [vmem:[#allocation49_spill] sm:$0xff] %v2777_v11  ;;  %v558_v11 = vld [vmem:[%s6839_s1 + $0x510] sm:$0xff] }
  0x95   : > { %6990 = vst [vmem:[#allocation50_spill] sm:$0xff] %v2781_v12  ;;  %v557_v12 = vld [vmem:[%s6839_s1 + $0x508] sm:$0xff]  ;;  %v2907_v54 = vmul.f32 %v558_v11, %v2583_v19 }
  0x96   : > { %6991 = vst [vmem:[#allocation51_spill] sm:$0xff] %v2785_v13  ;;  %v556_v13 = vld [vmem:[%s6839_s1 + $0x500] sm:$0xff]  ;;  %v2904_v55 = vmul.f32 %v557_v12, %v2580_v18 }
  0x97   : > { %6992 = vst [vmem:[#allocation52_spill] sm:$0xff] %v2798_v25  ;;  %v2838_v25 = vmul.f32 %v527_v8, %v2586_v20  ;;  %v2898_v8 = vmul.f32 %v531_v16, %v2646_v40  ;;  %v2901_v56 = vmul.f32 %v556_v13, %v2577_v17 }
  0x98   : > { %6993 = vst [vmem:[#allocation53_spill] sm:$0xff] %v2802_v26  ;;  %v2835_v26 = vmul.f32 %v526_v7, %v2583_v19  ;;  %v2895_v7 = vmul.f32 %v530_v15, %v2643_v39 }
  0x99   : > { %6994 = vst [vmem:[#allocation54_spill] sm:$0xff] %v2806_v31  ;;  %v2829_v31 = vmul.f32 %v524_v1, %v2577_v17  ;;  %v2889_v1 = vmul.f32 %v528_v9, %v2637_v37  ;;  %v2910_v9 = vmul.f32 %v556_v13, %v2607_v27  ;;  %v2928_v13 = vmul.f32 %v557_v12, %v2610_v28 }
  0x9a   : > { %6995 = vst [vmem:[#allocation55_spill] sm:$0xff] %v2810_v32  ;;  %v2832_v32 = vmul.f32 %v525_v2, %v2580_v18  ;;  %v2892_v2 = vmul.f32 %v529_v14, %v2640_v38  ;;  %v2946_v12 = vmul.f32 %v558_v11, %v2613_v29  ;;  %v2964_v11 = vmul.f32 %v561_v5, %v2640_v38  ;;  %v622_v5 = vld [vmem:[%s6839_s1 + $0x710] sm:$0xff] }
  0x9b   : > { %6996 = vst [vmem:[#allocation56_spill] sm:$0xff] %v2814_v33  ;;  %v559_v33 = vld [vmem:[%s6839_s1 + $0x518] sm:$0xff] }
  0x9c   : > { %6997 = vst [vmem:[#allocation57_spill] sm:$0xff] %v2818_v34  ;;  %v2859_v34 = vmul.f32 %v531_v16, %v2598_v24  ;;  %v2919_v16 = vmul.f32 %v559_v33, %v2586_v20  ;;  %v2949_v57 = vmul.f32 %v559_v33, %v2616_v30  ;;  %v2967_v33 = vmul.f32 %v562_v61, %v2643_v39  ;;  %v620_v61 = vld [vmem:[%s6839_s1 + $0x700] sm:$0xff] }
  0x9d   : > { %6998 = vst [vmem:[#allocation58_spill] sm:$0xff] %v2822_v35  ;;  %v2856_v35 = vmul.f32 %v530_v15, %v2595_v23  ;;  %v589_v15 = vld [vmem:[%s6839_s1 + $0x608] sm:$0xff] }
  0x9e   : > { %6999 = vst [vmem:[#allocation59_spill] sm:$0xff] %v2826_v36  ;;  %v2853_v36 = vmul.f32 %v529_v14, %v2592_v22  ;;  %v588_v14 = vld [vmem:[%s6839_s1 + $0x600] sm:$0xff]  ;;  %v2976_v49 = vmul.f32 %v589_v15, %v2580_v18  ;;  %v2982_v6 = vmul.f32 %v589_v15, %v2610_v28  ;;  %v3000_v15 = vmul.f32 %v592_v43, %v2589_v21 }
  0x9f   : > { %7000 = vst [vmem:[#allocation60_spill] sm:$0xff] %v2892_v2  ;;  %v2973_v0 = vmul.f32 %v588_v14, %v2577_v17  ;;  %v2979_v48 = vmul.f32 %v588_v14, %v2607_v27  ;;  %v2997_v14 = vmul.f32 %v591_v44, %v2586_v20 }
  0xa0   : > { %7001 = vst [vmem:[#allocation61_spill] sm:$0xff] %v2895_v7 }
  0xa1   : > { %7002 = vst [vmem:[#allocation62_spill] sm:$0xff] %v2898_v8  ;;  %v601_v8 = vld [vmem:[%s6839_s1 + $0x668] sm:$0xff] }
  0xa2   : > { %7003 = vst [vmem:[#allocation63_spill] sm:$0xff] %v2901_v56  ;;  %v599_v56 = vld [vmem:[%s6839_s1 + $0x658] sm:$0xff] }
  0xa3   : > { %7004 = vst [vmem:[#allocation64_spill] sm:$0xff] %v2904_v55 }
  0xa4   : > { %7005 = vst [vmem:[#allocation65_spill] sm:$0xff] %v2907_v54 }
  0xa5   : > { %7006 = vst [vmem:[#allocation66_spill] sm:$0xff] %v2910_v9  ;;  %v571_v9 = vld [vmem:[%s6839_s1 + $0x578] sm:$0xff] }
  0xa6   : > { %7007 = vst [vmem:[#allocation67_spill] sm:$0xff] %v2919_v16 }
  0xa7   : > { %7008 = vst [vmem:[#allocation68_spill] sm:$0xff] %v2922_v53 }
  0xa8   : > { %7009 = vst [vmem:[#allocation69_spill] sm:$0xff] %v2925_v46 }
  0xa9   : > { %7010 = vst [vmem:[#allocation70_spill] sm:$0xff] %v2928_v13  ;;  %v570_v13 = vld [vmem:[%s6839_s1 + $0x570] sm:$0xff] }
  0xaa   : > { %7011 = vst [vmem:[#allocation71_spill] sm:$0xff] %v2940_v59 }
  0xab   : > { %7012 = vst [vmem:[#allocation72_spill] sm:$0xff] %v2943_v58 }
  0xac   : > { %7013 = vst [vmem:[#allocation73_spill] sm:$0xff] %v2946_v12  ;;  %v3138_v12 = vld [vmem:[%s2574_s25 + $0xd8] sm:$0xff] }
  0xad   : > { %7014 = vst [vmem:[#allocation74_spill] sm:$0xff] %v2949_v57  ;;  %v3135_v57 = vld [vmem:[%s2574_s25 + $0xd0] sm:$0xff] }
  0xae   : > { %7015 = vst [vmem:[#allocation75_spill] sm:$0xff] %v2961_v42  ;;  %v3132_v42 = vld [vmem:[%s2574_s25 + $0xc8] sm:$0xff] }
  0xaf   : > { %7016 = vst [vmem:[#allocation76_spill] sm:$0xff] %v2964_v11  ;;  %v3102_v11 = vld [vmem:[%s2574_s25 + $0xb0] sm:$0xff] }
  0xb0   : > { %7017 = vst [vmem:[#allocation77_spill] sm:$0xff] %v2967_v33  ;;  %v533_v33 = vld [vmem:[%s6839_s1 + $0x448] sm:$0xff] }
  0xb1   : > { %7018 = vst [vmem:[#allocation78_spill] sm:$0xff] %v2970_v41  ;;  %v3033_v41 = vmul.f32 %v592_v43, %v2637_v37  ;;  %v3051_v43 = vmul.f32 %v620_v61, %v2577_v17  ;;  %v3072_v17 = vld [vmem:[%s2574_s25 + $0x98] sm:$0xff]  ;;  %v3216_v59 = vmul.f32 %v533_v33, %v3132_v42 }
  0xb2   : > { %7019 = vst [vmem:[#allocation79_spill] sm:$0xff] %v2973_v0  ;;  %v626_v0 = vld [vmem:[%s6839_s1 + $0x730] sm:$0xff] }
  0xb3   : > { %7020 = vst [vmem:[#allocation80_spill] sm:$0xff] %v2976_v49  ;;  %v624_v49 = vld [vmem:[%s6839_s1 + $0x720] sm:$0xff] }
  0xb4   : > { %7021 = vst [vmem:[#allocation81_spill] sm:$0xff] %v2979_v48  ;;  %v623_v48 = vld [vmem:[%s6839_s1 + $0x718] sm:$0xff] }
  0xb5   : > { %7022 = vst [vmem:[#allocation82_spill] sm:$0xff] %v2982_v6  ;;  %v3003_v6 = vmul.f32 %v590_v45, %v2613_v29  ;;  %v3021_v45 = vmul.f32 %v595_v50, %v2598_v24 }
  0xb6   : > { %7023 = vst [vmem:[#allocation83_spill] sm:$0xff] %v2994_v47  ;;  %v625_v47 = vld [vmem:[%s6839_s1 + $0x728] sm:$0xff] }
  0xb7   : > { %7024 = vst [vmem:[#allocation84_spill] sm:$0xff] %v2997_v14  ;;  %v3015_v14 = vmul.f32 %v593_v52, %v2592_v22 }
  0xb8   : > { %7025 = vst [vmem:[#allocation85_spill] sm:$0xff] %v3000_v15  ;;  %v3018_v15 = vmul.f32 %v594_v51, %v2595_v23 }
  0xb9   : > { %7026 = vst [vmem:[#allocation86_spill] sm:$0xff] %v3003_v6  ;;  %v3024_v6 = vmul.f32 %v591_v44, %v2616_v30  ;;  %v3042_v44 = vmul.f32 %v595_v50, %v2646_v40  ;;  %v3057_v50 = vmul.f32 %v622_v5, %v2583_v19  ;;  %v535_v19 = vld [vmem:[%s6839_s1 + $0x458] sm:$0xff] }
  0xba   : > { %7027 = vst [vmem:[#allocation87_spill] sm:$0xff] %v3015_v14  ;;  %v627_v14 = vld [vmem:[%s6839_s1 + $0x738] sm:$0xff]  ;;  %v3222_v53 = vmul.f32 %v535_v19, %v3138_v12 }
  0xbb   : > { %7028 = vst [vmem:[#allocation88_spill] sm:$0xff] %v3018_v15  ;;  %v3036_v15 = vmul.f32 %v593_v52, %v2640_v38  ;;  %v3054_v52 = vmul.f32 %v621_v60, %v2580_v18  ;;  %v534_v18 = vld [vmem:[%s6839_s1 + $0x450] sm:$0xff] }
  0xbc   : > { %7029 = vst [vmem:[#allocation89_spill] sm:$0xff] %v3021_v45  ;;  %v3039_v45 = vmul.f32 %v594_v51, %v2643_v39  ;;  %v3060_v51 = vmul.f32 %v620_v61, %v2607_v27  ;;  %v536_v61 = vld [vmem:[%s6839_s1 + $0x460] sm:$0xff]  ;;  %v3084_v27 = vmul.f32 %v623_v48, %v2586_v20  ;;  %v3105_v20 = vld [vmem:[%s2574_s25 + $0xb8] sm:$0xff]  ;;  %v3219_v46 = vmul.f32 %v534_v18, %v3135_v57 }
  0xbd   : > { %7030 = vst [vmem:[#allocation90_spill] sm:$0xff] %v3024_v6  ;;  %v532_v6 = vld [vmem:[%s6839_s1 + $0x440] sm:$0xff] }
  0xbe   : > { %7031 = vst [vmem:[#allocation91_spill] sm:$0xff] %v3033_v41  ;;  %v3099_v41 = vld [vmem:[%s2574_s25 + $0xa8] sm:$0xff] }
  0xbf   : > { %7032 = vst [vmem:[#allocation92_spill] sm:$0xff] %v3036_v15  ;;  %v3069_v15 = vld [vmem:[%s2574_s25 + $0x90] sm:$0xff] }
  0xc0   : > { %7033 = vst [vmem:[#allocation93_spill] sm:$0xff] %v3039_v45  ;;  %v3066_v45 = vld [vmem:[%s2574_s25 + $0x88] sm:$0xff] }
  0xc1   : > { %7034 = vst [vmem:[#allocation94_spill] sm:$0xff] %v3042_v44  ;;  %v3063_v44 = vld [vmem:[%s2574_s25 + $0x80] sm:$0xff] }
  0xc2   : > { %7035 = vst [vmem:[#allocation95_spill] sm:$0xff] %v3051_v43  ;;  %v3096_v43 = vld [vmem:[%s2574_s25 + $0xa0] sm:$0xff] }
  0xc3   : > { %7036 = vst [vmem:[#allocation96_spill] sm:$0xff] %v3054_v52  ;;  %v3093_v52 = vmul.f32 %v621_v60, %v2610_v28  ;;  %v539_v60 = vld [vmem:[%s6839_s1 + $0x478] sm:$0xff]  ;;  %v3117_v28 = vmul.f32 %v626_v0, %v2595_v23  ;;  %v3141_v23 = vmul.f32 %v624_v49, %v2637_v37 }
  0xc4   : > { %7037 = vst [vmem:[#allocation97_spill] sm:$0xff] %v3057_v50  ;;  %v3090_v50 = vmul.f32 %v625_v47, %v2592_v22  ;;  %v538_v22 = vld [vmem:[%s6839_s1 + $0x470] sm:$0xff]  ;;  %v567_v37 = vld [vmem:[%s6839_s1 + $0x558] sm:$0xff] }
  0xc5   : > { %7038 = vst [vmem:[#allocation98_spill] sm:$0xff] %v3060_v51  ;;  %v3087_v51 = vmul.f32 %v624_v49, %v2589_v21  ;;  %v537_v21 = vld [vmem:[%s6839_s1 + $0x468] sm:$0xff]  ;;  %v564_v49 = vld [vmem:[%s6839_s1 + $0x540] sm:$0xff]  ;;  %v3294_v7 = vmul.f32 %v567_v37, %v3138_v12 }
  0xc6   : > { %7039 = vst [vmem:[#allocation99_spill] sm:$0xff] %v3063_v44 }
  0xc7   : > { %7040 = vst [vmem:[#allocation100_spill] sm:$0xff] %v3066_v45 }
  0xc8   : > { %7041 = vst [vmem:[#allocation101_spill] sm:$0xff] %v3069_v15 }
  0xc9   : > { %7042 = vst [vmem:[#allocation102_spill] sm:$0xff] %v3072_v17 }
  0xca   : > { %7043 = vst [vmem:[#allocation103_spill] sm:$0xff] %v3084_v27  ;;  %v3129_v27 = vld [vmem:[%s2574_s25 + $0xc0] sm:$0xff] }
  0xcb   : > { %7044 = vst [vmem:[#allocation104_spill] sm:$0xff] %v3087_v51  ;;  %v3126_v51 = vmul.f32 %v623_v48, %v2616_v30  ;;  %v3150_v48 = vmul.f32 %v627_v14, %v2646_v40  ;;  %v3153_v30 = vld [vmem:[%s2574_s25 + $0xe0] sm:$0xff]  ;;  %v3177_v40 = vmul.f32 %v534_v18, %v3069_v15  ;;  %v3213_v58 = vmul.f32 %v532_v6, %v3129_v27 }
  0xcc   : > { %7045 = vst [vmem:[#allocation105_spill] sm:$0xff] %v3090_v50  ;;  %v3123_v50 = vmul.f32 %v622_v5, %v2613_v29  ;;  %v3147_v5 = vmul.f32 %v626_v0, %v2643_v39  ;;  %v3156_v29 = vld [vmem:[%s2574_s25 + $0xe8] sm:$0xff]  ;;  %v3171_v0 = vmul.f32 %v532_v6, %v3063_v44  ;;  %v3180_v39 = vmul.f32 %v535_v19, %v3072_v17  ;;  %v596_v18 = vld [vmem:[%s6839_s1 + $0x640] sm:$0xff] }
  0xcd   : > { %7046 = vst [vmem:[#allocation106_spill] sm:$0xff] %v3093_v52  ;;  %v3120_v52 = vmul.f32 %v627_v14, %v2598_v24  ;;  %v3144_v24 = vmul.f32 %v625_v47, %v2640_v38  ;;  %v565_v47 = vld [vmem:[%s6839_s1 + $0x548] sm:$0xff]  ;;  %v3174_v14 = vmul.f32 %v533_v33, %v3066_v45  ;;  %v566_v38 = vld [vmem:[%s6839_s1 + $0x550] sm:$0xff]  ;;  %v3225_v16 = vmul.f32 %v536_v61, %v3153_v30 }
  0xce   : > { %7047 = vst [vmem:[#allocation107_spill] sm:$0xff] %v3096_v43  ;;  %v3228_v54 = vmul.f32 %v537_v21, %v3156_v29  ;;  %v597_v19 = vld [vmem:[%s6839_s1 + $0x648] sm:$0xff]  ;;  %v3243_v33 = vmul.f32 %v564_v49, %v3063_v44 }
  0xcf   : > { %7048 = vst [vmem:[#allocation108_spill] sm:$0xff] %v3099_v41 }
  0xd0   : > { %7049 = vst [vmem:[#allocation109_spill] sm:$0xff] %v3102_v11 }
  0xd1   : > { %7050 = vst [vmem:[#allocation110_spill] sm:$0xff] %v3105_v20 }
  0xd2   : > { %7051 = vst [vmem:[#allocation111_spill] sm:$0xff] %v3117_v28  ;;  %v569_v28 = vld [vmem:[%s6839_s1 + $0x568] sm:$0xff] }
  0xd3   : > { %7052 = vst [vmem:[#allocation112_spill] sm:$0xff] %v3120_v52  ;;  %v3201_v52 = vmul.f32 %v539_v60, %v3105_v20  ;;  %v3300_v2 = vmul.f32 %v569_v28, %v3156_v29 }
  0xd4   : > { %7053 = vst [vmem:[#allocation113_spill] sm:$0xff] %v3123_v50  ;;  %v3162_v50 = vld [vmem:[%s2574_s25 + $0xf8] sm:$0xff] }
  0xd5   : > { %7054 = vst [vmem:[#allocation114_spill] sm:$0xff] %v3126_v51  ;;  %v3159_v51 = vld [vmem:[%s2574_s25 + $0xf0] sm:$0xff]  ;;  %v3234_v6 = vmul.f32 %v539_v60, %v3162_v50 }
  0xd6   : > { %7055 = vst [vmem:[#allocation115_spill] sm:$0xff] %v3141_v23  ;;  %v3198_v23 = vmul.f32 %v538_v22, %v3102_v11  ;;  %v3231_v55 = vmul.f32 %v538_v22, %v3159_v51  ;;  %v3249_v22 = vmul.f32 %v566_v38, %v3069_v15  ;;  %v598_v60 = vld [vmem:[%s6839_s1 + $0x650] sm:$0xff] }
  0xd7   : > { %7056 = vst [vmem:[#allocation116_spill] sm:$0xff] %v3144_v24  ;;  %v3195_v24 = vmul.f32 %v537_v21, %v3099_v41  ;;  %v3246_v21 = vmul.f32 %v565_v47, %v3066_v45 }
  0xd8   : > { %7057 = vst [vmem:[#allocation117_spill] sm:$0xff] %v3147_v5  ;;  %v3192_v5 = vmul.f32 %v536_v61, %v3096_v43  ;;  %v3252_v61 = vmul.f32 %v567_v37, %v3072_v17  ;;  %v629_v37 = vld [vmem:[%s6839_s1 + $0x748] sm:$0xff] }
  0xd9   : > { %7058 = vst [vmem:[#allocation118_spill] sm:$0xff] %v3150_v48  ;;  %v568_v48 = vld [vmem:[%s6839_s1 + $0x560] sm:$0xff] }
  0xda   : > { %7059 = vst [vmem:[#allocation119_spill] sm:$0xff] %v3225_v16  ;;  %v3303_v16 = vmul.f32 %v570_v13, %v3159_v51 }
  0xdb   : > { %7060 = vst [vmem:[#allocation120_spill] sm:$0xff] %v3228_v54  ;;  %v3297_v54 = vmul.f32 %v568_v48, %v3153_v30 }
  0xdc   : > { %7061 = vst [vmem:[#allocation121_spill] sm:$0xff] %v3231_v55  ;;  %v602_v55 = vld [vmem:[%s6839_s1 + $0x670] sm:$0xff] }
  0xdd   : > { %7062 = vst [vmem:[#allocation122_spill] sm:$0xff] %v3234_v6  ;;  %v3273_v6 = vmul.f32 %v571_v9, %v3105_v20 }
  0xde   : > { %7063 = vst [vmem:[#allocation123_spill] sm:$0xff] %v3243_v33  ;;  %v600_v33 = vld [vmem:[%s6839_s1 + $0x660] sm:$0xff] }
  0xdf   : > { %7064 = vst [vmem:[#allocation124_spill] sm:$0xff] %v3246_v21  ;;  %v3264_v21 = vmul.f32 %v568_v48, %v3096_v43  ;;  %v3315_v48 = vmul.f32 %v596_v18, %v3063_v44 }
  0xe0   : > { %7065 = vst [vmem:[#allocation125_spill] sm:$0xff] %v3249_v22  ;;  %v3267_v22 = vmul.f32 %v569_v28, %v3099_v41  ;;  %v3318_v28 = vmul.f32 %v597_v19, %v3066_v45 }
  0xe1   : > { %7066 = vst [vmem:[#allocation126_spill] sm:$0xff] %v3252_v61  ;;  %v3270_v61 = vmul.f32 %v570_v13, %v3102_v11  ;;  %v3321_v13 = vmul.f32 %v598_v60, %v3069_v15 }
  0xe2   : > { %7067 = vst [vmem:[#allocation127_spill] sm:$0xff] %v3264_v21  ;;  %v603_v21 = vld [vmem:[%s6839_s1 + $0x678] sm:$0xff] }
  0xe3   : > { %7068 = vst [vmem:[#allocation128_spill] sm:$0xff] %v3267_v22  ;;  %v3285_v22 = vmul.f32 %v564_v49, %v3129_v27  ;;  %v3306_v49 = vmul.f32 %v571_v9, %v3162_v50  ;;  %v3324_v9 = vmul.f32 %v599_v56, %v3072_v17 }
  0xe4   : > { %7069 = vst [vmem:[#allocation129_spill] sm:$0xff] %v3270_v61  ;;  %v3288_v61 = vmul.f32 %v565_v47, %v3132_v42  ;;  %v630_v47 = vld [vmem:[%s6839_s1 + $0x750] sm:$0xff] }
  0xe5   : > { %7070 = vst [vmem:[#allocation130_spill] sm:$0xff] %v3273_v6  ;;  %v3291_v6 = vmul.f32 %v566_v38, %v3135_v57  ;;  %v628_v38 = vld [vmem:[%s6839_s1 + $0x740] sm:$0xff] }
  0xe6   : > { %7071 = vst [vmem:[#allocation131_spill] sm:$0xff] %v3285_v22  ;;  %v3375_v22 = vmul.f32 %v602_v55, %v3159_v51 }
  0xe7   : > { %7072 = vst [vmem:[#allocation132_spill] sm:$0xff] %v3288_v61  ;;  %v3372_v61 = vmul.f32 %v601_v8, %v3156_v29 }
  0xe8   : > { %7073 = vst [vmem:[#allocation133_spill] sm:$0xff] %v3291_v6  ;;  %v3369_v6 = vmul.f32 %v600_v33, %v3153_v30 }
  0xe9   : > { %7074 = vst [vmem:[#allocation134_spill] sm:$0xff] %v3294_v7  ;;  %v3366_v7 = vmul.f32 %v599_v56, %v3138_v12  ;;  %v3387_v56 = vmul.f32 %v630_v47, %v3069_v15  ;;  %v3408_v15 = vmul.f32 %v629_v37, %v3132_v42 }
  0xea   : > { %7075 = vst [vmem:[#allocation135_spill] sm:$0xff] %v3297_v54  ;;  %v634_v54 = vld [vmem:[%s6839_s1 + $0x770] sm:$0xff] }
  0xeb   : > { %7076 = vst [vmem:[#allocation136_spill] sm:$0xff] %v3300_v2  ;;  %v633_v2 = vld [vmem:[%s6839_s1 + $0x768] sm:$0xff] }
  0xec   : > { %7077 = vst [vmem:[#allocation137_spill] sm:$0xff] %v3303_v16  ;;  %v3345_v16 = vmul.f32 %v603_v21, %v3105_v20 }
  0xed   : > { %7078 = vst [vmem:[#allocation138_spill] sm:$0xff] %v3306_v49  ;;  %v631_v49 = vld [vmem:[%s6839_s1 + $0x758] sm:$0xff] }
  0xee   : > { %7079 = vst [vmem:[#allocation139_spill] sm:$0xff] %v3315_v48  ;;  %v632_v48 = vld [vmem:[%s6839_s1 + $0x760] sm:$0xff] }
  0xef   : > { %7080 = vst [vmem:[#allocation140_spill] sm:$0xff] %v3318_v28  ;;  %v3336_v28 = vmul.f32 %v600_v33, %v3096_v43  ;;  %v3390_v33 = vmul.f32 %v631_v49, %v3072_v17  ;;  %v3411_v17 = vmul.f32 %v630_v47, %v3135_v57 }
  0xf0   : > { %7081 = vst [vmem:[#allocation141_spill] sm:$0xff] %v3321_v13  ;;  %v3339_v13 = vmul.f32 %v601_v8, %v3099_v41  ;;  %v3393_v8 = vmul.f32 %v632_v48, %v3096_v43  ;;  %v3414_v43 = vmul.f32 %v631_v49, %v3138_v12  ;;  %v3434_v49 = vadd.f32 %v3174_v14, %v2832_v32  ;;  %v7116_v14 = vld [vmem:[#allocation65_spill] sm:$0xff] }
  0xf1   : > { %7082 = vst [vmem:[#allocation142_spill] sm:$0xff] %v3324_v9  ;;  %v3342_v9 = vmul.f32 %v602_v55, %v3102_v11  ;;  %v3396_v55 = vmul.f32 %v633_v2, %v3099_v41  ;;  %v3417_v41 = vmul.f32 %v632_v48, %v3153_v30  ;;  %v3438_v48 = vadd.f32 %v3177_v40, %v2835_v26 }
  0xf2   : > { %7083 = vst [vmem:[#allocation143_spill] sm:$0xff] %v3336_v28  ;;  %v635_v28 = vld [vmem:[%s6839_s1 + $0x778] sm:$0xff]  ;;  %v3454_v32 = vadd.f32 %v3198_v23, %v2856_v35  ;;  %v3458_v40 = vadd.f32 %v3201_v52, %v2859_v34  ;;  %v3474_v23 = vadd.f32 %v3222_v53, %v2880_v62  ;;  %v7101_v34 = vld [vmem:[#allocation60_spill] sm:$0xff]  ;;  %v7108_v52 = vld [vmem:[#allocation122_spill] sm:$0xff] }
  0xf3   : > { %7084 = vst [vmem:[#allocation144_spill] sm:$0xff] %v3339_v13  ;;  %v3357_v13 = vmul.f32 %v596_v18, %v3129_v27  ;;  %v3378_v18 = vmul.f32 %v603_v21, %v3162_v50  ;;  %v3399_v21 = vmul.f32 %v634_v54, %v3102_v11  ;;  %v3420_v11 = vmul.f32 %v633_v2, %v3156_v29  ;;  %v7102_v35 = vld [vmem:[#allocation120_spill] sm:$0xff] }
  0xf4   : > { %7085 = vst [vmem:[#allocation145_spill] sm:$0xff] %v3342_v9  ;;  %v3360_v9 = vmul.f32 %v597_v19, %v3132_v42  ;;  %v3381_v19 = vmul.f32 %v628_v38, %v3063_v44  ;;  %v3402_v44 = vmul.f32 %v635_v28, %v3105_v20  ;;  %v3423_v20 = vmul.f32 %v634_v54, %v3159_v51  ;;  %v7113_v62 = vld [vmem:[#allocation64_spill] sm:$0xff] }
  0xf5   : > { %7086 = vst [vmem:[#allocation146_spill] sm:$0xff] %v3345_v16  ;;  %v3363_v16 = vmul.f32 %v598_v60, %v3135_v57  ;;  %v3384_v60 = vmul.f32 %v629_v37, %v3066_v45  ;;  %v3405_v45 = vmul.f32 %v628_v38, %v3129_v27  ;;  %v3426_v38 = vmul.f32 %v635_v28, %v3162_v50  ;;  %v7117_v28 = vld [vmem:[#allocation125_spill] sm:$0xff] }
  0xf6   : > { %v3430_v37 = vadd.f32 %v3171_v0, %v2829_v31  ;;  %7088 = vst [vmem:[#allocation148_spill] sm:$0xff] %v3434_v49  ;;  %v3442_v2 = vadd.f32 %v3180_v39, %v2838_v25  ;;  %v3446_v54 = vadd.f32 %v3192_v5, %v2850_v10  ;;  %v3450_v31 = vadd.f32 %v3195_v24, %v2853_v36  ;;  %v7099_v25 = vld [vmem:[#allocation119_spill] sm:$0xff]  ;;  %v7105_v36 = vld [vmem:[#allocation121_spill] sm:$0xff]  ;;  %v7114_v0 = vld [vmem:[#allocation124_spill] sm:$0xff] }
  0xf7   : > { %7089 = vst [vmem:[#allocation149_spill] sm:$0xff] %v3438_v48  ;;  %v3462_v39 = vadd.f32 %v3213_v58, %v2871_v4  ;;  %v3466_v10 = vadd.f32 %v3216_v59, %v2874_v3  ;;  %v3470_v24 = vadd.f32 %v3219_v46, %v2877_v63  ;;  %v3478_v26 = vadd.f32 %v7099_v25, %v2889_v1  ;;  %v7104_v4 = vld [vmem:[#allocation61_spill] sm:$0xff]  ;;  %v7107_v3 = vld [vmem:[#allocation62_spill] sm:$0xff]  ;;  %v7110_v63 = vld [vmem:[#allocation63_spill] sm:$0xff] }
  0xf8   : > { %7087 = vst [vmem:[#allocation147_spill] sm:$0xff] %v3430_v37  ;;  %v3482_v58 = vadd.f32 %v7102_v35, %v7101_v34  ;;  %v3486_v59 = vadd.f32 %v7105_v36, %v7104_v4  ;;  %v3490_v46 = vadd.f32 %v7108_v52, %v7107_v3  ;;  %v7111_v5 = vld [vmem:[#allocation123_spill] sm:$0xff]  ;;  %v3498_v1 = vadd.f32 %v7114_v0, %v7113_v62  ;;  %v7120_v34 = vld [vmem:[#allocation126_spill] sm:$0xff]  ;;  %v7122_v4 = vld [vmem:[#allocation68_spill] sm:$0xff] }
  0xf9   : > { %7090 = vst [vmem:[#allocation150_spill] sm:$0xff] %v3442_v2  ;;  %v3494_v53 = vadd.f32 %v7111_v5, %v7110_v63  ;;  %v3502_v47 = vadd.f32 %v7117_v28, %v7116_v14  ;;  %v7119_v25 = vld [vmem:[#allocation67_spill] sm:$0xff]  ;;  %v7125_v52 = vld [vmem:[#allocation69_spill] sm:$0xff]  ;;  %v7131_v0 = vld [vmem:[#allocation72_spill] sm:$0xff] }
  0xfa   : > { %7091 = vst [vmem:[#allocation151_spill] sm:$0xff] %v3446_v54  ;;  %v3506_v35 = vadd.f32 %v7120_v34, %v7119_v25  ;;  %v7123_v36 = vld [vmem:[#allocation127_spill] sm:$0xff]  ;;  %v7134_v28 = vld [vmem:[#allocation66_spill] sm:$0xff]  ;;  %v473_v48 = vld [vmem:[%s6839_s1 + $0x268] sm:$0xff] }
  0xfb   : > { %7092 = vst [vmem:[#allocation152_spill] sm:$0xff] %v3450_v31  ;;  %v3510_v3 = vadd.f32 %v7123_v36, %v7122_v4  ;;  %v7128_v5 = vld [vmem:[#allocation71_spill] sm:$0xff]  ;;  %v7137_v34 = vld [vmem:[#allocation70_spill] sm:$0xff]  ;;  %v7140_v36 = vld [vmem:[#allocation73_spill] sm:$0xff] }
  0xfc   : > { %7093 = vst [vmem:[#allocation153_spill] sm:$0xff] %v3454_v32  ;;  %v474_v49 = vld [vmem:[%s6839_s1 + $0x270] sm:$0xff]  ;;  %v475_v37 = vld [vmem:[%s6839_s1 + $0x278] sm:$0xff] }
  0xfd   : > { %7094 = vst [vmem:[#allocation154_spill] sm:$0xff] %v3458_v40  ;;  %v472_v40 = vld [vmem:[%s6839_s1 + $0x260] sm:$0xff] }
  0xfe   : > { %7095 = vst [vmem:[#allocation155_spill] sm:$0xff] %v3462_v39  ;;  %v471_v39 = vld [vmem:[%s6839_s1 + $0x258] sm:$0xff] }
  0xff   : > { %7096 = vst [vmem:[#allocation156_spill] sm:$0xff] %v3466_v10 }
 0x100   : > { %7097 = vst [vmem:[#allocation157_spill] sm:$0xff] %v3470_v24 }
 0x101   : > { %7098 = vst [vmem:[#allocation158_spill] sm:$0xff] %v3474_v23 }
 0x102   : > { %7100 = vst [vmem:[#allocation119_spill] sm:$0xff] %v3478_v26 }
 0x103   : > { %7103 = vst [vmem:[#allocation60_spill] sm:$0xff] %v3482_v58 }
 0x104   : > { %7106 = vst [vmem:[#allocation120_spill] sm:$0xff] %v3486_v59 }
 0x105   : > { %7109 = vst [vmem:[#allocation61_spill] sm:$0xff] %v3490_v46  ;;  %v7126_v46 = vld [vmem:[#allocation128_spill] sm:$0xff] }
 0x106   : > { %7112 = vst [vmem:[#allocation121_spill] sm:$0xff] %v3494_v53  ;;  %v3514_v63 = vadd.f32 %v7126_v46, %v7125_v52  ;;  %v7129_v53 = vld [vmem:[#allocation129_spill] sm:$0xff]  ;;  %v7143_v52 = vld [vmem:[#allocation74_spill] sm:$0xff] }
 0x107   : > { %7115 = vst [vmem:[#allocation62_spill] sm:$0xff] %v3498_v1  ;;  %v3518_v62 = vadd.f32 %v7129_v53, %v7128_v5  ;;  %v7132_v1 = vld [vmem:[#allocation130_spill] sm:$0xff]  ;;  %v7146_v5 = vld [vmem:[#allocation75_spill] sm:$0xff] }
 0x108   : > { %7118 = vst [vmem:[#allocation122_spill] sm:$0xff] %v3502_v47  ;;  %v3522_v14 = vadd.f32 %v7132_v1, %v7131_v0  ;;  %v7135_v47 = vld [vmem:[#allocation131_spill] sm:$0xff]  ;;  %v7149_v0 = vld [vmem:[#allocation76_spill] sm:$0xff] }
 0x109   : > { %7121 = vst [vmem:[#allocation63_spill] sm:$0xff] %v3506_v35  ;;  %v3526_v25 = vadd.f32 %v7135_v47, %v7134_v28  ;;  %v7138_v35 = vld [vmem:[#allocation132_spill] sm:$0xff]  ;;  %v7152_v28 = vld [vmem:[#allocation77_spill] sm:$0xff] }
 0x10a   : > { %7124 = vst [vmem:[#allocation123_spill] sm:$0xff] %v3510_v3  ;;  %v3530_v4 = vadd.f32 %v7138_v35, %v7137_v34  ;;  %v7141_v3 = vld [vmem:[#allocation133_spill] sm:$0xff]  ;;  %v7155_v34 = vld [vmem:[#allocation78_spill] sm:$0xff] }
 0x10b   : > { %7127 = vst [vmem:[#allocation64_spill] sm:$0xff] %v3514_v63  ;;  %v3534_v46 = vadd.f32 %v7141_v3, %v7140_v36  ;;  %v7144_v63 = vld [vmem:[#allocation134_spill] sm:$0xff]  ;;  %v7158_v36 = vld [vmem:[#allocation79_spill] sm:$0xff] }
 0x10c   : > { %7130 = vst [vmem:[#allocation124_spill] sm:$0xff] %v3518_v62  ;;  %v3538_v53 = vadd.f32 %v7144_v63, %v7143_v52  ;;  %v7147_v62 = vld [vmem:[#allocation135_spill] sm:$0xff]  ;;  %v7161_v52 = vld [vmem:[#allocation80_spill] sm:$0xff] }
 0x10d   : > { %7133 = vst [vmem:[#allocation65_spill] sm:$0xff] %v3522_v14  ;;  %v3542_v1 = vadd.f32 %v7147_v62, %v7146_v5  ;;  %v7150_v14 = vld [vmem:[#allocation136_spill] sm:$0xff]  ;;  %v7164_v5 = vld [vmem:[#allocation83_spill] sm:$0xff] }
 0x10e   : > { %7136 = vst [vmem:[#allocation125_spill] sm:$0xff] %v3526_v25  ;;  %v3546_v47 = vadd.f32 %v7150_v14, %v7149_v0  ;;  %v7153_v25 = vld [vmem:[#allocation137_spill] sm:$0xff]  ;;  %v7167_v0 = vld [vmem:[#allocation84_spill] sm:$0xff] }
 0x10f   : > { %7139 = vst [vmem:[#allocation67_spill] sm:$0xff] %v3530_v4  ;;  %v3550_v35 = vadd.f32 %v7153_v25, %v7152_v28  ;;  %v7156_v4 = vld [vmem:[#allocation138_spill] sm:$0xff]  ;;  %v7170_v28 = vld [vmem:[#allocation85_spill] sm:$0xff] }
 0x110   : > { %7142 = vst [vmem:[#allocation126_spill] sm:$0xff] %v3534_v46  ;;  %v3554_v3 = vadd.f32 %v7156_v4, %v7155_v34  ;;  %v7159_v46 = vld [vmem:[#allocation139_spill] sm:$0xff] }
 0x111   : > { %7145 = vst [vmem:[#allocation68_spill] sm:$0xff] %v3538_v53  ;;  %v3558_v63 = vadd.f32 %v7159_v46, %v7158_v36  ;;  %v7162_v53 = vld [vmem:[#allocation140_spill] sm:$0xff]  ;;  %v7173_v34 = vld [vmem:[#allocation87_spill] sm:$0xff] }
 0x112   : > { %7148 = vst [vmem:[#allocation127_spill] sm:$0xff] %v3542_v1  ;;  %v3562_v62 = vadd.f32 %v7162_v53, %v7161_v52  ;;  %v7165_v1 = vld [vmem:[#allocation141_spill] sm:$0xff]  ;;  %v7176_v36 = vld [vmem:[#allocation88_spill] sm:$0xff] }
 0x113   : > { %7151 = vst [vmem:[#allocation69_spill] sm:$0xff] %v3546_v47  ;;  %v3566_v14 = vadd.f32 %v7165_v1, %v7164_v5  ;;  %v7168_v47 = vld [vmem:[#allocation142_spill] sm:$0xff]  ;;  %v7179_v52 = vld [vmem:[#allocation89_spill] sm:$0xff] }
 0x114   : > { %7154 = vst [vmem:[#allocation128_spill] sm:$0xff] %v3550_v35  ;;  %v3570_v25 = vadd.f32 %v7168_v47, %v7167_v0  ;;  %v7171_v35 = vld [vmem:[#allocation143_spill] sm:$0xff]  ;;  %v7182_v5 = vld [vmem:[#allocation81_spill] sm:$0xff]  ;;  %v7184_v0 = vld [vmem:[#allocation82_spill] sm:$0xff] }
 0x115   : > { %7157 = vst [vmem:[#allocation71_spill] sm:$0xff] %v3554_v3  ;;  %v3574_v4 = vadd.f32 %v7171_v35, %v7170_v28  ;;  %v7174_v3 = vld [vmem:[#allocation144_spill] sm:$0xff]  ;;  %v3590_v47 = vadd.f32 %v3357_v13, %v7182_v5  ;;  %v3594_v35 = vadd.f32 %v3360_v9, %v7184_v0  ;;  %v7186_v28 = vld [vmem:[#allocation86_spill] sm:$0xff]  ;;  %v7194_v5 = vld [vmem:[#allocation93_spill] sm:$0xff] }
 0x116   : > { %7160 = vst [vmem:[#allocation129_spill] sm:$0xff] %v3558_v63  ;;  %v3578_v46 = vadd.f32 %v7174_v3, %v7173_v34  ;;  %v7177_v63 = vld [vmem:[#allocation145_spill] sm:$0xff]  ;;  %v3598_v3 = vadd.f32 %v3363_v16, %v7186_v28  ;;  %v7188_v34 = vld [vmem:[#allocation90_spill] sm:$0xff]  ;;  %v3614_v9 = vadd.f32 %v3375_v22, %v7194_v5  ;;  %v7198_v28 = vld [vmem:[#allocation95_spill] sm:$0xff] }
 0x117   : > { %7163 = vst [vmem:[#allocation72_spill] sm:$0xff] %v3562_v62  ;;  %v3582_v53 = vadd.f32 %v7177_v63, %v7176_v36  ;;  %v7180_v62 = vld [vmem:[#allocation146_spill] sm:$0xff]  ;;  %v3602_v63 = vadd.f32 %v3366_v7, %v7188_v34  ;;  %v7190_v36 = vld [vmem:[#allocation91_spill] sm:$0xff]  ;;  %v432_v7 = vld [vmem:[%s6839_s1 + $0x120] sm:$0xff] }
 0x118   : > { %7166 = vst [vmem:[#allocation130_spill] sm:$0xff] %v3566_v14  ;;  %v3586_v1 = vadd.f32 %v7180_v62, %v7179_v52  ;;  %v3606_v62 = vadd.f32 %v3369_v6, %v7190_v36  ;;  %v7192_v52 = vld [vmem:[#allocation92_spill] sm:$0xff]  ;;  %v7196_v0 = vld [vmem:[#allocation94_spill] sm:$0xff]  ;;  %v3625_v6 = vadd.f32 %v3381_v19, %v7198_v28  ;;  %v7202_v36 = vld [vmem:[#allocation97_spill] sm:$0xff] }
 0x119   : > { %7169 = vst [vmem:[#allocation66_spill] sm:$0xff] %v3570_v25  ;;  %v3610_v13 = vadd.f32 %v3372_v61, %v7192_v52  ;;  %v3618_v16 = vadd.f32 %v3378_v18, %v7196_v0  ;;  %v7200_v34 = vld [vmem:[#allocation96_spill] sm:$0xff]  ;;  %v3633_v22 = vadd.f32 %v3387_v56, %v7202_v36  ;;  %v7204_v52 = vld [vmem:[#allocation103_spill] sm:$0xff]  ;;  %v433_v5 = vld [vmem:[%s6839_s1 + $0x128] sm:$0xff] }
 0x11a   : > { %7172 = vst [vmem:[#allocation131_spill] sm:$0xff] %v3574_v4  ;;  %v3629_v61 = vadd.f32 %v3384_v60, %v7200_v34  ;;  %v3637_v18 = vadd.f32 %v3390_v33, %v7204_v52  ;;  %v434_v19 = vld [vmem:[%s6839_s1 + $0x130] sm:$0xff]  ;;  %v435_v60 = vld [vmem:[%s6839_s1 + $0x138] sm:$0xff]  ;;  %v7206_v0 = vld [vmem:[#allocation104_spill] sm:$0xff] }
 0x11b   : > { %7175 = vst [vmem:[#allocation70_spill] sm:$0xff] %v3578_v46  ;;  %v3650_v56 = vadd.f32 %v3393_v8, %v7206_v0  ;;  %v7208_v28 = vld [vmem:[#allocation105_spill] sm:$0xff]  ;;  %v7210_v34 = vld [vmem:[#allocation111_spill] sm:$0xff]  ;;  %v7212_v52 = vld [vmem:[#allocation112_spill] sm:$0xff] }
 0x11c   : > { %7178 = vst [vmem:[#allocation132_spill] sm:$0xff] %v3582_v53  ;;  %v3654_v33 = vadd.f32 %v3396_v55, %v7208_v28  ;;  %v3658_v36 = vadd.f32 %v3399_v21, %v7210_v34  ;;  %v7218_v0 = vld [vmem:[#allocation113_spill] sm:$0xff]  ;;  %v7220_v28 = vld [vmem:[#allocation114_spill] sm:$0xff]  ;;  %v7222_v34 = vld [vmem:[#allocation115_spill] sm:$0xff] }
 0x11d   : > { %7181 = vst [vmem:[#allocation73_spill] sm:$0xff] %v3586_v1  ;;  %v3674_v55 = vadd.f32 %v3411_v17, %v7218_v0  ;;  %v3678_v21 = vadd.f32 %v3414_v43, %v7220_v28  ;;  %v7230_v0 = vld [vmem:[#allocation8_spill] sm:$0xff]  ;;  %v7231_v43 = vld [vmem:[#allocation9_spill] sm:$0xff]  ;;  %v7263_v53 = vld [vmem:[#allocation31_spill] sm:$0xff] }
 0x11e   : > { %7183 = vst [vmem:[#allocation133_spill] sm:$0xff] %v3590_v47  ;;  %v3700_v28 = vmul.f32 %v433_v5, %v7231_v43  ;;  %v498_v47 = vld [vmem:[%s6839_s1 + $0x330] sm:$0xff]  ;;  %v7265_v4 = vld [vmem:[#allocation36_spill] sm:$0xff]  ;;  %v407_v25 = vld [vmem:[%s6839_s1 + $0x58] sm:$0xff] }
 0x11f   : > { %7185 = vst [vmem:[#allocation74_spill] sm:$0xff] %v3594_v35  ;;  %v497_v35 = vld [vmem:[%s6839_s1 + $0x328] sm:$0xff]  ;;  %v3922_v26 = vmul.f32 %v407_v25, %v3138_v12 }
 0x120   : > { %7187 = vst [vmem:[#allocation134_spill] sm:$0xff] %v3598_v3 }
 0x121   : > { %7189 = vst [vmem:[#allocation75_spill] sm:$0xff] %v3602_v63  ;;  %v7253_v63 = vld [vmem:[#allocation19_spill] sm:$0xff] }
 0x122   : > { %7191 = vst [vmem:[#allocation135_spill] sm:$0xff] %v3606_v62  ;;  %v3749_v3 = vmul.f32 %v435_v60, %v7253_v63 }
 0x123   : > { %7193 = vst [vmem:[#allocation76_spill] sm:$0xff] %v3610_v13 }
 0x124   : > { %7195 = vst [vmem:[#allocation136_spill] sm:$0xff] %v3614_v9 }
 0x125   : > { %7197 = vst [vmem:[#allocation77_spill] sm:$0xff] %v3618_v16  ;;  %v7247_v16 = vld [vmem:[#allocation16_spill] sm:$0xff] }
 0x126   : > { %7199 = vst [vmem:[#allocation137_spill] sm:$0xff] %v3625_v6  ;;  %v7216_v6 = vld [vmem:[#allocation106_spill] sm:$0xff]  ;;  %v3740_v9 = vmul.f32 %v432_v7, %v7247_v16  ;;  %v3778_v46 = vmul.f32 %v7263_v53, %v7247_v16  ;;  %v405_v53 = vld [vmem:[%s6839_s1 + $0x48] sm:$0xff] }
 0x127   : > { %7201 = vst [vmem:[#allocation78_spill] sm:$0xff] %v3629_v61  ;;  %v3670_v8 = vadd.f32 %v3408_v15, %v7216_v6  ;;  %v7228_v6 = vld [vmem:[#allocation118_spill] sm:$0xff]  ;;  %v3916_v59 = vmul.f32 %v405_v53, %v3132_v42 }
 0x128   : > { %7203 = vst [vmem:[#allocation138_spill] sm:$0xff] %v3633_v22  ;;  %v7214_v22 = vld [vmem:[#allocation98_spill] sm:$0xff]  ;;  %v3694_v17 = vadd.f32 %v3426_v38, %v7228_v6  ;;  %v493_v38 = vld [vmem:[%s6839_s1 + $0x308] sm:$0xff] }
 0x129   : > { %7205 = vst [vmem:[#allocation79_spill] sm:$0xff] %v3637_v18  ;;  %v3662_v18 = vadd.f32 %v3402_v44, %v7212_v52  ;;  %v3666_v61 = vadd.f32 %v3405_v45, %v7214_v22  ;;  %v3682_v44 = vadd.f32 %v3417_v41, %v7222_v34  ;;  %v7224_v52 = vld [vmem:[#allocation116_spill] sm:$0xff]  ;;  %v7226_v22 = vld [vmem:[#allocation117_spill] sm:$0xff]  ;;  %v7232_v41 = vld [vmem:[#allocation10_spill] sm:$0xff] }
 0x12a   : > { %7207 = vst [vmem:[#allocation139_spill] sm:$0xff] %v3650_v56  ;;  %v3686_v45 = vadd.f32 %v3420_v11, %v7224_v52  ;;  %v3690_v15 = vadd.f32 %v3423_v20, %v7226_v22  ;;  %v3703_v34 = vmul.f32 %v434_v19, %v7232_v41  ;;  %v492_v20 = vld [vmem:[%s6839_s1 + $0x300] sm:$0xff]  ;;  %v7236_v22 = vld [vmem:[#allocation26_spill] sm:$0xff] }
 0x12b   : > { %7209 = vst [vmem:[#allocation80_spill] sm:$0xff] %v3654_v33  ;;  %v7235_v52 = vld [vmem:[#allocation12_spill] sm:$0xff]  ;;  %v494_v56 = vld [vmem:[%s6839_s1 + $0x310] sm:$0xff] }
 0x12c   : > { %7211 = vst [vmem:[#allocation140_spill] sm:$0xff] %v3658_v36  ;;  %v3716_v6 = vmul.f32 %v7236_v22, %v7235_v52  ;;  %v7245_v36 = vld [vmem:[#allocation43_spill] sm:$0xff] }
 0x12d   : > { %7213 = vst [vmem:[#allocation83_spill] sm:$0xff] %v3662_v18  ;;  %v7244_v18 = vld [vmem:[#allocation15_spill] sm:$0xff] }
 0x12e   : > { %7215 = vst [vmem:[#allocation141_spill] sm:$0xff] %v3666_v61  ;;  %v3728_v33 = vmul.f32 %v7245_v36, %v7244_v18  ;;  %v495_v22 = vld [vmem:[%s6839_s1 + $0x318] sm:$0xff]  ;;  %v7251_v36 = vld [vmem:[#allocation18_spill] sm:$0xff] }
 0x12f   : > { %7217 = vst [vmem:[#allocation84_spill] sm:$0xff] %v3670_v8  ;;  %v7242_v8 = vld [vmem:[#allocation28_spill] sm:$0xff]  ;;  %v3746_v62 = vmul.f32 %v434_v19, %v7251_v36  ;;  %v7257_v19 = vld [vmem:[#allocation21_spill] sm:$0xff] }
 0x130   : > { %7219 = vst [vmem:[#allocation142_spill] sm:$0xff] %v3674_v55  ;;  %v3697_v55 = vmul.f32 %v432_v7, %v7230_v0  ;;  %v499_v7 = vld [vmem:[%s6839_s1 + $0x338] sm:$0xff] }
 0x131   : > { %7221 = vst [vmem:[#allocation85_spill] sm:$0xff] %v3678_v21  ;;  %v7241_v21 = vld [vmem:[#allocation14_spill] sm:$0xff] }
 0x132   : > { %7223 = vst [vmem:[#allocation143_spill] sm:$0xff] %v3682_v44  ;;  %v7233_v44 = vld [vmem:[#allocation11_spill] sm:$0xff]  ;;  %v3724_v61 = vmul.f32 %v7242_v8, %v7241_v21  ;;  %v7249_v8 = vld [vmem:[#allocation17_spill] sm:$0xff] }
 0x133   : > { %7225 = vst [vmem:[#allocation87_spill] sm:$0xff] %v3686_v45  ;;  %v3706_v11 = vmul.f32 %v435_v60, %v7233_v44  ;;  %v3743_v13 = vmul.f32 %v433_v5, %v7249_v8  ;;  %v7255_v5 = vld [vmem:[#allocation20_spill] sm:$0xff] }
 0x134   : > { %7227 = vst [vmem:[#allocation144_spill] sm:$0xff] %v3690_v15  ;;  %v7239_v15 = vld [vmem:[#allocation27_spill] sm:$0xff] }
 0x135   : > { %7229 = vst [vmem:[#allocation88_spill] sm:$0xff] %v3694_v17  ;;  %v7238_v17 = vld [vmem:[#allocation13_spill] sm:$0xff] }
 0x136   : > { %7234 = vst [vmem:[#allocation145_spill] sm:$0xff] %v3706_v11  ;;  %v3720_v45 = vmul.f32 %v7239_v15, %v7238_v17  ;;  %v496_v15 = vld [vmem:[%s6839_s1 + $0x320] sm:$0xff]  ;;  %v3766_v60 = vmul.f32 %v7257_v19, %v7238_v17 }
 0x137   : > { %7237 = vst [vmem:[#allocation89_spill] sm:$0xff] %v3716_v6 }
 0x138   : > { %7240 = vst [vmem:[#allocation146_spill] sm:$0xff] %v3720_v45 }
 0x139   : > { %7243 = vst [vmem:[#allocation81_spill] sm:$0xff] %v3724_v61 }
 0x13a   : > { %7246 = vst [vmem:[#allocation82_spill] sm:$0xff] %v3728_v33 }
 0x13b   : > { %7248 = vst [vmem:[#allocation86_spill] sm:$0xff] %v3740_v9  ;;  %v7261_v9 = vld [vmem:[#allocation30_spill] sm:$0xff] }
 0x13c   : > { %7250 = vst [vmem:[#allocation90_spill] sm:$0xff] %v3743_v13  ;;  %v3762_v13 = vmul.f32 %v7255_v5, %v7235_v52  ;;  %v3774_v1 = vmul.f32 %v7261_v9, %v7244_v18  ;;  %v3782_v5 = vmul.f32 %v7265_v4, %v7249_v8  ;;  %v404_v9 = vld [vmem:[%s6839_s1 + $0x40] sm:$0xff]  ;;  %v7273_v4 = vld [vmem:[#allocation5_spill] sm:$0xff] }
 0x13d   : > { %7252 = vst [vmem:[#allocation91_spill] sm:$0xff] %v3746_v62  ;;  %v3913_v14 = vmul.f32 %v404_v9, %v3129_v27 }
 0x13e   : > { %7254 = vst [vmem:[#allocation92_spill] sm:$0xff] %v3749_v3  ;;  %v7259_v3 = vld [vmem:[#allocation29_spill] sm:$0xff] }
 0x13f   : > { %7256 = vst [vmem:[#allocation93_spill] sm:$0xff] %v3762_v13  ;;  %v3770_v62 = vmul.f32 %v7259_v3, %v7241_v21  ;;  %v7267_v13 = vld [vmem:[#allocation37_spill] sm:$0xff] }
 0x140   : > { %7258 = vst [vmem:[#allocation94_spill] sm:$0xff] %v3766_v60  ;;  %v3786_v19 = vmul.f32 %v7267_v13, %v7251_v36  ;;  %v7269_v60 = vld [vmem:[#allocation38_spill] sm:$0xff] }
 0x141   : > { %7260 = vst [vmem:[#allocation95_spill] sm:$0xff] %v3770_v62  ;;  %v3790_v3 = vmul.f32 %v7269_v60, %v7253_v63  ;;  %v7275_v13 = vld [vmem:[#allocation6_spill] sm:$0xff]  ;;  %v7277_v62 = vld [vmem:[#allocation7_spill] sm:$0xff] }
 0x142   : > { %7262 = vst [vmem:[#allocation96_spill] sm:$0xff] %v3774_v1  ;;  %v3808_v60 = vmul.f32 %v495_v22, %v7277_v62  ;;  %v3826_v62 = vmul.f32 %v498_v47, %v7232_v41  ;;  %v3844_v41 = vmul.f32 %v493_v38, %v7238_v17  ;;  %v7292_v17 = vld [vmem:[#allocation100_spill] sm:$0xff] }
 0x143   : > { %7264 = vst [vmem:[#allocation97_spill] sm:$0xff] %v3778_v46  ;;  %v7271_v46 = vld [vmem:[#allocation4_spill] sm:$0xff] }
 0x144   : > { %7266 = vst [vmem:[#allocation103_spill] sm:$0xff] %v3782_v5  ;;  %v3799_v1 = vmul.f32 %v492_v20, %v7271_v46  ;;  %v3802_v5 = vmul.f32 %v493_v38, %v7273_v4  ;;  %v408_v46 = vld [vmem:[%s6839_s1 + $0x60] sm:$0xff]  ;;  %v3820_v4 = vmul.f32 %v496_v15, %v7230_v0  ;;  %v411_v0 = vld [vmem:[%s6839_s1 + $0x78] sm:$0xff]  ;;  %v7293_v38 = vld [vmem:[#allocation101_spill] sm:$0xff] }
 0x145   : > { %7268 = vst [vmem:[#allocation104_spill] sm:$0xff] %v3786_v19  ;;  %v3805_v19 = vmul.f32 %v494_v56, %v7275_v13  ;;  %v3823_v13 = vmul.f32 %v497_v35, %v7231_v43  ;;  %v3841_v43 = vmul.f32 %v492_v20, %v7235_v52  ;;  %v3862_v20 = vmul.f32 %v499_v7, %v7253_v63  ;;  %v7294_v52 = vld [vmem:[#allocation102_spill] sm:$0xff] }
 0x146   : > { %7270 = vst [vmem:[#allocation105_spill] sm:$0xff] %v3790_v3  ;;  %v406_v3 = vld [vmem:[%s6839_s1 + $0x50] sm:$0xff]  ;;  %v3880_v63 = vmul.f32 %v407_v25, %v7294_v52  ;;  %v3925_v23 = vmul.f32 %v408_v46, %v3153_v30  ;;  %v469_v25 = vld [vmem:[%s6839_s1 + $0x248] sm:$0xff] }
 0x147   : > { %7272 = vst [vmem:[#allocation111_spill] sm:$0xff] %v3799_v1  ;;  %v443_v1 = vld [vmem:[%s6839_s1 + $0x178] sm:$0xff]  ;;  %v3919_v58 = vmul.f32 %v406_v3, %v3135_v57 }
 0x148   : > { %7274 = vst [vmem:[#allocation112_spill] sm:$0xff] %v3802_v5  ;;  %v410_v5 = vld [vmem:[%s6839_s1 + $0x70] sm:$0xff] }
 0x149   : > { %7276 = vst [vmem:[#allocation98_spill] sm:$0xff] %v3805_v19  ;;  %v409_v19 = vld [vmem:[%s6839_s1 + $0x68] sm:$0xff]  ;;  %v3931_v10 = vmul.f32 %v410_v5, %v3159_v51 }
 0x14a   : > { %7278 = vst [vmem:[#allocation106_spill] sm:$0xff] %v3808_v60  ;;  %v3829_v60 = vmul.f32 %v499_v7, %v7233_v44  ;;  %v3847_v44 = vmul.f32 %v494_v56, %v7241_v21  ;;  %v436_v56 = vld [vmem:[%s6839_s1 + $0x140] sm:$0xff]  ;;  %v7291_v21 = vld [vmem:[#allocation99_spill] sm:$0xff]  ;;  %v3928_v24 = vmul.f32 %v409_v19, %v3156_v29 }
 0x14b   : > { %7279 = vst [vmem:[#allocation113_spill] sm:$0xff] %v3820_v4  ;;  %v3859_v4 = vmul.f32 %v498_v47, %v7251_v36  ;;  %v3877_v47 = vmul.f32 %v406_v3, %v7293_v38  ;;  %v7295_v36 = vld [vmem:[#allocation107_spill] sm:$0xff]  ;;  %v468_v3 = vld [vmem:[%s6839_s1 + $0x240] sm:$0xff]  ;;  %v3985_v33 = vmul.f32 %v436_v56, %v3129_v27 }
 0x14c   : > { %7280 = vst [vmem:[#allocation114_spill] sm:$0xff] %v3823_v13  ;;  %v3856_v13 = vmul.f32 %v497_v35, %v7249_v8  ;;  %v3874_v35 = vmul.f32 %v405_v53, %v7292_v17  ;;  %v440_v8 = vld [vmem:[%s6839_s1 + $0x160] sm:$0xff]  ;;  %v3892_v7 = vmul.f32 %v408_v46, %v7295_v36  ;;  %v3943_v53 = vmul.f32 %v436_v56, %v7291_v21 }
 0x14d   : > { %7281 = vst [vmem:[#allocation115_spill] sm:$0xff] %v3826_v62  ;;  %v3853_v62 = vmul.f32 %v496_v15, %v7247_v16  ;;  %v3871_v16 = vmul.f32 %v404_v9, %v7291_v21  ;;  %v439_v15 = vld [vmem:[%s6839_s1 + $0x158] sm:$0xff]  ;;  %v3934_v9 = vmul.f32 %v411_v0, %v3162_v50  ;;  %v3964_v32 = vmul.f32 %v440_v8, %v7295_v36 }
 0x14e   : > { %7282 = vst [vmem:[#allocation116_spill] sm:$0xff] %v3829_v60  ;;  %v3850_v60 = vmul.f32 %v495_v22, %v7244_v18  ;;  %v437_v18 = vld [vmem:[%s6839_s1 + $0x148] sm:$0xff]  ;;  %v438_v22 = vld [vmem:[%s6839_s1 + $0x150] sm:$0xff]  ;;  %v3952_v46 = vmul.f32 %v439_v15, %v7294_v52  ;;  %v3994_v6 = vmul.f32 %v439_v15, %v3138_v12  ;;  %v4006_v56 = vmul.f32 %v443_v1, %v3162_v50 }
 0x14f   : > { %7283 = vst [vmem:[#allocation117_spill] sm:$0xff] %v3841_v43  ;;  %v442_v43 = vld [vmem:[%s6839_s1 + $0x170] sm:$0xff]  ;;  %v3988_v61 = vmul.f32 %v437_v18, %v3132_v42  ;;  %v3991_v45 = vmul.f32 %v438_v22, %v3135_v57  ;;  %v4015_v15 = vmul.f32 %v468_v3, %v7291_v21 }
 0x150   : > { %7284 = vst [vmem:[#allocation118_spill] sm:$0xff] %v3844_v41  ;;  %v441_v41 = vld [vmem:[%s6839_s1 + $0x168] sm:$0xff] }
 0x151   : > { %7285 = vst [vmem:[#allocation8_spill] sm:$0xff] %v3847_v44  ;;  %v4000_v11 = vmul.f32 %v441_v41, %v3156_v29 }
 0x152   : > { %7286 = vst [vmem:[#allocation9_spill] sm:$0xff] %v3850_v60  ;;  %v7298_v60 = vld [vmem:[#allocation110_spill] sm:$0xff] }
 0x153   : > { %7287 = vst [vmem:[#allocation10_spill] sm:$0xff] %v3853_v62  ;;  %v3901_v44 = vmul.f32 %v411_v0, %v7298_v60  ;;  %v470_v0 = vld [vmem:[%s6839_s1 + $0x250] sm:$0xff]  ;;  %v3973_v2 = vmul.f32 %v443_v1, %v7298_v60  ;;  %v4024_v1 = vmul.f32 %v471_v39, %v7294_v52 }
 0x154   : > { %7288 = vst [vmem:[#allocation11_spill] sm:$0xff] %v3856_v13  ;;  %v7297_v13 = vld [vmem:[#allocation109_spill] sm:$0xff] }
 0x155   : > { %7289 = vst [vmem:[#allocation12_spill] sm:$0xff] %v3859_v4  ;;  %v3898_v62 = vmul.f32 %v410_v5, %v7297_v13  ;;  %v3949_v5 = vmul.f32 %v438_v22, %v7293_v38  ;;  %v3970_v54 = vmul.f32 %v442_v43, %v7297_v13  ;;  %v501_v22 = vld [vmem:[%s6839_s1 + $0x348] sm:$0xff] }
 0x156   : > { %7290 = vst [vmem:[#allocation26_spill] sm:$0xff] %v3862_v20  ;;  %v7296_v20 = vld [vmem:[#allocation108_spill] sm:$0xff] }
 0x157   : > { %v3895_v4 = vmul.f32 %v409_v19, %v7296_v20  ;;  %v3946_v19 = vmul.f32 %v437_v18, %v7292_v17  ;;  %v3967_v31 = vmul.f32 %v441_v41, %v7296_v20  ;;  %7299 = vst [vmem:[#allocation13_spill] sm:$0xff] %v3970_v54  ;;  %v4003_v54 = vmul.f32 %v442_v43, %v3159_v51  ;;  %v500_v18 = vld [vmem:[%s6839_s1 + $0x340] sm:$0xff] }
 0x158   : > { %7300 = vst [vmem:[#allocation27_spill] sm:$0xff] %v3973_v2  ;;  %v3997_v2 = vmul.f32 %v440_v8, %v3153_v30  ;;  %v4018_v41 = vmul.f32 %v469_v25, %v7292_v17  ;;  %v4021_v43 = vmul.f32 %v470_v0, %v7293_v38  ;;  %v502_v8 = vld [vmem:[%s6839_s1 + $0x350] sm:$0xff] }
 0x159   : > { %7301 = vst [vmem:[#allocation14_spill] sm:$0xff] %v3985_v33  ;;  %v4075_v33 = vmul.f32 %v474_v49, %v3159_v51 }
 0x15a   : > { %7302 = vst [vmem:[#allocation28_spill] sm:$0xff] %v3988_v61  ;;  %v4072_v61 = vmul.f32 %v473_v48, %v3156_v29 }
 0x15b   : > { %7303 = vst [vmem:[#allocation15_spill] sm:$0xff] %v3991_v45  ;;  %v4069_v45 = vmul.f32 %v472_v40, %v3153_v30 }
 0x15c   : > { %7304 = vst [vmem:[#allocation43_spill] sm:$0xff] %v3994_v6  ;;  %v4066_v6 = vmul.f32 %v471_v39, %v3138_v12  ;;  %v4087_v39 = vmul.f32 %v502_v8, %v7293_v38  ;;  %v4108_v38 = vmul.f32 %v501_v22, %v3132_v42 }
 0x15d   : > { %7305 = vst [vmem:[#allocation16_spill] sm:$0xff] %v3997_v2  ;;  %v506_v2 = vld [vmem:[%s6839_s1 + $0x370] sm:$0xff] }
 0x15e   : > { %7306 = vst [vmem:[#allocation17_spill] sm:$0xff] %v4000_v11  ;;  %v505_v11 = vld [vmem:[%s6839_s1 + $0x368] sm:$0xff] }
 0x15f   : > { %7307 = vst [vmem:[#allocation18_spill] sm:$0xff] %v4003_v54  ;;  %v4045_v54 = vmul.f32 %v475_v37, %v7298_v60 }
 0x160   : > { %7308 = vst [vmem:[#allocation19_spill] sm:$0xff] %v4006_v56  ;;  %v503_v56 = vld [vmem:[%s6839_s1 + $0x358] sm:$0xff] }
 0x161   : > { %7309 = vst [vmem:[#allocation20_spill] sm:$0xff] %v4015_v15  ;;  %v504_v15 = vld [vmem:[%s6839_s1 + $0x360] sm:$0xff] }
 0x162   : > { %7310 = vst [vmem:[#allocation21_spill] sm:$0xff] %v4018_v41  ;;  %v4036_v41 = vmul.f32 %v472_v40, %v7295_v36  ;;  %v4090_v40 = vmul.f32 %v503_v56, %v7294_v52  ;;  %v4111_v52 = vmul.f32 %v502_v8, %v3135_v57 }
 0x163   : > { %7311 = vst [vmem:[#allocation29_spill] sm:$0xff] %v4021_v43  ;;  %v4039_v43 = vmul.f32 %v473_v48, %v7296_v20  ;;  %v4093_v48 = vmul.f32 %v504_v15, %v7295_v36  ;;  %v4114_v36 = vmul.f32 %v503_v56, %v3138_v12  ;;  %v7345_v56 = vld [vmem:[#allocation24_spill] sm:$0xff] }
 0x164   : > { %7312 = vst [vmem:[#allocation30_spill] sm:$0xff] %v4024_v1  ;;  %v4042_v1 = vmul.f32 %v474_v49, %v7297_v13  ;;  %v4096_v49 = vmul.f32 %v505_v11, %v7296_v20  ;;  %v4117_v20 = vmul.f32 %v504_v15, %v3153_v30  ;;  %v4138_v30 = vadd.f32 %v3877_v47, %v7345_v56  ;;  %v7365_v56 = vld [vmem:[#allocation44_spill] sm:$0xff] }
 0x165   : > { %7313 = vst [vmem:[#allocation31_spill] sm:$0xff] %v4036_v41  ;;  %v507_v41 = vld [vmem:[%s6839_s1 + $0x378] sm:$0xff] }
 0x166   : > { %7314 = vst [vmem:[#allocation36_spill] sm:$0xff] %v4039_v43  ;;  %v4057_v43 = vmul.f32 %v468_v3, %v3129_v27  ;;  %v4078_v3 = vmul.f32 %v475_v37, %v3162_v50  ;;  %v4099_v37 = vmul.f32 %v506_v2, %v7297_v13  ;;  %v4120_v13 = vmul.f32 %v505_v11, %v3156_v29  ;;  %v7347_v29 = vld [vmem:[#allocation25_spill] sm:$0xff] }
 0x167   : > { %7315 = vst [vmem:[#allocation37_spill] sm:$0xff] %v4042_v1  ;;  %v4060_v1 = vmul.f32 %v469_v25, %v3132_v42  ;;  %v4081_v25 = vmul.f32 %v500_v18, %v7291_v21  ;;  %v4102_v21 = vmul.f32 %v507_v41, %v7298_v60  ;;  %v4123_v60 = vmul.f32 %v506_v2, %v3159_v51  ;;  %v7341_v42 = vld [vmem:[#allocation22_spill] sm:$0xff]  ;;  %v7349_v2 = vld [vmem:[#allocation32_spill] sm:$0xff]  ;;  %v7351_v11 = vld [vmem:[#allocation33_spill] sm:$0xff] }
 0x168   : > { %7316 = vst [vmem:[#allocation38_spill] sm:$0xff] %v4045_v54  ;;  %v4063_v54 = vmul.f32 %v470_v0, %v3135_v57  ;;  %v4084_v0 = vmul.f32 %v501_v22, %v7292_v17  ;;  %v4105_v17 = vmul.f32 %v500_v18, %v3129_v27  ;;  %v4126_v27 = vmul.f32 %v507_v41, %v3162_v50  ;;  %v7343_v57 = vld [vmem:[#allocation23_spill] sm:$0xff] }
 0x169   : > { %7317 = vst [vmem:[#allocation4_spill] sm:$0xff] %v4057_v43  ;;  %v4130_v18 = vadd.f32 %v3871_v16, %v7341_v42  ;;  %v4134_v12 = vadd.f32 %v3874_v35, %v7343_v57  ;;  %v4142_v51 = vadd.f32 %v3880_v63, %v7347_v29  ;;  %v4146_v50 = vadd.f32 %v3892_v7, %v7349_v2  ;;  %v7353_v35 = vld [vmem:[#allocation34_spill] sm:$0xff]  ;;  %v7355_v22 = vld [vmem:[#allocation35_spill] sm:$0xff]  ;;  %v7359_v7 = vld [vmem:[#allocation40_spill] sm:$0xff] }
 0x16a   : > { %7318 = vst [vmem:[#allocation5_spill] sm:$0xff] %v4060_v1  ;;  %v4150_v16 = vadd.f32 %v3895_v4, %v7351_v11  ;;  %v4154_v47 = vadd.f32 %v3898_v62, %v7353_v35  ;;  %v4158_v15 = vadd.f32 %v3901_v44, %v7355_v22  ;;  %v7357_v63 = vld [vmem:[#allocation39_spill] sm:$0xff]  ;;  %v4166_v8 = vadd.f32 %v3916_v59, %v7359_v7  ;;  %v7361_v42 = vld [vmem:[#allocation41_spill] sm:$0xff]  ;;  %v7363_v57 = vld [vmem:[#allocation42_spill] sm:$0xff] }
 0x16b   : > { %7319 = vst [vmem:[#allocation6_spill] sm:$0xff] %v4063_v54  ;;  %v4162_v41 = vadd.f32 %v3913_v14, %v7357_v63  ;;  %v4170_v4 = vadd.f32 %v3919_v58, %v7361_v42  ;;  %v4174_v62 = vadd.f32 %v3922_v26, %v7363_v57  ;;  %v540_v44 = vld [vmem:[%s6839_s1 + $0x480] sm:$0xff]  ;;  %v541_v14 = vld [vmem:[%s6839_s1 + $0x488] sm:$0xff]  ;;  %v4184_v59 = vadd.f32 %v3925_v23, %v7365_v56  ;;  %v7369_v26 = vld [vmem:[#allocation46_spill] sm:$0xff] }
 0x16c   : > { %7320 = vst [vmem:[#allocation7_spill] sm:$0xff] %v4066_v6  ;;  %v7367_v29 = vld [vmem:[#allocation45_spill] sm:$0xff]  ;;  %v4192_v2 = vadd.f32 %v3931_v10, %v7369_v26  ;;  %v7371_v11 = vld [vmem:[#allocation47_spill] sm:$0xff]  ;;  %v4199_v22 = vld [vmem:[%s2574_s25 + $0x100] sm:$0xff] }
 0x16d   : > { %7321 = vst [vmem:[#allocation99_spill] sm:$0xff] %v4069_v45  ;;  %v4188_v58 = vadd.f32 %v3928_v24, %v7367_v29  ;;  %v4196_v35 = vadd.f32 %v3934_v9, %v7371_v11  ;;  %v4202_v63 = vld [vmem:[%s2574_s25 + $0x108] sm:$0xff]  ;;  %v4205_v23 = vld [vmem:[%s2574_s25 + $0x110] sm:$0xff]  ;;  %v4208_v7 = vld [vmem:[%s2574_s25 + $0x118] sm:$0xff] }
 0x16e   : > { %7322 = vst [vmem:[#allocation100_spill] sm:$0xff] %v4072_v61  ;;  %v542_v24 = vld [vmem:[%s6839_s1 + $0x490] sm:$0xff]  ;;  %v543_v10 = vld [vmem:[%s6839_s1 + $0x498] sm:$0xff]  ;;  %v544_v9 = vld [vmem:[%s6839_s1 + $0x4a0] sm:$0xff] }
 0x16f   : > { %7323 = vst [vmem:[#allocation101_spill] sm:$0xff] %v4075_v33  ;;  %v7377_v42 = vld [vmem:[#allocation56_spill] sm:$0xff]  ;;  %v7379_v56 = vld [vmem:[#allocation57_spill] sm:$0xff]  ;;  %v7381_v26 = vld [vmem:[#allocation58_spill] sm:$0xff] }
 0x170   : > { %7324 = vst [vmem:[#allocation102_spill] sm:$0xff] %v4078_v3  ;;  %v4221_v57 = vadd.f32 %v3943_v53, %v7377_v42  ;;  %v4225_v29 = vadd.f32 %v3946_v19, %v7379_v56  ;;  %v4229_v11 = vadd.f32 %v3949_v5, %v7381_v26  ;;  %v4242_v53 = vld [vmem:[%s2574_s25 + $0x130] sm:$0xff]  ;;  %v4245_v42 = vld [vmem:[%s2574_s25 + $0x138] sm:$0xff]  ;;  %v545_v19 = vld [vmem:[%s6839_s1 + $0x4a8] sm:$0xff]  ;;  %v4262_v56 = vadd.f32 %v3967_v31, %v3700_v28 }
 0x171   : > { %7325 = vst [vmem:[#allocation107_spill] sm:$0xff] %v4081_v25  ;;  %v546_v5 = vld [vmem:[%s6839_s1 + $0x4b0] sm:$0xff]  ;;  %v7391_v26 = vld [vmem:[#allocation13_spill] sm:$0xff]  ;;  %v611_v25 = vld [vmem:[%s6839_s1 + $0x6b8] sm:$0xff] }
 0x172   : > { %7326 = vst [vmem:[#allocation108_spill] sm:$0xff] %v4084_v0  ;;  %v7401_v28 = vld [vmem:[#allocation146_spill] sm:$0xff]  ;;  %v639_v43 = vld [vmem:[%s6839_s1 + $0x798] sm:$0xff] }
 0x173   : > { %7327 = vst [vmem:[#allocation109_spill] sm:$0xff] %v4087_v39  ;;  %v609_v39 = vld [vmem:[%s6839_s1 + $0x6a8] sm:$0xff]  ;;  %v610_v0 = vld [vmem:[%s6839_s1 + $0x6b0] sm:$0xff] }
 0x174   : > { %7328 = vst [vmem:[#allocation110_spill] sm:$0xff] %v4090_v40 }
 0x175   : > { %7329 = vst [vmem:[#allocation159_spill] sm:$0xff] %v4093_v48 }
 0x176   : > { %7330 = vst [vmem:[#allocation160_spill] sm:$0xff] %v4096_v49 }
 0x177   : > { %7331 = vst [vmem:[#allocation161_spill] sm:$0xff] %v4099_v37 }
 0x178   : > { %7332 = vst [vmem:[#allocation162_spill] sm:$0xff] %v4102_v21  ;;  %v608_v21 = vld [vmem:[%s6839_s1 + $0x6a0] sm:$0xff] }
 0x179   : > { %7333 = vst [vmem:[#allocation163_spill] sm:$0xff] %v4105_v17  ;;  %v607_v17 = vld [vmem:[%s6839_s1 + $0x698] sm:$0xff] }
 0x17a   : > { %7334 = vst [vmem:[#allocation164_spill] sm:$0xff] %v4108_v38 }
 0x17b   : > { %7335 = vst [vmem:[#allocation165_spill] sm:$0xff] %v4111_v52 }
 0x17c   : > { %7336 = vst [vmem:[#allocation166_spill] sm:$0xff] %v4114_v36 }
 0x17d   : > { %7337 = vst [vmem:[#allocation167_spill] sm:$0xff] %v4117_v20 }
 0x17e   : > { %7338 = vst [vmem:[#allocation168_spill] sm:$0xff] %v4120_v13 }
 0x17f   : > { %7339 = vst [vmem:[#allocation169_spill] sm:$0xff] %v4123_v60 }
 0x180   : > { %7340 = vst [vmem:[#allocation170_spill] sm:$0xff] %v4126_v27 }
 0x181   : > { %7342 = vst [vmem:[#allocation22_spill] sm:$0xff] %v4130_v18  ;;  %v579_v18 = vld [vmem:[%s6839_s1 + $0x5b8] sm:$0xff] }
 0x182   : > { %7344 = vst [vmem:[#allocation23_spill] sm:$0xff] %v4134_v12  ;;  %v578_v12 = vld [vmem:[%s6839_s1 + $0x5b0] sm:$0xff]  ;;  %v4421_v40 = vmul.f32 %v579_v18, %v4245_v42 }
 0x183   : > { %7346 = vst [vmem:[#allocation24_spill] sm:$0xff] %v4138_v30  ;;  %v577_v30 = vld [vmem:[%s6839_s1 + $0x5a8] sm:$0xff]  ;;  %v4418_v48 = vmul.f32 %v578_v12, %v4242_v53 }
 0x184   : > { %7348 = vst [vmem:[#allocation25_spill] sm:$0xff] %v4142_v51 }
 0x185   : > { %7350 = vst [vmem:[#allocation32_spill] sm:$0xff] %v4146_v50  ;;  %v4346_v50 = vmul.f32 %v546_v5, %v4242_v53 }
 0x186   : > { %7352 = vst [vmem:[#allocation33_spill] sm:$0xff] %v4150_v16  ;;  %v4307_v16 = vld [vmem:[%s2574_s25 + $0x170] sm:$0xff] }
 0x187   : > { %7354 = vst [vmem:[#allocation34_spill] sm:$0xff] %v4154_v47  ;;  %v4304_v47 = vld [vmem:[%s2574_s25 + $0x168] sm:$0xff]  ;;  %v4379_v38 = vmul.f32 %v546_v5, %v4307_v16  ;;  %v4451_v1 = vmul.f32 %v578_v12, %v4307_v16 }
 0x188   : > { %7356 = vst [vmem:[#allocation35_spill] sm:$0xff] %v4158_v15  ;;  %v4301_v15 = vld [vmem:[%s2574_s25 + $0x160] sm:$0xff]  ;;  %v4376_v52 = vmul.f32 %v545_v19, %v4304_v47  ;;  %v4448_v54 = vmul.f32 %v577_v30, %v4304_v47 }
 0x189   : > { %7358 = vst [vmem:[#allocation39_spill] sm:$0xff] %v4162_v41  ;;  %v4373_v36 = vmul.f32 %v544_v9, %v4301_v15 }
 0x18a   : > { %7360 = vst [vmem:[#allocation40_spill] sm:$0xff] %v4166_v8  ;;  %v4279_v8 = vld [vmem:[%s2574_s25 + $0x150] sm:$0xff] }
 0x18b   : > { %7362 = vst [vmem:[#allocation41_spill] sm:$0xff] %v4170_v4  ;;  %v4276_v4 = vld [vmem:[%s2574_s25 + $0x148] sm:$0xff]  ;;  %v4367_v13 = vmul.f32 %v542_v24, %v4279_v8 }
 0x18c   : > { %7364 = vst [vmem:[#allocation42_spill] sm:$0xff] %v4174_v62  ;;  %v4273_v62 = vld [vmem:[%s2574_s25 + $0x140] sm:$0xff]  ;;  %v4364_v60 = vmul.f32 %v541_v14, %v4276_v4 }
 0x18d   : > { %7366 = vst [vmem:[#allocation44_spill] sm:$0xff] %v4184_v59  ;;  %v4239_v59 = vld [vmem:[%s2574_s25 + $0x128] sm:$0xff]  ;;  %v4361_v27 = vmul.f32 %v540_v44, %v4273_v62 }
 0x18e   : > { %7368 = vst [vmem:[#allocation45_spill] sm:$0xff] %v4188_v58  ;;  %v4236_v58 = vld [vmem:[%s2574_s25 + $0x120] sm:$0xff]  ;;  %v4415_v49 = vmul.f32 %v577_v30, %v4239_v59 }
 0x18f   : > { %7370 = vst [vmem:[#allocation46_spill] sm:$0xff] %v4192_v2 }
 0x190   : > { %7372 = vst [vmem:[#allocation47_spill] sm:$0xff] %v4196_v35  ;;  %v7383_v35 = vld [vmem:[#allocation59_spill] sm:$0xff] }
 0x191   : > { %7373 = vst [vmem:[#allocation171_spill] sm:$0xff] %v4199_v22  ;;  %v4233_v2 = vadd.f32 %v3952_v46, %v7383_v35  ;;  %v547_v46 = vld [vmem:[%s6839_s1 + $0x4b8] sm:$0xff]  ;;  %v4258_v35 = vadd.f32 %v3964_v32, %v3697_v55  ;;  %v7398_v55 = vld [vmem:[#allocation89_spill] sm:$0xff] }
 0x192   : > { %7374 = vst [vmem:[#allocation172_spill] sm:$0xff] %v4202_v63  ;;  %v4282_v32 = vld [vmem:[%s2574_s25 + $0x158] sm:$0xff]  ;;  %v4349_v51 = vmul.f32 %v547_v46, %v4245_v42 }
 0x193   : > { %7375 = vst [vmem:[#allocation173_spill] sm:$0xff] %v4205_v23  ;;  %v4370_v20 = vmul.f32 %v543_v10, %v4282_v32 }
 0x194   : > { %7376 = vst [vmem:[#allocation174_spill] sm:$0xff] %v4208_v7 }
 0x195   : > { %7378 = vst [vmem:[#allocation56_spill] sm:$0xff] %v4221_v57 }
 0x196   : > { %7380 = vst [vmem:[#allocation57_spill] sm:$0xff] %v4225_v29  ;;  %v7394_v29 = vld [vmem:[#allocation27_spill] sm:$0xff] }
 0x197   : > { %7382 = vst [vmem:[#allocation58_spill] sm:$0xff] %v4229_v11  ;;  %v7393_v11 = vld [vmem:[#allocation145_spill] sm:$0xff] }
 0x198   : > { %7384 = vst [vmem:[#allocation59_spill] sm:$0xff] %v4233_v2  ;;  %v4266_v2 = vadd.f32 %v7391_v26, %v3703_v34  ;;  %v4270_v57 = vadd.f32 %v7394_v29, %v7393_v11  ;;  %v7404_v26 = vld [vmem:[#allocation81_spill] sm:$0xff]  ;;  %v7407_v11 = vld [vmem:[#allocation82_spill] sm:$0xff] }
 0x199   : > { %7385 = vst [vmem:[#allocation175_spill] sm:$0xff] %v4236_v58 }
 0x19a   : > { %7386 = vst [vmem:[#allocation176_spill] sm:$0xff] %v4239_v59 }
 0x19b   : > { %7387 = vst [vmem:[#allocation177_spill] sm:$0xff] %v4242_v53 }
 0x19c   : > { %7388 = vst [vmem:[#allocation178_spill] sm:$0xff] %v4245_v42 }
 0x19d   : > { %7389 = vst [vmem:[#allocation179_spill] sm:$0xff] %v4258_v35  ;;  %v7399_v35 = vld [vmem:[#allocation14_spill] sm:$0xff] }
 0x19e   : > { %7390 = vst [vmem:[#allocation180_spill] sm:$0xff] %v4262_v56  ;;  %v4286_v31 = vadd.f32 %v7399_v35, %v7398_v55  ;;  %v7402_v56 = vld [vmem:[#allocation28_spill] sm:$0xff]  ;;  %v4310_v35 = vld [vmem:[%s2574_s25 + $0x178] sm:$0xff]  ;;  %v4319_v55 = vmul.f32 %v540_v44, %v4199_v22 }
 0x19f   : > { %7392 = vst [vmem:[#allocation13_spill] sm:$0xff] %v4266_v2  ;;  %v4290_v34 = vadd.f32 %v7402_v56, %v7401_v28  ;;  %v7405_v2 = vld [vmem:[#allocation15_spill] sm:$0xff]  ;;  %v572_v56 = vld [vmem:[%s6839_s1 + $0x580] sm:$0xff]  ;;  %v4325_v28 = vmul.f32 %v542_v24, %v4205_v23  ;;  %v4382_v44 = vmul.f32 %v547_v46, %v4310_v35  ;;  %v605_v24 = vld [vmem:[%s6839_s1 + $0x688] sm:$0xff] }
 0x1a0   : > { %7395 = vst [vmem:[#allocation145_spill] sm:$0xff] %v4270_v57  ;;  %v4294_v29 = vadd.f32 %v7405_v2, %v7404_v26  ;;  %v7408_v57 = vld [vmem:[#allocation43_spill] sm:$0xff]  ;;  %v573_v2 = vld [vmem:[%s6839_s1 + $0x588] sm:$0xff]  ;;  %v4328_v26 = vmul.f32 %v543_v10, %v4208_v7  ;;  %v4391_v10 = vmul.f32 %v572_v56, %v4199_v22  ;;  %v606_v46 = vld [vmem:[%s6839_s1 + $0x690] sm:$0xff]  ;;  %v4433_v3 = vmul.f32 %v572_v56, %v4273_v62 }
 0x1a1   : > { %7396 = vst [vmem:[#allocation27_spill] sm:$0xff] %v4276_v4  ;;  %v4298_v41 = vadd.f32 %v7408_v57, %v7407_v11  ;;  %v4322_v57 = vmul.f32 %v541_v14, %v4202_v63  ;;  %v574_v11 = vld [vmem:[%s6839_s1 + $0x590] sm:$0xff]  ;;  %v604_v14 = vld [vmem:[%s6839_s1 + $0x680] sm:$0xff]  ;;  %v4436_v33 = vmul.f32 %v573_v2, %v4276_v4  ;;  %v4454_v56 = vmul.f32 %v579_v18, %v4310_v35 }
 0x1a2   : > { %7397 = vst [vmem:[#allocation181_spill] sm:$0xff] %v4282_v32  ;;  %v4439_v61 = vmul.f32 %v574_v11, %v4279_v8  ;;  %v4466_v30 = vmul.f32 %v605_v24, %v4202_v63  ;;  %v4469_v12 = vmul.f32 %v606_v46, %v4205_v23  ;;  %v4472_v18 = vmul.f32 %v607_v17, %v4208_v7 }
 0x1a3   : > { %7400 = vst [vmem:[#allocation89_spill] sm:$0xff] %v4286_v31  ;;  %v4343_v31 = vmul.f32 %v545_v19, %v4239_v59  ;;  %v4397_v19 = vmul.f32 %v574_v11, %v4205_v23  ;;  %v638_v11 = vld [vmem:[%s6839_s1 + $0x790] sm:$0xff] }
 0x1a4   : > { %7403 = vst [vmem:[#allocation14_spill] sm:$0xff] %v4290_v34  ;;  %v4340_v34 = vmul.f32 %v544_v9, %v4236_v58  ;;  %v4394_v9 = vmul.f32 %v573_v2, %v4202_v63  ;;  %v636_v2 = vld [vmem:[%s6839_s1 + $0x780] sm:$0xff] }
 0x1a5   : > { %7406 = vst [vmem:[#allocation146_spill] sm:$0xff] %v4294_v29  ;;  %v576_v29 = vld [vmem:[%s6839_s1 + $0x5a0] sm:$0xff] }
 0x1a6   : > { %7409 = vst [vmem:[#allocation28_spill] sm:$0xff] %v4298_v41  ;;  %v575_v41 = vld [vmem:[%s6839_s1 + $0x598] sm:$0xff]  ;;  %v4412_v37 = vmul.f32 %v576_v29, %v4236_v58  ;;  %v4445_v6 = vmul.f32 %v576_v29, %v4301_v15  ;;  %v4463_v29 = vmul.f32 %v604_v14, %v4199_v22 }
 0x1a7   : > { %7410 = vst [vmem:[#allocation81_spill] sm:$0xff] %v4304_v47  ;;  %v4400_v5 = vmul.f32 %v575_v41, %v4208_v7  ;;  %v4442_v45 = vmul.f32 %v575_v41, %v4282_v32  ;;  %v637_v41 = vld [vmem:[%s6839_s1 + $0x788] sm:$0xff] }
 0x1a8   : > { %7411 = vst [vmem:[#allocation15_spill] sm:$0xff] %v4310_v35 }
 0x1a9   : > { %7412 = vst [vmem:[#allocation82_spill] sm:$0xff] %v4436_v33  ;;  %v4523_v33 = vmul.f32 %v610_v0, %v4307_v16 }
 0x1aa   : > { %7413 = vst [vmem:[#allocation43_spill] sm:$0xff] %v4439_v61  ;;  %v4520_v61 = vmul.f32 %v609_v39, %v4304_v47 }
 0x1ab   : > { %7414 = vst [vmem:[#allocation182_spill] sm:$0xff] %v4442_v45  ;;  %v4517_v45 = vmul.f32 %v608_v21, %v4301_v15 }
 0x1ac   : > { %7415 = vst [vmem:[#allocation183_spill] sm:$0xff] %v4445_v6  ;;  %v4514_v6 = vmul.f32 %v607_v17, %v4282_v32  ;;  %v4535_v17 = vmul.f32 %v638_v11, %v4205_v23  ;;  %v4556_v23 = vmul.f32 %v637_v41, %v4276_v4 }
 0x1ad   : > { %7416 = vst [vmem:[#allocation184_spill] sm:$0xff] %v4448_v54  ;;  %v642_v54 = vld [vmem:[%s6839_s1 + $0x7b0] sm:$0xff] }
 0x1ae   : > { %7417 = vst [vmem:[#allocation185_spill] sm:$0xff] %v4451_v1  ;;  %v641_v1 = vld [vmem:[%s6839_s1 + $0x7a8] sm:$0xff] }
 0x1af   : > { %7418 = vst [vmem:[#allocation186_spill] sm:$0xff] %v4454_v56  ;;  %v4493_v56 = vmul.f32 %v611_v25, %v4245_v42 }
 0x1b0   : > { %7419 = vst [vmem:[#allocation187_spill] sm:$0xff] %v4463_v29  ;;  %v640_v29 = vld [vmem:[%s6839_s1 + $0x7a0] sm:$0xff] }
 0x1b1   : > { %7420 = vst [vmem:[#allocation188_spill] sm:$0xff] %v4466_v30  ;;  %v4484_v30 = vmul.f32 %v608_v21, %v4236_v58  ;;  %v4538_v21 = vmul.f32 %v639_v43, %v4208_v7  ;;  %v4559_v7 = vmul.f32 %v638_v11, %v4279_v8  ;;  %v7428_v11 = vld [vmem:[#allocation148_spill] sm:$0xff] }
 0x1b2   : > { %7421 = vst [vmem:[#allocation189_spill] sm:$0xff] %v4469_v12  ;;  %v4487_v12 = vmul.f32 %v609_v39, %v4239_v59  ;;  %v4541_v39 = vmul.f32 %v640_v29, %v4236_v58  ;;  %v4562_v58 = vmul.f32 %v639_v43, %v4282_v32  ;;  %v4582_v43 = vadd.f32 %v4322_v57, %v7428_v11  ;;  %v7429_v32 = vld [vmem:[#allocation149_spill] sm:$0xff]  ;;  %v7434_v11 = vld [vmem:[#allocation154_spill] sm:$0xff] }
 0x1b3   : > { %7422 = vst [vmem:[#allocation190_spill] sm:$0xff] %v4472_v18  ;;  %v4490_v18 = vmul.f32 %v610_v0, %v4242_v53  ;;  %v4544_v0 = vmul.f32 %v641_v1, %v4239_v59  ;;  %v4565_v59 = vmul.f32 %v640_v29, %v4301_v15  ;;  %v4586_v29 = vadd.f32 %v4325_v28, %v7429_v32  ;;  %v7435_v28 = vld [vmem:[#allocation155_spill] sm:$0xff] }
 0x1b4   : > { %7423 = vst [vmem:[#allocation191_spill] sm:$0xff] %v4484_v30  ;;  %v643_v30 = vld [vmem:[%s6839_s1 + $0x7b8] sm:$0xff]  ;;  %v4606_v32 = vadd.f32 %v4349_v51, %v7434_v11  ;;  %v7445_v11 = vld [vmem:[#allocation60_spill] sm:$0xff] }
 0x1b5   : > { %7424 = vst [vmem:[#allocation192_spill] sm:$0xff] %v4487_v12  ;;  %v4505_v12 = vmul.f32 %v604_v14, %v4273_v62  ;;  %v4526_v14 = vmul.f32 %v611_v25, %v4310_v35  ;;  %v4547_v25 = vmul.f32 %v642_v54, %v4242_v53  ;;  %v4568_v53 = vmul.f32 %v641_v1, %v4304_v47  ;;  %v7430_v1 = vld [vmem:[#allocation150_spill] sm:$0xff] }
 0x1b6   : > { %7425 = vst [vmem:[#allocation193_spill] sm:$0xff] %v4490_v18  ;;  %v4508_v18 = vmul.f32 %v605_v24, %v4276_v4  ;;  %v4529_v24 = vmul.f32 %v636_v2, %v4199_v22  ;;  %v4550_v22 = vmul.f32 %v643_v30, %v4245_v42  ;;  %v4571_v42 = vmul.f32 %v642_v54, %v4307_v16  ;;  %v7431_v54 = vld [vmem:[#allocation151_spill] sm:$0xff] }
 0x1b7   : > { %7426 = vst [vmem:[#allocation194_spill] sm:$0xff] %v4493_v56  ;;  %v4511_v56 = vmul.f32 %v606_v46, %v4279_v8  ;;  %v4532_v46 = vmul.f32 %v637_v41, %v4202_v63  ;;  %v4553_v63 = vmul.f32 %v636_v2, %v4273_v62  ;;  %v4574_v2 = vmul.f32 %v643_v30, %v4310_v35  ;;  %v7427_v41 = vld [vmem:[#allocation147_spill] sm:$0xff]  ;;  %v7432_v35 = vld [vmem:[#allocation152_spill] sm:$0xff] }
 0x1b8   : > { %v4578_v4 = vadd.f32 %v4319_v55, %v7427_v41  ;;  %v4590_v47 = vadd.f32 %v4328_v26, %v7430_v1  ;;  %v4594_v30 = vadd.f32 %v4340_v34, %v7431_v54  ;;  %v4598_v55 = vadd.f32 %v4343_v31, %v7432_v35  ;;  %v7433_v41 = vld [vmem:[#allocation153_spill] sm:$0xff]  ;;  %v7437_v1 = vld [vmem:[#allocation156_spill] sm:$0xff]  ;;  %v7441_v35 = vld [vmem:[#allocation158_spill] sm:$0xff] }
 0x1b9   : > { %v4602_v57 = vadd.f32 %v4346_v50, %v7433_v41  ;;  %v4610_v26 = vadd.f32 %v4361_v27, %v7435_v28  ;;  %v4614_v34 = vadd.f32 %v4364_v60, %v7437_v1  ;;  %v7439_v54 = vld [vmem:[#allocation157_spill] sm:$0xff]  ;;  %v4622_v50 = vadd.f32 %v4370_v20, %v7441_v35  ;;  %v7443_v41 = vld [vmem:[#allocation119_spill] sm:$0xff]  ;;  %v7447_v28 = vld [vmem:[#allocation120_spill] sm:$0xff] }
 0x1ba   : > { %v4618_v31 = vadd.f32 %v4367_v13, %v7439_v54  ;;  %v4626_v51 = vadd.f32 %v4373_v36, %v7443_v41  ;;  %v4630_v27 = vadd.f32 %v4376_v52, %v7445_v11  ;;  %v4634_v60 = vadd.f32 %v4379_v38, %v7447_v28  ;;  %v7449_v1 = vld [vmem:[#allocation61_spill] sm:$0xff]  ;;  %v7453_v35 = vld [vmem:[#allocation62_spill] sm:$0xff]  ;;  %v7457_v11 = vld [vmem:[#allocation63_spill] sm:$0xff] }
 0x1bb   : > { %7436 = vst [vmem:[#allocation147_spill] sm:$0xff] %v4610_v26  ;;  %v4638_v13 = vadd.f32 %v4382_v44, %v7449_v1  ;;  %v7451_v54 = vld [vmem:[#allocation121_spill] sm:$0xff]  ;;  %v4646_v36 = vadd.f32 %v4394_v9, %v7453_v35  ;;  %v7455_v41 = vld [vmem:[#allocation122_spill] sm:$0xff]  ;;  %v4654_v38 = vadd.f32 %v4400_v5, %v7457_v11  ;;  %v7459_v28 = vld [vmem:[#allocation123_spill] sm:$0xff] }
 0x1bc   : > { %7438 = vst [vmem:[#allocation148_spill] sm:$0xff] %v4614_v34  ;;  %v4642_v20 = vadd.f32 %v4391_v10, %v7451_v54  ;;  %v4650_v52 = vadd.f32 %v4397_v19, %v7455_v41  ;;  %v4658_v44 = vadd.f32 %v4412_v37, %v7459_v28  ;;  %v7461_v1 = vld [vmem:[#allocation64_spill] sm:$0xff]  ;;  %v7465_v35 = vld [vmem:[#allocation65_spill] sm:$0xff]  ;;  %v7469_v11 = vld [vmem:[#allocation67_spill] sm:$0xff] }
 0x1bd   : > { %7440 = vst [vmem:[#allocation149_spill] sm:$0xff] %v4618_v31  ;;  %v4662_v10 = vadd.f32 %v4415_v49, %v7461_v1  ;;  %v7463_v54 = vld [vmem:[#allocation124_spill] sm:$0xff]  ;;  %v4670_v19 = vadd.f32 %v4421_v40, %v7465_v35  ;;  %v7467_v41 = vld [vmem:[#allocation125_spill] sm:$0xff]  ;;  %v7472_v28 = vld [vmem:[#allocation126_spill] sm:$0xff] }
 0x1be   : > { %7442 = vst [vmem:[#allocation150_spill] sm:$0xff] %v4622_v50  ;;  %v4666_v9 = vadd.f32 %v4418_v48, %v7463_v54  ;;  %v4674_v5 = vadd.f32 %v4433_v3, %v7467_v41  ;;  %v7475_v1 = vld [vmem:[#allocation68_spill] sm:$0xff]  ;;  %v7478_v54 = vld [vmem:[#allocation127_spill] sm:$0xff]  ;;  %v7481_v35 = vld [vmem:[#allocation69_spill] sm:$0xff] }
 0x1bf   : > { %7444 = vst [vmem:[#allocation151_spill] sm:$0xff] %v4626_v51  ;;  %v7484_v41 = vld [vmem:[#allocation128_spill] sm:$0xff]  ;;  %v5498_v51 = vld [vmem:[%s2574_s25 + $0x1f8] sm:$0xff]  ;;  %v586_v50 = vld [vmem:[%s6839_s1 + $0x5f0] sm:$0xff] }
 0x1c0   : > { %7446 = vst [vmem:[#allocation152_spill] sm:$0xff] %v4630_v27  ;;  %v587_v31 = vld [vmem:[%s6839_s1 + $0x5f8] sm:$0xff] }
 0x1c1   : > { %7448 = vst [vmem:[#allocation153_spill] sm:$0xff] %v4634_v60 }
 0x1c2   : > { %7450 = vst [vmem:[#allocation154_spill] sm:$0xff] %v4638_v13 }
 0x1c3   : > { %7452 = vst [vmem:[#allocation155_spill] sm:$0xff] %v4642_v20 }
 0x1c4   : > { %7454 = vst [vmem:[#allocation156_spill] sm:$0xff] %v4646_v36 }
 0x1c5   : > { %7456 = vst [vmem:[#allocation157_spill] sm:$0xff] %v4650_v52 }
 0x1c6   : > { %7458 = vst [vmem:[#allocation158_spill] sm:$0xff] %v4654_v38  ;;  %v7470_v38 = vld [vmem:[#allocation82_spill] sm:$0xff] }
 0x1c7   : > { %7460 = vst [vmem:[#allocation119_spill] sm:$0xff] %v4658_v44  ;;  %v4678_v37 = vadd.f32 %v7470_v38, %v7469_v11  ;;  %v7473_v44 = vld [vmem:[#allocation43_spill] sm:$0xff] }
 0x1c8   : > { %7462 = vst [vmem:[#allocation60_spill] sm:$0xff] %v4662_v10  ;;  %v4682_v49 = vadd.f32 %v7473_v44, %v7472_v28  ;;  %v7476_v10 = vld [vmem:[#allocation182_spill] sm:$0xff]  ;;  %v7487_v11 = vld [vmem:[#allocation71_spill] sm:$0xff]  ;;  %v7490_v28 = vld [vmem:[#allocation129_spill] sm:$0xff] }
 0x1c9   : > { %7464 = vst [vmem:[#allocation120_spill] sm:$0xff] %v4666_v9  ;;  %v4686_v48 = vadd.f32 %v7476_v10, %v7475_v1  ;;  %v7479_v9 = vld [vmem:[#allocation183_spill] sm:$0xff]  ;;  %v7493_v1 = vld [vmem:[#allocation72_spill] sm:$0xff] }
 0x1ca   : > { %7466 = vst [vmem:[#allocation61_spill] sm:$0xff] %v4670_v19  ;;  %v4690_v40 = vadd.f32 %v7479_v9, %v7478_v54  ;;  %v7482_v19 = vld [vmem:[#allocation184_spill] sm:$0xff]  ;;  %v7496_v54 = vld [vmem:[#allocation130_spill] sm:$0xff] }
 0x1cb   : > { %7468 = vst [vmem:[#allocation121_spill] sm:$0xff] %v4674_v5  ;;  %v4694_v3 = vadd.f32 %v7482_v19, %v7481_v35  ;;  %v7485_v5 = vld [vmem:[#allocation185_spill] sm:$0xff]  ;;  %v7499_v35 = vld [vmem:[#allocation66_spill] sm:$0xff] }
 0x1cc   : > { %7471 = vst [vmem:[#allocation62_spill] sm:$0xff] %v4678_v37  ;;  %v4698_v38 = vadd.f32 %v7485_v5, %v7484_v41  ;;  %v7488_v37 = vld [vmem:[#allocation186_spill] sm:$0xff]  ;;  %v7502_v41 = vld [vmem:[#allocation131_spill] sm:$0xff] }
 0x1cd   : > { %7474 = vst [vmem:[#allocation122_spill] sm:$0xff] %v4682_v49  ;;  %v4702_v44 = vadd.f32 %v7488_v37, %v7487_v11  ;;  %v7491_v49 = vld [vmem:[#allocation187_spill] sm:$0xff]  ;;  %v7505_v11 = vld [vmem:[#allocation70_spill] sm:$0xff] }
 0x1ce   : > { %7477 = vst [vmem:[#allocation63_spill] sm:$0xff] %v4686_v48  ;;  %v4706_v10 = vadd.f32 %v7491_v49, %v7490_v28  ;;  %v7494_v48 = vld [vmem:[#allocation188_spill] sm:$0xff] }
 0x1cf   : > { %7480 = vst [vmem:[#allocation123_spill] sm:$0xff] %v4690_v40  ;;  %v4710_v9 = vadd.f32 %v7494_v48, %v7493_v1  ;;  %v7497_v40 = vld [vmem:[#allocation189_spill] sm:$0xff]  ;;  %v7508_v28 = vld [vmem:[#allocation132_spill] sm:$0xff] }
 0x1d0   : > { %7483 = vst [vmem:[#allocation64_spill] sm:$0xff] %v4694_v3  ;;  %v4714_v19 = vadd.f32 %v7497_v40, %v7496_v54  ;;  %v7500_v3 = vld [vmem:[#allocation190_spill] sm:$0xff]  ;;  %v7511_v1 = vld [vmem:[#allocation73_spill] sm:$0xff] }
 0x1d1   : > { %7486 = vst [vmem:[#allocation124_spill] sm:$0xff] %v4698_v38  ;;  %v4718_v5 = vadd.f32 %v7500_v3, %v7499_v35  ;;  %v7503_v38 = vld [vmem:[#allocation191_spill] sm:$0xff]  ;;  %v7514_v54 = vld [vmem:[#allocation133_spill] sm:$0xff]  ;;  %v7516_v35 = vld [vmem:[#allocation74_spill] sm:$0xff] }
 0x1d2   : > { %7489 = vst [vmem:[#allocation65_spill] sm:$0xff] %v4702_v44  ;;  %v4722_v37 = vadd.f32 %v7503_v38, %v7502_v41  ;;  %v7506_v44 = vld [vmem:[#allocation192_spill] sm:$0xff]  ;;  %v4738_v3 = vadd.f32 %v4505_v12, %v7514_v54  ;;  %v4742_v38 = vadd.f32 %v4508_v18, %v7516_v35  ;;  %v7518_v41 = vld [vmem:[#allocation134_spill] sm:$0xff]  ;;  %v7528_v35 = vld [vmem:[#allocation77_spill] sm:$0xff] }
 0x1d3   : > { %7492 = vst [vmem:[#allocation125_spill] sm:$0xff] %v4706_v10  ;;  %v4726_v49 = vadd.f32 %v7506_v44, %v7505_v11  ;;  %v7509_v10 = vld [vmem:[#allocation193_spill] sm:$0xff]  ;;  %v4746_v44 = vadd.f32 %v4511_v56, %v7518_v41  ;;  %v7520_v11 = vld [vmem:[#allocation75_spill] sm:$0xff]  ;;  %v7526_v54 = vld [vmem:[#allocation136_spill] sm:$0xff]  ;;  %v4766_v56 = vadd.f32 %v4526_v14, %v7528_v35 }
 0x1d4   : > { %7495 = vst [vmem:[#allocation67_spill] sm:$0xff] %v4710_v9  ;;  %v4730_v48 = vadd.f32 %v7509_v10, %v7508_v28  ;;  %v7512_v9 = vld [vmem:[#allocation194_spill] sm:$0xff]  ;;  %v4750_v10 = vadd.f32 %v4514_v6, %v7520_v11  ;;  %v7522_v28 = vld [vmem:[#allocation135_spill] sm:$0xff]  ;;  %v4762_v18 = vadd.f32 %v4523_v33, %v7526_v54  ;;  %v7530_v41 = vld [vmem:[#allocation137_spill] sm:$0xff] }
 0x1d5   : > { %7498 = vst [vmem:[#allocation82_spill] sm:$0xff] %v4714_v19  ;;  %v4734_v40 = vadd.f32 %v7512_v9, %v7511_v1  ;;  %v4754_v9 = vadd.f32 %v4517_v45, %v7522_v28  ;;  %v7524_v1 = vld [vmem:[#allocation76_spill] sm:$0xff]  ;;  %v4770_v6 = vadd.f32 %v4529_v24, %v7530_v41  ;;  %v7532_v11 = vld [vmem:[#allocation78_spill] sm:$0xff]  ;;  %v7538_v54 = vld [vmem:[#allocation139_spill] sm:$0xff] }
 0x1d6   : > { %7501 = vst [vmem:[#allocation126_spill] sm:$0xff] %v4718_v5  ;;  %v4758_v12 = vadd.f32 %v4520_v61, %v7524_v1  ;;  %v4774_v45 = vadd.f32 %v4532_v46, %v7532_v11  ;;  %v7534_v28 = vld [vmem:[#allocation138_spill] sm:$0xff]  ;;  %v7536_v1 = vld [vmem:[#allocation79_spill] sm:$0xff]  ;;  %v4786_v14 = vadd.f32 %v4541_v39, %v7538_v54  ;;  %v7540_v35 = vld [vmem:[#allocation80_spill] sm:$0xff] }
 0x1d7   : > { %7504 = vst [vmem:[#allocation43_spill] sm:$0xff] %v4722_v37  ;;  %v4778_v61 = vadd.f32 %v4535_v17, %v7534_v28  ;;  %v4782_v33 = vadd.f32 %v4538_v21, %v7536_v1  ;;  %v4790_v24 = vadd.f32 %v4544_v0, %v7540_v35  ;;  %v7542_v41 = vld [vmem:[#allocation140_spill] sm:$0xff]  ;;  %v7544_v11 = vld [vmem:[#allocation83_spill] sm:$0xff]  ;;  %v7546_v28 = vld [vmem:[#allocation141_spill] sm:$0xff] }
 0x1d8   : > { %7507 = vst [vmem:[#allocation68_spill] sm:$0xff] %v4726_v49  ;;  %v4794_v46 = vadd.f32 %v4547_v25, %v7542_v41  ;;  %v4798_v17 = vadd.f32 %v4550_v22, %v7544_v11  ;;  %v4802_v21 = vadd.f32 %v4553_v63, %v7546_v28  ;;  %v7548_v1 = vld [vmem:[#allocation84_spill] sm:$0xff]  ;;  %v7550_v54 = vld [vmem:[#allocation142_spill] sm:$0xff]  ;;  %v7552_v35 = vld [vmem:[#allocation85_spill] sm:$0xff] }
 0x1d9   : > { %7510 = vst [vmem:[#allocation182_spill] sm:$0xff] %v4730_v48  ;;  %v4806_v39 = vadd.f32 %v4556_v23, %v7548_v1  ;;  %v4810_v0 = vadd.f32 %v4559_v7, %v7550_v54  ;;  %v4814_v25 = vadd.f32 %v4562_v58, %v7552_v35  ;;  %v7554_v41 = vld [vmem:[#allocation143_spill] sm:$0xff]  ;;  %v7558_v28 = vld [vmem:[#allocation144_spill] sm:$0xff]  ;;  %v7562_v54 = vld [vmem:[#allocation86_spill] sm:$0xff] }
 0x1da   : > { %7513 = vst [vmem:[#allocation127_spill] sm:$0xff] %v4734_v40  ;;  %v4818_v22 = vadd.f32 %v4565_v59, %v7554_v41  ;;  %v7556_v11 = vld [vmem:[#allocation87_spill] sm:$0xff]  ;;  %v4826_v23 = vadd.f32 %v4571_v42, %v7558_v28  ;;  %v7560_v1 = vld [vmem:[#allocation88_spill] sm:$0xff]  ;;  %v7565_v35 = vld [vmem:[#allocation90_spill] sm:$0xff] }
 0x1db   : > { %7515 = vst [vmem:[#allocation183_spill] sm:$0xff] %v4738_v3  ;;  %v4822_v63 = vadd.f32 %v4568_v53, %v7556_v11  ;;  %v4830_v7 = vadd.f32 %v4574_v2, %v7560_v1  ;;  %v7568_v41 = vld [vmem:[#allocation91_spill] sm:$0xff]  ;;  %v7571_v11 = vld [vmem:[#allocation92_spill] sm:$0xff]  ;;  %v7577_v1 = vld [vmem:[#allocation49_spill] sm:$0xff] }
 0x1dc   : > { %7517 = vst [vmem:[#allocation69_spill] sm:$0xff] %v4742_v38  ;;  %v7574_v28 = vld [vmem:[#allocation48_spill] sm:$0xff]  ;;  %v7678_v38 = vld [vmem:[#allocation27_spill] sm:$0xff]  ;;  %v7679_v48 = vld [vmem:[#allocation181_spill] sm:$0xff] }
 0x1dd   : > { %7519 = vst [vmem:[#allocation184_spill] sm:$0xff] %v4746_v44  ;;  %v7682_v5 = vld [vmem:[#allocation81_spill] sm:$0xff] }
 0x1de   : > { %7521 = vst [vmem:[#allocation128_spill] sm:$0xff] %v4750_v10  ;;  %v451_v10 = vld [vmem:[%s6839_s1 + $0x1b8] sm:$0xff] }
 0x1df   : > { %7523 = vst [vmem:[#allocation185_spill] sm:$0xff] %v4754_v9  ;;  %v450_v9 = vld [vmem:[%s6839_s1 + $0x1b0] sm:$0xff] }
 0x1e0   : > { %7525 = vst [vmem:[#allocation71_spill] sm:$0xff] %v4758_v12  ;;  %v449_v12 = vld [vmem:[%s6839_s1 + $0x1a8] sm:$0xff]  ;;  %v5139_v60 = vmul.f32 %v450_v9, %v4307_v16 }
 0x1e1   : > { %7527 = vst [vmem:[#allocation186_spill] sm:$0xff] %v4762_v18  ;;  %v5136_v13 = vmul.f32 %v449_v12, %v7682_v5 }
 0x1e2   : > { %7529 = vst [vmem:[#allocation129_spill] sm:$0xff] %v4766_v56  ;;  %v7677_v56 = vld [vmem:[#allocation178_spill] sm:$0xff] }
 0x1e3   : > { %7531 = vst [vmem:[#allocation187_spill] sm:$0xff] %v4770_v6 }
 0x1e4   : > { %7533 = vst [vmem:[#allocation72_spill] sm:$0xff] %v4774_v45  ;;  %v7676_v45 = vld [vmem:[#allocation177_spill] sm:$0xff] }
 0x1e5   : > { %7535 = vst [vmem:[#allocation188_spill] sm:$0xff] %v4778_v61  ;;  %v7662_v61 = vld [vmem:[#allocation168_spill] sm:$0xff] }
 0x1e6   : > { %7537 = vst [vmem:[#allocation130_spill] sm:$0xff] %v4782_v33  ;;  %v7661_v33 = vld [vmem:[#allocation11_spill] sm:$0xff] }
 0x1e7   : > { %7539 = vst [vmem:[#allocation189_spill] sm:$0xff] %v4786_v14 }
 0x1e8   : > { %7541 = vst [vmem:[#allocation66_spill] sm:$0xff] %v4790_v24  ;;  %v7659_v24 = vld [vmem:[#allocation167_spill] sm:$0xff] }
 0x1e9   : > { %7543 = vst [vmem:[#allocation190_spill] sm:$0xff] %v4794_v46  ;;  %v7658_v46 = vld [vmem:[#allocation10_spill] sm:$0xff] }
 0x1ea   : > { %7545 = vst [vmem:[#allocation131_spill] sm:$0xff] %v4798_v17  ;;  %v4986_v14 = vadd.f32 %v7659_v24, %v7658_v46  ;;  %v445_v24 = vld [vmem:[%s6839_s1 + $0x188] sm:$0xff]  ;;  %v7670_v46 = vld [vmem:[#allocation171_spill] sm:$0xff] }
 0x1eb   : > { %7547 = vst [vmem:[#allocation191_spill] sm:$0xff] %v4802_v21  ;;  %v7656_v21 = vld [vmem:[#allocation166_spill] sm:$0xff] }
 0x1ec   : > { %7549 = vst [vmem:[#allocation70_spill] sm:$0xff] %v4806_v39  ;;  %v417_v39 = vld [vmem:[%s6839_s1 + $0xa8] sm:$0xff] }
 0x1ed   : > { %7551 = vst [vmem:[#allocation192_spill] sm:$0xff] %v4810_v0  ;;  %v7563_v0 = vld [vmem:[#allocation16_spill] sm:$0xff]  ;;  %v5064_v19 = vmul.f32 %v417_v39, %v7682_v5 }
 0x1ee   : > { %7553 = vst [vmem:[#allocation132_spill] sm:$0xff] %v4814_v25  ;;  %v4834_v58 = vadd.f32 %v7563_v0, %v7562_v54  ;;  %v7566_v25 = vld [vmem:[#allocation17_spill] sm:$0xff]  ;;  %v7580_v54 = vld [vmem:[#allocation50_spill] sm:$0xff] }
 0x1ef   : > { %7555 = vst [vmem:[#allocation193_spill] sm:$0xff] %v4818_v22  ;;  %v4838_v59 = vadd.f32 %v7566_v25, %v7565_v35  ;;  %v7569_v22 = vld [vmem:[#allocation18_spill] sm:$0xff]  ;;  %v7583_v35 = vld [vmem:[#allocation51_spill] sm:$0xff] }
 0x1f0   : > { %7557 = vst [vmem:[#allocation73_spill] sm:$0xff] %v4822_v63  ;;  %v4842_v53 = vadd.f32 %v7569_v22, %v7568_v41  ;;  %v7572_v63 = vld [vmem:[#allocation19_spill] sm:$0xff]  ;;  %v7586_v41 = vld [vmem:[#allocation52_spill] sm:$0xff] }
 0x1f1   : > { %7559 = vst [vmem:[#allocation194_spill] sm:$0xff] %v4826_v23  ;;  %v4846_v42 = vadd.f32 %v7572_v63, %v7571_v11  ;;  %v7575_v23 = vld [vmem:[#allocation20_spill] sm:$0xff]  ;;  %v7589_v11 = vld [vmem:[#allocation53_spill] sm:$0xff] }
 0x1f2   : > { %7561 = vst [vmem:[#allocation133_spill] sm:$0xff] %v4830_v7  ;;  %v4850_v2 = vadd.f32 %v7575_v23, %v7574_v28  ;;  %v7578_v7 = vld [vmem:[#allocation21_spill] sm:$0xff]  ;;  %v7592_v28 = vld [vmem:[#allocation54_spill] sm:$0xff] }
 0x1f3   : > { %7564 = vst [vmem:[#allocation74_spill] sm:$0xff] %v4834_v58  ;;  %v4854_v0 = vadd.f32 %v7578_v7, %v7577_v1  ;;  %v7581_v58 = vld [vmem:[#allocation29_spill] sm:$0xff]  ;;  %v7595_v1 = vld [vmem:[#allocation55_spill] sm:$0xff] }
 0x1f4   : > { %7567 = vst [vmem:[#allocation134_spill] sm:$0xff] %v4838_v59  ;;  %v4858_v25 = vadd.f32 %v7581_v58, %v7580_v54  ;;  %v7584_v59 = vld [vmem:[#allocation30_spill] sm:$0xff]  ;;  %v7598_v54 = vld [vmem:[#allocation93_spill] sm:$0xff] }
 0x1f5   : > { %7570 = vst [vmem:[#allocation75_spill] sm:$0xff] %v4842_v53  ;;  %v4862_v22 = vadd.f32 %v7584_v59, %v7583_v35  ;;  %v7587_v53 = vld [vmem:[#allocation31_spill] sm:$0xff]  ;;  %v7601_v35 = vld [vmem:[#allocation94_spill] sm:$0xff] }
 0x1f6   : > { %7573 = vst [vmem:[#allocation135_spill] sm:$0xff] %v4846_v42  ;;  %v4866_v63 = vadd.f32 %v7587_v53, %v7586_v41  ;;  %v7590_v42 = vld [vmem:[#allocation36_spill] sm:$0xff]  ;;  %v7604_v41 = vld [vmem:[#allocation95_spill] sm:$0xff] }
 0x1f7   : > { %7576 = vst [vmem:[#allocation76_spill] sm:$0xff] %v4850_v2  ;;  %v4870_v23 = vadd.f32 %v7590_v42, %v7589_v11  ;;  %v7593_v2 = vld [vmem:[#allocation37_spill] sm:$0xff]  ;;  %v7607_v11 = vld [vmem:[#allocation96_spill] sm:$0xff] }
 0x1f8   : > { %7579 = vst [vmem:[#allocation136_spill] sm:$0xff] %v4854_v0  ;;  %v4874_v7 = vadd.f32 %v7593_v2, %v7592_v28  ;;  %v7596_v0 = vld [vmem:[#allocation38_spill] sm:$0xff]  ;;  %v7610_v28 = vld [vmem:[#allocation97_spill] sm:$0xff] }
 0x1f9   : > { %7582 = vst [vmem:[#allocation77_spill] sm:$0xff] %v4858_v25  ;;  %v4878_v58 = vadd.f32 %v7596_v0, %v7595_v1  ;;  %v7599_v25 = vld [vmem:[#allocation4_spill] sm:$0xff]  ;;  %v7613_v1 = vld [vmem:[#allocation103_spill] sm:$0xff] }
 0x1fa   : > { %7585 = vst [vmem:[#allocation137_spill] sm:$0xff] %v4862_v22  ;;  %v4882_v59 = vadd.f32 %v7599_v25, %v7598_v54  ;;  %v7602_v22 = vld [vmem:[#allocation5_spill] sm:$0xff]  ;;  %v7616_v54 = vld [vmem:[#allocation104_spill] sm:$0xff] }
 0x1fb   : > { %7588 = vst [vmem:[#allocation78_spill] sm:$0xff] %v4866_v63  ;;  %v4886_v53 = vadd.f32 %v7602_v22, %v7601_v35  ;;  %v7605_v63 = vld [vmem:[#allocation6_spill] sm:$0xff]  ;;  %v7619_v35 = vld [vmem:[#allocation105_spill] sm:$0xff] }
 0x1fc   : > { %7591 = vst [vmem:[#allocation138_spill] sm:$0xff] %v4870_v23  ;;  %v4890_v42 = vadd.f32 %v7605_v63, %v7604_v41  ;;  %v7608_v23 = vld [vmem:[#allocation7_spill] sm:$0xff] }
 0x1fd   : > { %7594 = vst [vmem:[#allocation79_spill] sm:$0xff] %v4874_v7  ;;  %v4894_v2 = vadd.f32 %v7608_v23, %v7607_v11  ;;  %v7611_v7 = vld [vmem:[#allocation99_spill] sm:$0xff]  ;;  %v412_v23 = vld [vmem:[%s6839_s1 + $0x80] sm:$0xff] }
 0x1fe   : > { %7597 = vst [vmem:[#allocation139_spill] sm:$0xff] %v4878_v58  ;;  %v4898_v0 = vadd.f32 %v7611_v7, %v7610_v28  ;;  %v7614_v58 = vld [vmem:[#allocation100_spill] sm:$0xff]  ;;  %v413_v7 = vld [vmem:[%s6839_s1 + $0x88] sm:$0xff]  ;;  %v7622_v41 = vld [vmem:[#allocation111_spill] sm:$0xff]  ;;  %v5049_v44 = vmul.f32 %v412_v23, %v4273_v62 }
 0x1ff   : > { %7600 = vst [vmem:[#allocation80_spill] sm:$0xff] %v4882_v59  ;;  %v4902_v25 = vadd.f32 %v7614_v58, %v7613_v1  ;;  %v7617_v59 = vld [vmem:[#allocation101_spill] sm:$0xff]  ;;  %v7623_v11 = vld [vmem:[#allocation107_spill] sm:$0xff]  ;;  %v7625_v28 = vld [vmem:[#allocation112_spill] sm:$0xff]  ;;  %v5052_v3 = vmul.f32 %v413_v7, %v7678_v38 }
 0x200   : > { %7603 = vst [vmem:[#allocation140_spill] sm:$0xff] %v4886_v53  ;;  %v4906_v22 = vadd.f32 %v7617_v59, %v7616_v54  ;;  %v7620_v53 = vld [vmem:[#allocation102_spill] sm:$0xff]  ;;  %v4920_v58 = vadd.f32 %v7623_v11, %v7622_v41  ;;  %v7626_v1 = vld [vmem:[#allocation108_spill] sm:$0xff]  ;;  %v415_v41 = vld [vmem:[%s6839_s1 + $0x98] sm:$0xff] }
 0x201   : > { %7606 = vst [vmem:[#allocation83_spill] sm:$0xff] %v4890_v42  ;;  %v4910_v63 = vadd.f32 %v7620_v53, %v7619_v35  ;;  %v4924_v59 = vadd.f32 %v7626_v1, %v7625_v28  ;;  %v7628_v54 = vld [vmem:[#allocation98_spill] sm:$0xff]  ;;  %v416_v11 = vld [vmem:[%s6839_s1 + $0xa0] sm:$0xff]  ;;  %v7634_v28 = vld [vmem:[#allocation113_spill] sm:$0xff]  ;;  %v5058_v49 = vmul.f32 %v415_v41, %v7679_v48 }
 0x202   : > { %7609 = vst [vmem:[#allocation141_spill] sm:$0xff] %v4894_v2  ;;  %v7631_v35 = vld [vmem:[#allocation106_spill] sm:$0xff]  ;;  %v7635_v1 = vld [vmem:[#allocation159_spill] sm:$0xff]  ;;  %v5061_v37 = vmul.f32 %v416_v11, %v4301_v15 }
 0x203   : > { %7612 = vst [vmem:[#allocation84_spill] sm:$0xff] %v4898_v0  ;;  %v414_v0 = vld [vmem:[%s6839_s1 + $0x90] sm:$0xff] }
 0x204   : > { %7615 = vst [vmem:[#allocation142_spill] sm:$0xff] %v4902_v25  ;;  %v7644_v2 = vld [vmem:[#allocation162_spill] sm:$0xff]  ;;  %v5055_v40 = vmul.f32 %v414_v0, %v4279_v8 }
 0x205   : > { %7618 = vst [vmem:[#allocation85_spill] sm:$0xff] %v4906_v22  ;;  %v7629_v22 = vld [vmem:[#allocation109_spill] sm:$0xff] }
 0x206   : > { %7621 = vst [vmem:[#allocation143_spill] sm:$0xff] %v4910_v63  ;;  %v4928_v53 = vadd.f32 %v7629_v22, %v7628_v54  ;;  %v7632_v63 = vld [vmem:[#allocation110_spill] sm:$0xff]  ;;  %v4945_v22 = vadd.f32 %v7635_v1, %v7634_v28  ;;  %v7646_v1 = vld [vmem:[#allocation117_spill] sm:$0xff] }
 0x207   : > { %7624 = vst [vmem:[#allocation87_spill] sm:$0xff] %v4920_v58  ;;  %v4932_v25 = vadd.f32 %v7632_v63, %v7631_v35  ;;  %v7637_v54 = vld [vmem:[#allocation114_spill] sm:$0xff]  ;;  %v7640_v35 = vld [vmem:[#allocation115_spill] sm:$0xff]  ;;  %v7643_v58 = vld [vmem:[#allocation116_spill] sm:$0xff] }
 0x208   : > { %7627 = vst [vmem:[#allocation144_spill] sm:$0xff] %v4924_v59  ;;  %v4957_v42 = vadd.f32 %v7644_v2, %v7643_v58  ;;  %v418_v28 = vld [vmem:[%s6839_s1 + $0xb0] sm:$0xff]  ;;  %v7652_v58 = vld [vmem:[#allocation8_spill] sm:$0xff] }
 0x209   : > { %7630 = vst [vmem:[#allocation88_spill] sm:$0xff] %v4928_v53  ;;  %v7638_v53 = vld [vmem:[#allocation160_spill] sm:$0xff]  ;;  %v5034_v6 = vmul.f32 %v418_v28, %v7676_v45  ;;  %v5067_v52 = vmul.f32 %v418_v28, %v4307_v16 }
 0x20a   : > { %7633 = vst [vmem:[#allocation86_spill] sm:$0xff] %v4932_v25  ;;  %v4949_v63 = vadd.f32 %v7638_v53, %v7637_v54  ;;  %v7641_v25 = vld [vmem:[#allocation161_spill] sm:$0xff]  ;;  %v419_v53 = vld [vmem:[%s6839_s1 + $0xb8] sm:$0xff] }
 0x20b   : > { %7636 = vst [vmem:[#allocation16_spill] sm:$0xff] %v4945_v22  ;;  %v4953_v59 = vadd.f32 %v7641_v25, %v7640_v35  ;;  %v7647_v54 = vld [vmem:[#allocation163_spill] sm:$0xff]  ;;  %v7649_v35 = vld [vmem:[#allocation118_spill] sm:$0xff]  ;;  %v7655_v22 = vld [vmem:[#allocation9_spill] sm:$0xff]  ;;  %v5037_v18 = vmul.f32 %v419_v53, %v7677_v56 }
 0x20c   : > { %7639 = vst [vmem:[#allocation90_spill] sm:$0xff] %v4949_v63  ;;  %v4970_v25 = vadd.f32 %v7647_v54, %v7646_v1  ;;  %v4982_v17 = vadd.f32 %v7656_v21, %v7655_v22  ;;  %v4990_v1 = vadd.f32 %v7662_v61, %v7661_v33  ;;  %v7664_v54 = vld [vmem:[#allocation12_spill] sm:$0xff]  ;;  %v5007_v22 = vmul.f32 %v412_v23, %v7670_v46  ;;  %v7685_v23 = vld [vmem:[#allocation15_spill] sm:$0xff] }
 0x20d   : > { %7642 = vst [vmem:[#allocation17_spill] sm:$0xff] %v4953_v59  ;;  %v7650_v59 = vld [vmem:[#allocation164_spill] sm:$0xff]  ;;  %v5070_v36 = vmul.f32 %v419_v53, %v7685_v23  ;;  %v478_v53 = vld [vmem:[%s6839_s1 + $0x290] sm:$0xff] }
 0x20e   : > { %7645 = vst [vmem:[#allocation91_spill] sm:$0xff] %v4957_v42  ;;  %v4974_v2 = vadd.f32 %v7650_v59, %v7649_v35  ;;  %v7653_v42 = vld [vmem:[#allocation165_spill] sm:$0xff]  ;;  %v7667_v35 = vld [vmem:[#allocation26_spill] sm:$0xff]  ;;  %v444_v21 = vld [vmem:[%s6839_s1 + $0x180] sm:$0xff] }
 0x20f   : > { %7648 = vst [vmem:[#allocation18_spill] sm:$0xff] %v4970_v25  ;;  %v4978_v63 = vadd.f32 %v7653_v42, %v7652_v58  ;;  %v7665_v25 = vld [vmem:[#allocation169_spill] sm:$0xff]  ;;  %v7671_v61 = vld [vmem:[#allocation172_spill] sm:$0xff] }
 0x210   : > { %7651 = vst [vmem:[#allocation92_spill] sm:$0xff] %v4974_v2  ;;  %v4994_v59 = vadd.f32 %v7665_v25, %v7664_v54  ;;  %v7668_v2 = vld [vmem:[#allocation170_spill] sm:$0xff]  ;;  %v5010_v33 = vmul.f32 %v413_v7, %v7671_v61  ;;  %v7672_v25 = vld [vmem:[#allocation173_spill] sm:$0xff] }
 0x211   : > { %7654 = vst [vmem:[#allocation19_spill] sm:$0xff] %v4978_v63  ;;  %v4998_v42 = vadd.f32 %v7668_v2, %v7667_v35  ;;  %v5013_v58 = vmul.f32 %v414_v0, %v7672_v25  ;;  %v7673_v54 = vld [vmem:[#allocation174_spill] sm:$0xff]  ;;  %v476_v0 = vld [vmem:[%s6839_s1 + $0x280] sm:$0xff]  ;;  %v477_v7 = vld [vmem:[%s6839_s1 + $0x288] sm:$0xff] }
 0x212   : > { %7657 = vst [vmem:[#allocation48_spill] sm:$0xff] %v4982_v17  ;;  %v5016_v2 = vmul.f32 %v415_v41, %v7673_v54  ;;  %v446_v35 = vld [vmem:[%s6839_s1 + $0x190] sm:$0xff]  ;;  %v7675_v17 = vld [vmem:[#allocation176_spill] sm:$0xff]  ;;  %v5079_v41 = vmul.f32 %v444_v21, %v7670_v46 }
 0x213   : > { %7660 = vst [vmem:[#allocation20_spill] sm:$0xff] %v4986_v14  ;;  %v5031_v63 = vmul.f32 %v417_v39, %v7675_v17  ;;  %v5082_v39 = vmul.f32 %v445_v24, %v7671_v61 }
 0x214   : > { %7663 = vst [vmem:[#allocation49_spill] sm:$0xff] %v4990_v1  ;;  %v7674_v1 = vld [vmem:[#allocation175_spill] sm:$0xff] }
 0x215   : > { %7666 = vst [vmem:[#allocation21_spill] sm:$0xff] %v4994_v59  ;;  %v448_v59 = vld [vmem:[%s6839_s1 + $0x1a0] sm:$0xff]  ;;  %v5028_v14 = vmul.f32 %v416_v11, %v7674_v1  ;;  %v5085_v11 = vmul.f32 %v446_v35, %v7672_v25 }
 0x216   : > { %7669 = vst [vmem:[#allocation50_spill] sm:$0xff] %v4998_v42  ;;  %v447_v42 = vld [vmem:[%s6839_s1 + $0x198] sm:$0xff]  ;;  %v5133_v20 = vmul.f32 %v448_v59, %v4301_v15 }
 0x217   : > { %7680 = vst [vmem:[#allocation29_spill] sm:$0xff] %v5058_v49  ;;  %v5088_v28 = vmul.f32 %v447_v42, %v7673_v54  ;;  %v5130_v49 = vmul.f32 %v447_v42, %v7679_v48  ;;  %v509_v42 = vld [vmem:[%s6839_s1 + $0x388] sm:$0xff] }
 0x218   : > { %7681 = vst [vmem:[#allocation51_spill] sm:$0xff] %v5061_v37  ;;  %v482_v37 = vld [vmem:[%s6839_s1 + $0x2b0] sm:$0xff] }
 0x219   : > { %7683 = vst [vmem:[#allocation30_spill] sm:$0xff] %v5064_v19  ;;  %v481_v19 = vld [vmem:[%s6839_s1 + $0x2a8] sm:$0xff] }
 0x21a   : > { %7684 = vst [vmem:[#allocation52_spill] sm:$0xff] %v5067_v52  ;;  %v5109_v52 = vmul.f32 %v451_v10, %v7677_v56 }
 0x21b   : > { %7686 = vst [vmem:[#allocation31_spill] sm:$0xff] %v5070_v36  ;;  %v479_v36 = vld [vmem:[%s6839_s1 + $0x298] sm:$0xff] }
 0x21c   : > { %7687 = vst [vmem:[#allocation53_spill] sm:$0xff] %v5079_v41  ;;  %v480_v41 = vld [vmem:[%s6839_s1 + $0x2a0] sm:$0xff] }
 0x21d   : > { %7688 = vst [vmem:[#allocation36_spill] sm:$0xff] %v5082_v39  ;;  %v5100_v39 = vmul.f32 %v448_v59, %v7674_v1  ;;  %v5151_v59 = vmul.f32 %v476_v0, %v7670_v46 }
 0x21e   : > { %7689 = vst [vmem:[#allocation54_spill] sm:$0xff] %v5085_v11  ;;  %v5103_v11 = vmul.f32 %v449_v12, %v7675_v17  ;;  %v5154_v12 = vmul.f32 %v477_v7, %v7671_v61 }
 0x21f   : > { %7690 = vst [vmem:[#allocation37_spill] sm:$0xff] %v5088_v28  ;;  %v5106_v28 = vmul.f32 %v450_v9, %v7676_v45  ;;  %v5157_v9 = vmul.f32 %v478_v53, %v7672_v25 }
 0x220   : > { %7691 = vst [vmem:[#allocation55_spill] sm:$0xff] %v5100_v39  ;;  %v483_v39 = vld [vmem:[%s6839_s1 + $0x2b8] sm:$0xff] }
 0x221   : > { %7692 = vst [vmem:[#allocation38_spill] sm:$0xff] %v5103_v11  ;;  %v5121_v11 = vmul.f32 %v444_v21, %v4273_v62  ;;  %v5142_v21 = vmul.f32 %v451_v10, %v7685_v23  ;;  %v5160_v10 = vmul.f32 %v479_v36, %v7673_v54 }
 0x222   : > { %7693 = vst [vmem:[#allocation93_spill] sm:$0xff] %v5106_v28  ;;  %v5124_v28 = vmul.f32 %v445_v24, %v7678_v38  ;;  %v508_v24 = vld [vmem:[%s6839_s1 + $0x380] sm:$0xff] }
 0x223   : > { %7694 = vst [vmem:[#allocation4_spill] sm:$0xff] %v5109_v52  ;;  %v5127_v52 = vmul.f32 %v446_v35, %v4279_v8  ;;  %v510_v35 = vld [vmem:[%s6839_s1 + $0x390] sm:$0xff] }
 0x224   : > { %7695 = vst [vmem:[#allocation94_spill] sm:$0xff] %v5121_v11  ;;  %v5438_v11 = vld [vmem:[%s2574_s25 + $0x1e8] sm:$0xff] }
 0x225   : > { %7696 = vst [vmem:[#allocation5_spill] sm:$0xff] %v5124_v28  ;;  %v5208_v28 = vmul.f32 %v481_v19, %v7682_v5 }
 0x226   : > { %7697 = vst [vmem:[#allocation95_spill] sm:$0xff] %v5127_v52  ;;  %v5205_v52 = vmul.f32 %v480_v41, %v4301_v15 }
 0x227   : > { %7698 = vst [vmem:[#allocation6_spill] sm:$0xff] %v5130_v49  ;;  %v5202_v49 = vmul.f32 %v479_v36, %v7679_v48  ;;  %v5220_v36 = vmul.f32 %v509_v42, %v7671_v61 }
 0x228   : > { %7699 = vst [vmem:[#allocation96_spill] sm:$0xff] %v5133_v20  ;;  %v514_v20 = vld [vmem:[%s6839_s1 + $0x3b0] sm:$0xff] }
 0x229   : > { %7700 = vst [vmem:[#allocation7_spill] sm:$0xff] %v5136_v13  ;;  %v513_v13 = vld [vmem:[%s6839_s1 + $0x3a8] sm:$0xff]  ;;  %v5238_v61 = vmul.f32 %v514_v20, %v7676_v45 }
 0x22a   : > { %7701 = vst [vmem:[#allocation97_spill] sm:$0xff] %v5139_v60  ;;  %v5181_v60 = vmul.f32 %v483_v39, %v7677_v56 }
 0x22b   : > { %7702 = vst [vmem:[#allocation99_spill] sm:$0xff] %v5142_v21  ;;  %v511_v21 = vld [vmem:[%s6839_s1 + $0x398] sm:$0xff] }
 0x22c   : > { %7703 = vst [vmem:[#allocation103_spill] sm:$0xff] %v5151_v59  ;;  %v512_v59 = vld [vmem:[%s6839_s1 + $0x3a0] sm:$0xff] }
 0x22d   : > { %7704 = vst [vmem:[#allocation100_spill] sm:$0xff] %v5154_v12  ;;  %v5172_v12 = vmul.f32 %v480_v41, %v7674_v1  ;;  %v5223_v41 = vmul.f32 %v510_v35, %v7672_v25 }
 0x22e   : > { %7705 = vst [vmem:[#allocation104_spill] sm:$0xff] %v5157_v9  ;;  %v5175_v9 = vmul.f32 %v481_v19, %v7675_v17  ;;  %v5226_v19 = vmul.f32 %v511_v21, %v7673_v54  ;;  %v5247_v54 = vld [vmem:[%s2574_s25 + $0x190] sm:$0xff] }
 0x22f   : > { %7706 = vst [vmem:[#allocation101_spill] sm:$0xff] %v5160_v10  ;;  %v5178_v10 = vmul.f32 %v482_v37, %v7676_v45  ;;  %v5262_v45 = vmul.f32 %v510_v35, %v4279_v8  ;;  %v5301_v35 = vld [vmem:[%s2574_s25 + $0x1d0] sm:$0xff] }
 0x230   : > { %7707 = vst [vmem:[#allocation105_spill] sm:$0xff] %v5172_v12  ;;  %v515_v12 = vld [vmem:[%s6839_s1 + $0x3b8] sm:$0xff] }
 0x231   : > { %7708 = vst [vmem:[#allocation102_spill] sm:$0xff] %v5175_v9  ;;  %v5193_v9 = vmul.f32 %v476_v0, %v4273_v62  ;;  %v5211_v0 = vmul.f32 %v482_v37, %v4307_v16  ;;  %v5229_v37 = vld [vmem:[%s2574_s25 + $0x180] sm:$0xff]  ;;  %v5241_v25 = vmul.f32 %v515_v12, %v7677_v56  ;;  %v5265_v56 = vmul.f32 %v511_v21, %v7679_v48 }
 0x232   : > { %7709 = vst [vmem:[#allocation111_spill] sm:$0xff] %v5178_v10  ;;  %v5196_v10 = vmul.f32 %v477_v7, %v7678_v38  ;;  %v5214_v7 = vmul.f32 %v483_v39, %v7685_v23  ;;  %v5232_v39 = vmul.f32 %v512_v59, %v7674_v1  ;;  %v5256_v1 = vmul.f32 %v508_v24, %v4273_v62  ;;  %v420_v62 = vld [vmem:[%s6839_s1 + $0xc0] sm:$0xff] }
 0x233   : > { %7710 = vst [vmem:[#allocation107_spill] sm:$0xff] %v5181_v60  ;;  %v5199_v60 = vmul.f32 %v478_v53, %v4279_v8  ;;  %v5217_v53 = vmul.f32 %v508_v24, %v7670_v46  ;;  %v5235_v46 = vmul.f32 %v513_v13, %v7675_v17  ;;  %v5259_v17 = vmul.f32 %v509_v42, %v7678_v38  ;;  %v421_v8 = vld [vmem:[%s6839_s1 + $0xc8] sm:$0xff] }
 0x234   : > { %7711 = vst [vmem:[#allocation112_spill] sm:$0xff] %v5193_v9  ;;  %v5286_v38 = vmul.f32 %v512_v59, %v4301_v15  ;;  %v5289_v48 = vmul.f32 %v513_v13, %v7682_v5  ;;  %v5292_v21 = vmul.f32 %v514_v20, %v4307_v16  ;;  %v5295_v24 = vmul.f32 %v515_v12, %v7685_v23  ;;  %v5298_v42 = vld [vmem:[%s2574_s25 + $0x1c8] sm:$0xff]  ;;  %v5309_v15 = vld [vmem:[%s6839_s1 + $0xd8] sm:$0xff]  ;;  %v5314_v16 = vld [vmem:[%s6839_s1 + $0xe0] sm:$0xff] }
 0x235   : > { %7712 = vst [vmem:[#allocation108_spill] sm:$0xff] %v5196_v10  ;;  %v7745_v13 = vld [vmem:[#allocation22_spill] sm:$0xff]  ;;  %v7746_v5 = vld [vmem:[#allocation23_spill] sm:$0xff]  ;;  %v7747_v59 = vld [vmem:[#allocation24_spill] sm:$0xff] }
 0x236   : > { %7713 = vst [vmem:[#allocation98_spill] sm:$0xff] %v5199_v60  ;;  %v5318_v20 = vadd.f32 %v5007_v22, %v7745_v13  ;;  %v5322_v23 = vadd.f32 %v5010_v33, %v7746_v5  ;;  %v5326_v12 = vadd.f32 %v5013_v58, %v7747_v59  ;;  %v5340_v22 = vld [vmem:[%s6839_s1 + $0xf0] sm:$0xff]  ;;  %v5345_v33 = vld [vmem:[%s6839_s1 + $0xf8] sm:$0xff]  ;;  %v7752_v58 = vld [vmem:[#allocation32_spill] sm:$0xff] }
 0x237   : > { %7714 = vst [vmem:[#allocation109_spill] sm:$0xff] %v5202_v49  ;;  %v5349_v13 = vadd.f32 %v5028_v14, %v7752_v58  ;;  %v7754_v5 = vld [vmem:[#allocation34_spill] sm:$0xff]  ;;  %v549_v14 = vld [vmem:[%s6839_s1 + $0x4c8] sm:$0xff]  ;;  %v7758_v58 = vld [vmem:[#allocation39_spill] sm:$0xff] }
 0x238   : > { %7715 = vst [vmem:[#allocation106_spill] sm:$0xff] %v5205_v52  ;;  %v5357_v59 = vadd.f32 %v5034_v6, %v7754_v5  ;;  %v5374_v6 = vadd.f32 %v5049_v44, %v7758_v58  ;;  %v552_v44 = vld [vmem:[%s6839_s1 + $0x4e0] sm:$0xff]  ;;  %v5432_v10 = vld [vmem:[%s2574_s25 + $0x1d8] sm:$0xff]  ;;  %v5495_v27 = vmul.f32 %v549_v14, %v5298_v42 }
 0x239   : > { %7716 = vst [vmem:[#allocation110_spill] sm:$0xff] %v5208_v28  ;;  %v5435_v9 = vld [vmem:[%s2574_s25 + $0x1e0] sm:$0xff] }
 0x23a   : > { %7717 = vst [vmem:[#allocation113_spill] sm:$0xff] %v5211_v0  ;;  %v555_v0 = vld [vmem:[%s6839_s1 + $0x4f8] sm:$0xff] }
 0x23b   : > { %7718 = vst [vmem:[#allocation159_spill] sm:$0xff] %v5214_v7  ;;  %v554_v7 = vld [vmem:[%s6839_s1 + $0x4f0] sm:$0xff] }
 0x23c   : > { %7719 = vst [vmem:[#allocation114_spill] sm:$0xff] %v5217_v53  ;;  %v551_v53 = vld [vmem:[%s6839_s1 + $0x4d8] sm:$0xff] }
 0x23d   : > { %7720 = vst [vmem:[#allocation160_spill] sm:$0xff] %v5220_v36  ;;  %v5253_v36 = vld [vmem:[%s2574_s25 + $0x1a0] sm:$0xff]  ;;  %v5510_v26 = vmul.f32 %v551_v53, %v5432_v10 }
 0x23e   : > { %7721 = vst [vmem:[#allocation115_spill] sm:$0xff] %v5223_v41  ;;  %v5244_v41 = vld [vmem:[%s2574_s25 + $0x188] sm:$0xff] }
 0x23f   : > { %7722 = vst [vmem:[#allocation161_spill] sm:$0xff] %v5226_v19  ;;  %v5250_v19 = vld [vmem:[%s2574_s25 + $0x198] sm:$0xff] }
 0x240   : > { %7723 = vst [vmem:[#allocation116_spill] sm:$0xff] %v5229_v37 }
 0x241   : > { %7724 = vst [vmem:[#allocation162_spill] sm:$0xff] %v5232_v39  ;;  %v5277_v39 = vld [vmem:[%s2574_s25 + $0x1c0] sm:$0xff] }
 0x242   : > { %7725 = vst [vmem:[#allocation117_spill] sm:$0xff] %v5235_v46  ;;  %v5274_v46 = vld [vmem:[%s2574_s25 + $0x1b8] sm:$0xff]  ;;  %v5429_v60 = vmul.f32 %v420_v62, %v5277_v39 }
 0x243   : > { %7726 = vst [vmem:[#allocation163_spill] sm:$0xff] %v5238_v61  ;;  %v5271_v61 = vld [vmem:[%s2574_s25 + $0x1b0] sm:$0xff]  ;;  %v5426_v49 = vmul.f32 %v5345_v33, %v5274_v46 }
 0x244   : > { %7727 = vst [vmem:[#allocation118_spill] sm:$0xff] %v5241_v25  ;;  %v5268_v25 = vld [vmem:[%s2574_s25 + $0x1a8] sm:$0xff]  ;;  %v5422_v52 = vmul.f32 %v5340_v22, %v5271_v61 }
 0x245   : > { %7728 = vst [vmem:[#allocation164_spill] sm:$0xff] %v5244_v41 }
 0x246   : > { %7729 = vst [vmem:[#allocation8_spill] sm:$0xff] %v5247_v54 }
 0x247   : > { %7730 = vst [vmem:[#allocation165_spill] sm:$0xff] %v5250_v19 }
 0x248   : > { %7731 = vst [vmem:[#allocation9_spill] sm:$0xff] %v5253_v36 }
 0x249   : > { %7732 = vst [vmem:[#allocation166_spill] sm:$0xff] %v5256_v1  ;;  %v5385_v1 = vmul.f32 %v420_v62, %v5229_v37  ;;  %v5453_v62 = vld [vmem:[%s2574_s25 + $0x1f0] sm:$0xff] }
 0x24a   : > { %7733 = vst [vmem:[#allocation10_spill] sm:$0xff] %v5259_v17  ;;  %v548_v17 = vld [vmem:[%s6839_s1 + $0x4c0] sm:$0xff] }
 0x24b   : > { %7734 = vst [vmem:[#allocation167_spill] sm:$0xff] %v5262_v45 }
 0x24c   : > { %7735 = vst [vmem:[#allocation11_spill] sm:$0xff] %v5265_v56  ;;  %v422_v56 = vld [vmem:[%s6839_s1 + $0xd0] sm:$0xff] }
 0x24d   : > { %7736 = vst [vmem:[#allocation168_spill] sm:$0xff] %v5268_v25  ;;  %v5400_v58 = vmul.f32 %v422_v56, %v5247_v54 }
 0x24e   : > { %7737 = vst [vmem:[#allocation12_spill] sm:$0xff] %v5271_v61 }
 0x24f   : > { %7738 = vst [vmem:[#allocation169_spill] sm:$0xff] %v5274_v46 }
 0x250   : > { %7739 = vst [vmem:[#allocation26_spill] sm:$0xff] %v5286_v38  ;;  %v7756_v38 = vld [vmem:[#allocation35_spill] sm:$0xff] }
 0x251   : > { %7740 = vst [vmem:[#allocation170_spill] sm:$0xff] %v5289_v48  ;;  %v5335_v48 = vld [vmem:[%s6839_s1 + $0xe8] sm:$0xff]  ;;  %v5361_v45 = vadd.f32 %v5037_v18, %v7756_v38 }
 0x252   : > { %7741 = vst [vmem:[#allocation171_spill] sm:$0xff] %v5292_v21  ;;  %v7762_v38 = vld [vmem:[#allocation41_spill] sm:$0xff]  ;;  %v5418_v28 = vmul.f32 %v5335_v48, %v5268_v25 }
 0x253   : > { %7742 = vst [vmem:[#allocation172_spill] sm:$0xff] %v5295_v24  ;;  %v7748_v24 = vld [vmem:[#allocation25_spill] sm:$0xff]  ;;  %v5382_v5 = vadd.f32 %v5055_v40, %v7762_v38  ;;  %v5397_v40 = vmul.f32 %v421_v8, %v5244_v41  ;;  %v5408_v38 = vmul.f32 %v5314_v16, %v5253_v36 }
 0x254   : > { %7743 = vst [vmem:[#allocation173_spill] sm:$0xff] %v5309_v15  ;;  %v5330_v21 = vadd.f32 %v5016_v2, %v7748_v24  ;;  %v7753_v2 = vld [vmem:[#allocation33_spill] sm:$0xff] }
 0x255   : > { %7744 = vst [vmem:[#allocation174_spill] sm:$0xff] %v5314_v16  ;;  %v5353_v24 = vadd.f32 %v5031_v63, %v7753_v2  ;;  %v550_v63 = vld [vmem:[%s6839_s1 + $0x4d0] sm:$0xff]  ;;  %v7760_v2 = vld [vmem:[#allocation40_spill] sm:$0xff]  ;;  %v583_v16 = vld [vmem:[%s6839_s1 + $0x5d8] sm:$0xff] }
 0x256   : > { %7749 = vst [vmem:[#allocation175_spill] sm:$0xff] %v5335_v48  ;;  %v5378_v18 = vadd.f32 %v5052_v3, %v7760_v2  ;;  %v553_v3 = vld [vmem:[%s6839_s1 + $0x4e8] sm:$0xff]  ;;  %v5404_v2 = vmul.f32 %v5309_v15, %v5250_v19  ;;  %v580_v48 = vld [vmem:[%s6839_s1 + $0x5c0] sm:$0xff]  ;;  %v5486_v15 = vmul.f32 %v554_v7, %v5271_v61  ;;  %v5507_v34 = vmul.f32 %v550_v63, %v5301_v35 }
 0x257   : > { %7750 = vst [vmem:[#allocation176_spill] sm:$0xff] %v5340_v22  ;;  %v5447_v22 = vmul.f32 %v548_v17, %v5229_v37 }
 0x258   : > { %7751 = vst [vmem:[#allocation177_spill] sm:$0xff] %v5345_v33  ;;  %v5450_v33 = vmul.f32 %v549_v14, %v5244_v41  ;;  %v5516_v14 = vmul.f32 %v553_v3, %v5438_v11 }
 0x259   : > { %7755 = vst [vmem:[#allocation178_spill] sm:$0xff] %v5357_v59  ;;  %v5492_v59 = vmul.f32 %v548_v17, %v5277_v39  ;;  %v5513_v17 = vmul.f32 %v552_v44, %v5435_v9 }
 0x25a   : > { %7757 = vst [vmem:[#allocation27_spill] sm:$0xff] %v5361_v45  ;;  %v585_v45 = vld [vmem:[%s6839_s1 + $0x5e8] sm:$0xff] }
 0x25b   : > { %7759 = vst [vmem:[#allocation181_spill] sm:$0xff] %v5374_v6  ;;  %v5474_v6 = vmul.f32 %v553_v3, %v5268_v25  ;;  %v5543_v3 = vmul.f32 %v583_v16, %v5250_v19 }
 0x25c   : > { %7761 = vst [vmem:[#allocation81_spill] sm:$0xff] %v5378_v18  ;;  %v5444_v18 = vmul.f32 %v422_v56, %v5301_v35  ;;  %v582_v56 = vld [vmem:[%s6839_s1 + $0x5d0] sm:$0xff] }
 0x25d   : > { %7763 = vst [vmem:[#allocation15_spill] sm:$0xff] %v5382_v5  ;;  %v5441_v5 = vmul.f32 %v421_v8, %v5298_v42  ;;  %v581_v8 = vld [vmem:[%s6839_s1 + $0x5c8] sm:$0xff] }
 0x25e   : > { %7764 = vst [vmem:[#allocation22_spill] sm:$0xff] %v5422_v52  ;;  %v5489_v52 = vmul.f32 %v555_v0, %v5274_v46 }
 0x25f   : > { %7765 = vst [vmem:[#allocation23_spill] sm:$0xff] %v5426_v49  ;;  %v584_v49 = vld [vmem:[%s6839_s1 + $0x5e0] sm:$0xff] }
 0x260   : > { %7766 = vst [vmem:[#allocation24_spill] sm:$0xff] %v5429_v60  ;;  %v5471_v60 = vmul.f32 %v552_v44, %v5253_v36  ;;  %v613_v44 = vld [vmem:[%s6839_s1 + $0x6c8] sm:$0xff] }
 0x261   : > { %7767 = vst [vmem:[#allocation25_spill] sm:$0xff] %v5441_v5  ;;  %v5468_v5 = vmul.f32 %v551_v53, %v5250_v19  ;;  %v612_v53 = vld [vmem:[%s6839_s1 + $0x6c0] sm:$0xff] }
 0x262   : > { %7768 = vst [vmem:[#allocation32_spill] sm:$0xff] %v5444_v18  ;;  %v5465_v18 = vmul.f32 %v550_v63, %v5247_v54  ;;  %v5528_v63 = vmul.f32 %v581_v8, %v5244_v41 }
 0x263   : > { %7769 = vst [vmem:[#allocation33_spill] sm:$0xff] %v5489_v52  ;;  %v5525_v52 = vmul.f32 %v580_v48, %v5229_v37 }
 0x264   : > { %7770 = vst [vmem:[#allocation34_spill] sm:$0xff] %v5492_v59  ;;  %v5522_v59 = vmul.f32 %v555_v0, %v5498_v51  ;;  %v5540_v0 = vmul.f32 %v582_v56, %v5247_v54 }
 0x265   : > { %7771 = vst [vmem:[#allocation35_spill] sm:$0xff] %v5495_v27  ;;  %v5519_v27 = vmul.f32 %v554_v7, %v5453_v62  ;;  %v614_v7 = vld [vmem:[%s6839_s1 + $0x6d0] sm:$0xff] }
 0x266   : > { %7772 = vst [vmem:[#allocation39_spill] sm:$0xff] %v5507_v34  ;;  %v5579_v34 = vmul.f32 %v582_v56, %v5301_v35  ;;  %v5600_v56 = vmul.f32 %v613_v44, %v5244_v41 }
 0x267   : > { %7773 = vst [vmem:[#allocation40_spill] sm:$0xff] %v5510_v26  ;;  %v619_v26 = vld [vmem:[%s6839_s1 + $0x6f8] sm:$0xff] }
 0x268   : > { %7774 = vst [vmem:[#allocation41_spill] sm:$0xff] %v5513_v17  ;;  %v618_v17 = vld [vmem:[%s6839_s1 + $0x6f0] sm:$0xff] }
 0x269   : > { %7775 = vst [vmem:[#allocation195_spill] sm:$0xff] %v5516_v14  ;;  %v5570_v14 = vmul.f32 %v581_v8, %v5298_v42  ;;  %v5588_v8 = vmul.f32 %v585_v45, %v5438_v11 }
 0x26a   : > { %7776 = vst [vmem:[#allocation196_spill] sm:$0xff] %v5519_v27  ;;  %v616_v27 = vld [vmem:[%s6839_s1 + $0x6e0] sm:$0xff] }
 0x26b   : > { %7777 = vst [vmem:[#allocation197_spill] sm:$0xff] %v5522_v59  ;;  %v615_v59 = vld [vmem:[%s6839_s1 + $0x6d8] sm:$0xff] }
 0x26c   : > { %7778 = vst [vmem:[#allocation198_spill] sm:$0xff] %v5525_v52  ;;  %v5549_v52 = vmul.f32 %v585_v45, %v5268_v25  ;;  %v645_v45 = vld [vmem:[%s6839_s1 + $0x7c8] sm:$0xff] }
 0x26d   : > { %7779 = vst [vmem:[#allocation199_spill] sm:$0xff] %v5528_v63  ;;  %v5546_v63 = vmul.f32 %v584_v49, %v5253_v36 }
 0x26e   : > { %7780 = vst [vmem:[#allocation200_spill] sm:$0xff] %v5540_v0  ;;  %v617_v0 = vld [vmem:[%s6839_s1 + $0x6e8] sm:$0xff] }
 0x26f   : > { %7781 = vst [vmem:[#allocation201_spill] sm:$0xff] %v5543_v3  ;;  %v5561_v3 = vmul.f32 %v586_v50, %v5271_v61 }
 0x270   : > { %7782 = vst [vmem:[#allocation202_spill] sm:$0xff] %v5546_v63  ;;  %v5564_v63 = vmul.f32 %v587_v31, %v5274_v46 }
 0x271   : > { %7783 = vst [vmem:[#allocation203_spill] sm:$0xff] %v5549_v52  ;;  %v5567_v52 = vmul.f32 %v580_v48, %v5277_v39  ;;  %v5585_v48 = vmul.f32 %v584_v49, %v5435_v9  ;;  %v644_v49 = vld [vmem:[%s6839_s1 + $0x7c0] sm:$0xff] }
 0x272   : > { %7784 = vst [vmem:[#allocation204_spill] sm:$0xff] %v5561_v3  ;;  %v5582_v3 = vmul.f32 %v583_v16, %v5432_v10  ;;  %v5615_v16 = vmul.f32 %v615_v59, %v5250_v19 }
 0x273   : > { %7785 = vst [vmem:[#allocation205_spill] sm:$0xff] %v5564_v63  ;;  %v5597_v63 = vmul.f32 %v612_v53, %v5229_v37 }
 0x274   : > { %7786 = vst [vmem:[#allocation206_spill] sm:$0xff] %v5567_v52  ;;  %v5594_v52 = vmul.f32 %v587_v31, %v5498_v51  ;;  %v5612_v31 = vmul.f32 %v614_v7, %v5247_v54 }
 0x275   : > { %7787 = vst [vmem:[#allocation207_spill] sm:$0xff] %v5570_v14  ;;  %v5591_v14 = vmul.f32 %v586_v50, %v5453_v62  ;;  %v646_v50 = vld [vmem:[%s6839_s1 + $0x7d0] sm:$0xff] }
 0x276   : > { %7788 = vst [vmem:[#allocation208_spill] sm:$0xff] %v5579_v34  ;;  %v5651_v34 = vmul.f32 %v614_v7, %v5301_v35  ;;  %v5672_v7 = vmul.f32 %v645_v45, %v5244_v41  ;;  %v5693_v41 = vmul.f32 %v644_v49, %v5277_v39 }
 0x277   : > { %7789 = vst [vmem:[#allocation209_spill] sm:$0xff] %v5582_v3  ;;  %v651_v3 = vld [vmem:[%s6839_s1 + $0x7f8] sm:$0xff] }
 0x278   : > { %7790 = vst [vmem:[#allocation210_spill] sm:$0xff] %v5585_v48  ;;  %v650_v48 = vld [vmem:[%s6839_s1 + $0x7f0] sm:$0xff] }
 0x279   : > { %7791 = vst [vmem:[#allocation211_spill] sm:$0xff] %v5588_v8  ;;  %v5642_v8 = vmul.f32 %v613_v44, %v5298_v42  ;;  %v5660_v44 = vmul.f32 %v617_v0, %v5438_v11 }
 0x27a   : > { %7792 = vst [vmem:[#allocation212_spill] sm:$0xff] %v5591_v14  ;;  %v648_v14 = vld [vmem:[%s6839_s1 + $0x7e0] sm:$0xff] }
 0x27b   : > { %7793 = vst [vmem:[#allocation213_spill] sm:$0xff] %v5594_v52  ;;  %v647_v52 = vld [vmem:[%s6839_s1 + $0x7d8] sm:$0xff] }
 0x27c   : > { %7794 = vst [vmem:[#allocation214_spill] sm:$0xff] %v5597_v63  ;;  %v5621_v63 = vmul.f32 %v617_v0, %v5268_v25  ;;  %v5681_v0 = vmul.f32 %v648_v14, %v5253_v36 }
 0x27d   : > { %7795 = vst [vmem:[#allocation215_spill] sm:$0xff] %v5600_v56  ;;  %v5618_v56 = vmul.f32 %v616_v27, %v5253_v36  ;;  %v5702_v36 = vmul.f32 %v647_v52, %v5432_v10 }
 0x27e   : > { %7796 = vst [vmem:[#allocation216_spill] sm:$0xff] %v5612_v31  ;;  %v649_v31 = vld [vmem:[%s6839_s1 + $0x7e8] sm:$0xff] }
 0x27f   : > { %7797 = vst [vmem:[#allocation217_spill] sm:$0xff] %v5615_v16  ;;  %v5633_v16 = vmul.f32 %v618_v17, %v5271_v61 }
 0x280   : > { %7798 = vst [vmem:[#allocation218_spill] sm:$0xff] %v5618_v56  ;;  %v5636_v56 = vmul.f32 %v619_v26, %v5274_v46 }
 0x281   : > { %7799 = vst [vmem:[#allocation219_spill] sm:$0xff] %v5621_v63  ;;  %v5639_v63 = vmul.f32 %v612_v53, %v5277_v39  ;;  %v5657_v53 = vmul.f32 %v616_v27, %v5435_v9  ;;  %v5678_v27 = vmul.f32 %v647_v52, %v5250_v19  ;;  %v5699_v19 = vmul.f32 %v646_v50, %v5301_v35 }
 0x282   : > { %7800 = vst [vmem:[#allocation220_spill] sm:$0xff] %v5633_v16  ;;  %v5654_v16 = vmul.f32 %v615_v59, %v5432_v10  ;;  %v5675_v59 = vmul.f32 %v646_v50, %v5247_v54  ;;  %v5696_v54 = vmul.f32 %v645_v45, %v5298_v42  ;;  %v5718_v45 = vadd.f32 %v5385_v1, %v5318_v20 }
 0x283   : > { %7801 = vst [vmem:[#allocation221_spill] sm:$0xff] %v5636_v56  ;;  %v5669_v56 = vmul.f32 %v644_v49, %v5229_v37  ;;  %v5690_v37 = vmul.f32 %v651_v3, %v5274_v46  ;;  %v5711_v46 = vmul.f32 %v650_v48, %v5453_v62  ;;  %v5714_v49 = vmul.f32 %v651_v3, %v5498_v51 }
 0x284   : > { %7802 = vst [vmem:[#allocation222_spill] sm:$0xff] %v5639_v63  ;;  %v5666_v63 = vmul.f32 %v619_v26, %v5498_v51  ;;  %v5687_v26 = vmul.f32 %v650_v48, %v5271_v61  ;;  %v5708_v61 = vmul.f32 %v649_v31, %v5438_v11  ;;  %v5722_v52 = vadd.f32 %v5397_v40, %v5322_v23  ;;  %v7815_v40 = vld [vmem:[#allocation40_spill] sm:$0xff] }
 0x285   : > { %7803 = vst [vmem:[#allocation223_spill] sm:$0xff] %v5642_v8  ;;  %v5663_v8 = vmul.f32 %v618_v17, %v5453_v62  ;;  %v5684_v17 = vmul.f32 %v649_v31, %v5268_v25  ;;  %v5705_v25 = vmul.f32 %v648_v14, %v5435_v9  ;;  %v5726_v14 = vadd.f32 %v5400_v58, %v5326_v12  ;;  %v7818_v58 = vld [vmem:[#allocation41_spill] sm:$0xff] }
 0x286   : > { %v5730_v50 = vadd.f32 %v5404_v2, %v5330_v21  ;;  %v5734_v3 = vadd.f32 %v5408_v38, %v5349_v13  ;;  %v5738_v1 = vadd.f32 %v5418_v28, %v5353_v24  ;;  %v5742_v20 = vadd.f32 %v5447_v22, %v4578_v4  ;;  %v7804_v22 = vld [vmem:[#allocation33_spill] sm:$0xff]  ;;  %v7806_v13 = vld [vmem:[#allocation34_spill] sm:$0xff]  ;;  %v7808_v24 = vld [vmem:[#allocation148_spill] sm:$0xff] }
 0x287   : > { %v5746_v23 = vadd.f32 %v5450_v33, %v4582_v43  ;;  %v5750_v21 = vadd.f32 %v5465_v18, %v4586_v29  ;;  %v5754_v12 = vadd.f32 %v5468_v5, %v4590_v47  ;;  %v5758_v28 = vadd.f32 %v5471_v60, %v4594_v30  ;;  %v7805_v33 = vld [vmem:[#allocation147_spill] sm:$0xff]  ;;  %v7811_v60 = vld [vmem:[#allocation149_spill] sm:$0xff]  ;;  %v7820_v2 = vld [vmem:[#allocation152_spill] sm:$0xff] }
 0x288   : > { %v5762_v4 = vadd.f32 %v5474_v6, %v4598_v55  ;;  %v5766_v43 = vadd.f32 %v5486_v15, %v4602_v57  ;;  %v5770_v29 = vadd.f32 %v7804_v22, %v4606_v32  ;;  %v5774_v47 = vadd.f32 %v7806_v13, %v7805_v33  ;;  %v7809_v18 = vld [vmem:[#allocation35_spill] sm:$0xff]  ;;  %v7814_v6 = vld [vmem:[#allocation150_spill] sm:$0xff]  ;;  %v7823_v31 = vld [vmem:[#allocation153_spill] sm:$0xff] }
 0x289   : > { %v5778_v30 = vadd.f32 %v7809_v18, %v7808_v24  ;;  %v7812_v5 = vld [vmem:[#allocation39_spill] sm:$0xff]  ;;  %v5786_v57 = vadd.f32 %v7815_v40, %v7814_v6  ;;  %v7824_v22 = vld [vmem:[#allocation196_spill] sm:$0xff]  ;;  %v7826_v13 = vld [vmem:[#allocation154_spill] sm:$0xff] }
 0x28a   : > { %7807 = vst [vmem:[#allocation33_spill] sm:$0xff] %v5774_v47  ;;  %v5782_v55 = vadd.f32 %v7812_v5, %v7811_v60  ;;  %v7817_v15 = vld [vmem:[#allocation151_spill] sm:$0xff]  ;;  %v5798_v33 = vadd.f32 %v7824_v22, %v7823_v31  ;;  %v7827_v24 = vld [vmem:[#allocation197_spill] sm:$0xff]  ;;  %v7830_v5 = vld [vmem:[#allocation198_spill] sm:$0xff] }
 0x28b   : > { %7810 = vst [vmem:[#allocation147_spill] sm:$0xff] %v5778_v30  ;;  %v5790_v32 = vadd.f32 %v7818_v58, %v7817_v15  ;;  %v7821_v38 = vld [vmem:[#allocation195_spill] sm:$0xff]  ;;  %v5802_v18 = vadd.f32 %v7827_v24, %v7826_v13  ;;  %v7832_v40 = vld [vmem:[#allocation156_spill] sm:$0xff]  ;;  %v7835_v58 = vld [vmem:[#allocation157_spill] sm:$0xff] }
 0x28c   : > { %7813 = vst [vmem:[#allocation34_spill] sm:$0xff] %v5782_v55  ;;  %v5794_v48 = vadd.f32 %v7821_v38, %v7820_v2  ;;  %v7829_v60 = vld [vmem:[#allocation155_spill] sm:$0xff]  ;;  %v7838_v38 = vld [vmem:[#allocation158_spill] sm:$0xff]  ;;  %v7844_v24 = vld [vmem:[#allocation60_spill] sm:$0xff] }
 0x28d   : > { %7816 = vst [vmem:[#allocation148_spill] sm:$0xff] %v5786_v57  ;;  %v5806_v6 = vadd.f32 %v7830_v5, %v7829_v60  ;;  %v7833_v57 = vld [vmem:[#allocation199_spill] sm:$0xff]  ;;  %v7847_v5 = vld [vmem:[#allocation120_spill] sm:$0xff]  ;;  %v7997_v55 = vld [vmem:[#allocation145_spill] sm:$0xff] }
 0x28e   : > { %7819 = vst [vmem:[#allocation35_spill] sm:$0xff] %v5790_v32  ;;  %v5810_v15 = vadd.f32 %v7833_v57, %v7832_v40  ;;  %v7836_v32 = vld [vmem:[#allocation200_spill] sm:$0xff]  ;;  %v7841_v22 = vld [vmem:[#allocation119_spill] sm:$0xff]  ;;  %v7850_v40 = vld [vmem:[#allocation61_spill] sm:$0xff] }
 0x28f   : > { %7822 = vst [vmem:[#allocation149_spill] sm:$0xff] %v5794_v48  ;;  %v5814_v2 = vadd.f32 %v7836_v32, %v7835_v58  ;;  %v7839_v48 = vld [vmem:[#allocation201_spill] sm:$0xff]  ;;  %v7998_v30 = vld [vmem:[#allocation4_spill] sm:$0xff] }
 0x290   : > { %7825 = vst [vmem:[#allocation39_spill] sm:$0xff] %v5798_v33  ;;  %v5818_v31 = vadd.f32 %v7839_v48, %v7838_v38  ;;  %v7842_v33 = vld [vmem:[#allocation202_spill] sm:$0xff]  ;;  %v7853_v58 = vld [vmem:[#allocation121_spill] sm:$0xff] }
 0x291   : > { %7828 = vst [vmem:[#allocation150_spill] sm:$0xff] %v5802_v18  ;;  %v5822_v13 = vadd.f32 %v7842_v33, %v7841_v22  ;;  %v7845_v18 = vld [vmem:[#allocation203_spill] sm:$0xff]  ;;  %v7856_v38 = vld [vmem:[#allocation62_spill] sm:$0xff] }
 0x292   : > { %7831 = vst [vmem:[#allocation40_spill] sm:$0xff] %v5806_v6  ;;  %v5826_v60 = vadd.f32 %v7845_v18, %v7844_v24  ;;  %v7848_v6 = vld [vmem:[#allocation204_spill] sm:$0xff]  ;;  %v7859_v22 = vld [vmem:[#allocation122_spill] sm:$0xff]  ;;  %v7862_v24 = vld [vmem:[#allocation63_spill] sm:$0xff] }
 0x293   : > { %7834 = vst [vmem:[#allocation151_spill] sm:$0xff] %v5810_v15  ;;  %v5830_v57 = vadd.f32 %v7848_v6, %v7847_v5  ;;  %v7851_v15 = vld [vmem:[#allocation205_spill] sm:$0xff]  ;;  %v7865_v5 = vld [vmem:[#allocation123_spill] sm:$0xff] }
 0x294   : > { %7837 = vst [vmem:[#allocation41_spill] sm:$0xff] %v5814_v2  ;;  %v5834_v32 = vadd.f32 %v7851_v15, %v7850_v40  ;;  %v7854_v2 = vld [vmem:[#allocation206_spill] sm:$0xff]  ;;  %v7868_v40 = vld [vmem:[#allocation64_spill] sm:$0xff] }
 0x295   : > { %7840 = vst [vmem:[#allocation152_spill] sm:$0xff] %v5818_v31  ;;  %v5838_v48 = vadd.f32 %v7854_v2, %v7853_v58  ;;  %v7857_v31 = vld [vmem:[#allocation207_spill] sm:$0xff]  ;;  %v7871_v58 = vld [vmem:[#allocation124_spill] sm:$0xff] }
 0x296   : > { %7843 = vst [vmem:[#allocation195_spill] sm:$0xff] %v5822_v13  ;;  %v5842_v33 = vadd.f32 %v7857_v31, %v7856_v38  ;;  %v7860_v13 = vld [vmem:[#allocation208_spill] sm:$0xff]  ;;  %v7874_v38 = vld [vmem:[#allocation65_spill] sm:$0xff] }
 0x297   : > { %7846 = vst [vmem:[#allocation153_spill] sm:$0xff] %v5826_v60  ;;  %v5846_v18 = vadd.f32 %v7860_v13, %v7859_v22  ;;  %v7863_v60 = vld [vmem:[#allocation209_spill] sm:$0xff] }
 0x298   : > { %7849 = vst [vmem:[#allocation196_spill] sm:$0xff] %v5830_v57  ;;  %v5850_v6 = vadd.f32 %v7863_v60, %v7862_v24  ;;  %v7866_v57 = vld [vmem:[#allocation210_spill] sm:$0xff]  ;;  %v7877_v22 = vld [vmem:[#allocation125_spill] sm:$0xff]  ;;  %v7880_v24 = vld [vmem:[#allocation67_spill] sm:$0xff] }
 0x299   : > { %7852 = vst [vmem:[#allocation154_spill] sm:$0xff] %v5834_v32  ;;  %v5854_v15 = vadd.f32 %v7866_v57, %v7865_v5  ;;  %v7869_v32 = vld [vmem:[#allocation211_spill] sm:$0xff]  ;;  %v7883_v5 = vld [vmem:[#allocation82_spill] sm:$0xff] }
 0x29a   : > { %7855 = vst [vmem:[#allocation197_spill] sm:$0xff] %v5838_v48  ;;  %v5858_v2 = vadd.f32 %v7869_v32, %v7868_v40  ;;  %v7872_v48 = vld [vmem:[#allocation212_spill] sm:$0xff] }
 0x29b   : > { %7858 = vst [vmem:[#allocation155_spill] sm:$0xff] %v5842_v33  ;;  %v5862_v31 = vadd.f32 %v7872_v48, %v7871_v58  ;;  %v7875_v33 = vld [vmem:[#allocation213_spill] sm:$0xff]  ;;  %v7884_v32 = vld [vmem:[#allocation216_spill] sm:$0xff] }
 0x29c   : > { %7861 = vst [vmem:[#allocation198_spill] sm:$0xff] %v5846_v18  ;;  %v5866_v13 = vadd.f32 %v7875_v33, %v7874_v38  ;;  %v7878_v18 = vld [vmem:[#allocation214_spill] sm:$0xff]  ;;  %v5878_v40 = vadd.f32 %v7884_v32, %v7883_v5  ;;  %v7887_v48 = vld [vmem:[#allocation217_spill] sm:$0xff]  ;;  %v7901_v32 = vld [vmem:[#allocation183_spill] sm:$0xff] }
 0x29d   : > { %7864 = vst [vmem:[#allocation156_spill] sm:$0xff] %v5850_v6  ;;  %v5870_v60 = vadd.f32 %v7878_v18, %v7877_v22  ;;  %v7881_v6 = vld [vmem:[#allocation215_spill] sm:$0xff]  ;;  %v7890_v33 = vld [vmem:[#allocation218_spill] sm:$0xff] }
 0x29e   : > { %7867 = vst [vmem:[#allocation199_spill] sm:$0xff] %v5854_v15  ;;  %v5874_v57 = vadd.f32 %v7881_v6, %v7880_v24  ;;  %v7893_v18 = vld [vmem:[#allocation219_spill] sm:$0xff]  ;;  %v7896_v15 = vld [vmem:[#allocation220_spill] sm:$0xff] }
 0x29f   : > { %7870 = vst [vmem:[#allocation157_spill] sm:$0xff] %v5858_v2  ;;  %v7886_v2 = vld [vmem:[#allocation126_spill] sm:$0xff]  ;;  %v7898_v24 = vld [vmem:[#allocation127_spill] sm:$0xff] }
 0x2a0   : > { %7873 = vst [vmem:[#allocation200_spill] sm:$0xff] %v5862_v31  ;;  %v5882_v58 = vadd.f32 %v7887_v48, %v7886_v2  ;;  %v7889_v31 = vld [vmem:[#allocation43_spill] sm:$0xff]  ;;  %v7904_v48 = vld [vmem:[#allocation69_spill] sm:$0xff] }
 0x2a1   : > { %7876 = vst [vmem:[#allocation158_spill] sm:$0xff] %v5866_v13  ;;  %v5886_v38 = vadd.f32 %v7890_v33, %v7889_v31  ;;  %v7892_v13 = vld [vmem:[#allocation68_spill] sm:$0xff] }
 0x2a2   : > { %7879 = vst [vmem:[#allocation201_spill] sm:$0xff] %v5870_v60  ;;  %v5890_v22 = vadd.f32 %v7893_v18, %v7892_v13  ;;  %v7895_v60 = vld [vmem:[#allocation182_spill] sm:$0xff]  ;;  %v7907_v33 = vld [vmem:[#allocation184_spill] sm:$0xff] }
 0x2a3   : > { %7882 = vst [vmem:[#allocation119_spill] sm:$0xff] %v5874_v57  ;;  %v5894_v6 = vadd.f32 %v7896_v15, %v7895_v60  ;;  %v7899_v57 = vld [vmem:[#allocation221_spill] sm:$0xff]  ;;  %v5910_v13 = vadd.f32 %v5651_v34, %v7907_v33  ;;  %v7909_v18 = vld [vmem:[#allocation128_spill] sm:$0xff] }
 0x2a4   : > { %7885 = vst [vmem:[#allocation202_spill] sm:$0xff] %v5878_v40  ;;  %v5898_v5 = vadd.f32 %v7899_v57, %v7898_v24  ;;  %v7902_v40 = vld [vmem:[#allocation222_spill] sm:$0xff]  ;;  %v5914_v15 = vadd.f32 %v5654_v16, %v7909_v18  ;;  %v7911_v60 = vld [vmem:[#allocation185_spill] sm:$0xff]  ;;  %v7913_v24 = vld [vmem:[#allocation71_spill] sm:$0xff] }
 0x2a5   : > { %7888 = vst [vmem:[#allocation60_spill] sm:$0xff] %v5882_v58  ;;  %v5902_v2 = vadd.f32 %v7902_v40, %v7901_v32  ;;  %v7905_v58 = vld [vmem:[#allocation223_spill] sm:$0xff]  ;;  %v5918_v57 = vadd.f32 %v5657_v53, %v7911_v60  ;;  %v5922_v40 = vadd.f32 %v5660_v44, %v7913_v24  ;;  %v7915_v32 = vld [vmem:[#allocation186_spill] sm:$0xff]  ;;  %v7921_v53 = vld [vmem:[#allocation72_spill] sm:$0xff] }
 0x2a6   : > { %7891 = vst [vmem:[#allocation203_spill] sm:$0xff] %v5886_v38  ;;  %v5906_v31 = vadd.f32 %v7905_v58, %v7904_v48  ;;  %v5926_v58 = vadd.f32 %v5663_v8, %v7915_v32  ;;  %v7917_v48 = vld [vmem:[#allocation129_spill] sm:$0xff]  ;;  %v7919_v16 = vld [vmem:[#allocation187_spill] sm:$0xff]  ;;  %v5940_v18 = vadd.f32 %v5672_v7, %v7921_v53  ;;  %v7923_v44 = vld [vmem:[#allocation188_spill] sm:$0xff] }
 0x2a7   : > { %7894 = vst [vmem:[#allocation120_spill] sm:$0xff] %v5890_v22  ;;  %v5930_v34 = vadd.f32 %v5666_v63, %v7917_v48  ;;  %v5936_v33 = vadd.f32 %v5669_v56, %v7919_v16  ;;  %v5944_v60 = vadd.f32 %v5675_v59, %v7923_v44  ;;  %v7925_v8 = vld [vmem:[#allocation130_spill] sm:$0xff]  ;;  %v7927_v63 = vld [vmem:[#allocation189_spill] sm:$0xff]  ;;  %v7933_v53 = vld [vmem:[#allocation131_spill] sm:$0xff] }
 0x2a8   : > { %7897 = vst [vmem:[#allocation204_spill] sm:$0xff] %v5894_v6  ;;  %v5948_v24 = vadd.f32 %v5678_v27, %v7925_v8  ;;  %v5952_v32 = vadd.f32 %v5681_v0, %v7927_v63  ;;  %v7929_v48 = vld [vmem:[#allocation66_spill] sm:$0xff]  ;;  %v5964_v59 = vadd.f32 %v5690_v37, %v7933_v53  ;;  %v7935_v44 = vld [vmem:[#allocation191_spill] sm:$0xff]  ;;  %v7939_v63 = vld [vmem:[#allocation192_spill] sm:$0xff] }
 0x2a9   : > { %7900 = vst [vmem:[#allocation61_spill] sm:$0xff] %v5898_v5  ;;  %v5956_v56 = vadd.f32 %v5684_v17, %v7929_v48  ;;  %v7931_v16 = vld [vmem:[#allocation190_spill] sm:$0xff]  ;;  %v5968_v27 = vadd.f32 %v5693_v41, %v7935_v44  ;;  %v5976_v17 = vadd.f32 %v5699_v19, %v7939_v63  ;;  %v7941_v48 = vld [vmem:[#allocation132_spill] sm:$0xff]  ;;  %v7943_v37 = vld [vmem:[#allocation193_spill] sm:$0xff] }
 0x2aa   : > { %7903 = vst [vmem:[#allocation205_spill] sm:$0xff] %v5902_v2  ;;  %v5960_v7 = vadd.f32 %v5687_v26, %v7931_v16  ;;  %v7937_v8 = vld [vmem:[#allocation70_spill] sm:$0xff]  ;;  %v5980_v26 = vadd.f32 %v5702_v36, %v7941_v48  ;;  %v5982_v16 = vpop.permute.xlu0 %1566  ;;  %v5986_v53 = vadd.f32 %v5705_v25, %v7943_v37  ;;  %v7945_v41 = vld [vmem:[#allocation73_spill] sm:$0xff] }
 0x2ab   : > { %7906 = vst [vmem:[#allocation121_spill] sm:$0xff] %v5906_v31  ;;  %v5972_v0 = vadd.f32 %v5696_v54, %v7937_v8  ;;  %v5990_v44 = vadd.f32 %v5708_v61, %v7945_v41  ;;  %v7947_v54 = vld [vmem:[#allocation194_spill] sm:$0xff]  ;;  %v7949_v19 = vld [vmem:[#allocation133_spill] sm:$0xff]  ;;  %v1598_v25 = vadd.f32 %v5982_v16, %v5722_v52  ;;  %v1599_v61 = vadd.f32 %v5982_v16, %v5726_v14  ;;  %v7962_v14 = vld [vmem:[#allocation24_spill] sm:$0xff] }
 0x2ac   : > { %7908 = vst [vmem:[#allocation206_spill] sm:$0xff] %v5910_v13  ;;  %v5994_v8 = vadd.f32 %v5711_v46, %v7947_v54  ;;  %v5998_v63 = vadd.f32 %v5714_v49, %v7949_v19  ;;  %v7951_v36 = vld [vmem:[#allocation178_spill] sm:$0xff]  ;;  %v7954_v41 = vld [vmem:[#allocation29_spill] sm:$0xff]  ;;  %v7956_v49 = vld [vmem:[#allocation27_spill] sm:$0xff] }
 0x2ad   : > { %7910 = vst [vmem:[#allocation62_spill] sm:$0xff] %v5914_v15  ;;  %v7952_v48 = vld [vmem:[#allocation22_spill] sm:$0xff]  ;;  %v7955_v54 = vld [vmem:[#allocation173_spill] sm:$0xff]  ;;  %v7957_v19 = vld [vmem:[#allocation23_spill] sm:$0xff] }
 0x2ae   : > { %7912 = vst [vmem:[#allocation207_spill] sm:$0xff] %v5918_v57  ;;  %v7953_v37 = vld [vmem:[#allocation42_spill] sm:$0xff]  ;;  %v7987_v57 = vld [vmem:[#allocation165_spill] sm:$0xff] }
 0x2af   : > { %7914 = vst [vmem:[#allocation122_spill] sm:$0xff] %v5922_v40  ;;  %v1175_v46 = vadd.f32 %v7954_v41, %v7953_v37  ;;  %v7960_v52 = vld [vmem:[#allocation174_spill] sm:$0xff]  ;;  %v1601_v37 = vadd.f32 %v5982_v16, %v5734_v3  ;;  %v7963_v41 = vld [vmem:[#allocation45_spill] sm:$0xff] }
 0x2b0   : > { %7916 = vst [vmem:[#allocation208_spill] sm:$0xff] %v5926_v58  ;;  %v7967_v3 = vld [vmem:[#allocation25_spill] sm:$0xff]  ;;  %v7984_v58 = vld [vmem:[#allocation8_spill] sm:$0xff] }
 0x2b1   : > { %7918 = vst [vmem:[#allocation63_spill] sm:$0xff] %v5930_v34 }
 0x2b2   : > { %7920 = vst [vmem:[#allocation209_spill] sm:$0xff] %v5936_v33 }
 0x2b3   : > { %7922 = vst [vmem:[#allocation123_spill] sm:$0xff] %v5940_v18  ;;  %v7978_v18 = vld [vmem:[#allocation116_spill] sm:$0xff] }
 0x2b4   : > { %7924 = vst [vmem:[#allocation210_spill] sm:$0xff] %v5944_v60 }
 0x2b5   : > { %7926 = vst [vmem:[#allocation64_spill] sm:$0xff] %v5948_v24 }
 0x2b6   : > { %7928 = vst [vmem:[#allocation211_spill] sm:$0xff] %v5952_v32 }
 0x2b7   : > { %7930 = vst [vmem:[#allocation124_spill] sm:$0xff] %v5956_v56  ;;  %v7972_v56 = vld [vmem:[#allocation32_spill] sm:$0xff] }
 0x2b8   : > { %7932 = vst [vmem:[#allocation212_spill] sm:$0xff] %v5960_v7 }
 0x2b9   : > { %7934 = vst [vmem:[#allocation65_spill] sm:$0xff] %v5964_v59  ;;  %v7969_v59 = vld [vmem:[#allocation52_spill] sm:$0xff] }
 0x2ba   : > { %7936 = vst [vmem:[#allocation213_spill] sm:$0xff] %v5968_v27 }
 0x2bb   : > { %7938 = vst [vmem:[#allocation125_spill] sm:$0xff] %v5972_v0  ;;  %v7961_v0 = vld [vmem:[#allocation181_spill] sm:$0xff] }
 0x2bc   : > { %7940 = vst [vmem:[#allocation214_spill] sm:$0xff] %v5976_v17  ;;  %v1597_v17 = vadd.f32 %v5982_v16, %v5718_v45  ;;  %v7959_v45 = vld [vmem:[#allocation51_spill] sm:$0xff]  ;;  %v1428_v27 = vadd.f32 %v7962_v14, %v7961_v0  ;;  %v7968_v14 = vld [vmem:[#allocation46_spill] sm:$0xff] }
 0x2bd   : > { %7942 = vst [vmem:[#allocation67_spill] sm:$0xff] %v5980_v26  ;;  %v1426_v26 = vadd.f32 %v7952_v48, %v7951_v36  ;;  %v1600_v36 = vadd.f32 %v5982_v16, %v5730_v50  ;;  %v7958_v48 = vld [vmem:[#allocation44_spill] sm:$0xff]  ;;  %v1178_v7 = vadd.f32 %v7969_v59, %v7968_v14  ;;  %v7975_v59 = vld [vmem:[#allocation177_spill] sm:$0xff] }
 0x2be   : > { %7944 = vst [vmem:[#allocation215_spill] sm:$0xff] %v5986_v53  ;;  %v1304_v53 = vmul.f32 %v7960_v52, %v5435_v9  ;;  %v6030_v50 = vld [vmem:[%s6839_s1 + $0x1c0] sm:$0xff]  ;;  %v1602_v52 = vadd.f32 %v5982_v16, %v5738_v1  ;;  %v6057_v1 = vld [vmem:[%s6839_s1 + $0x1d0] sm:$0xff]  ;;  %v1307_v14 = vmul.f32 %v7975_v59, %v5498_v51 }
 0x2bf   : > { %7946 = vst [vmem:[#allocation82_spill] sm:$0xff] %v5990_v44  ;;  %v1176_v44 = vadd.f32 %v7959_v45, %v7958_v48  ;;  %v7966_v48 = vld [vmem:[#allocation81_spill] sm:$0xff]  ;;  %v1308_v33 = vmul.f32 %v6030_v50, %v7978_v18  ;;  %v7981_v59 = vld [vmem:[#allocation164_spill] sm:$0xff]  ;;  %v1310_v40 = vmul.f32 %v6057_v1, %v7984_v58 }
 0x2c0   : > { %7948 = vst [vmem:[#allocation216_spill] sm:$0xff] %v5994_v8  ;;  %v1303_v8 = vmul.f32 %v7955_v54, %v5432_v10  ;;  %v7964_v54 = vld [vmem:[#allocation30_spill] sm:$0xff]  ;;  %v1429_v45 = vadd.f32 %v7967_v3, %v7966_v48  ;;  %v1603_v48 = vadd.f32 %v5982_v16, %v1426_v26  ;;  %v7974_v3 = vld [vmem:[#allocation31_spill] sm:$0xff]  ;;  %v7976_v26 = vld [vmem:[#allocation56_spill] sm:$0xff] }
 0x2c1   : > { %7950 = vst [vmem:[#allocation126_spill] sm:$0xff] %v5998_v63  ;;  %v1427_v63 = vadd.f32 %v7957_v19, %v7956_v49  ;;  %v1177_v49 = vadd.f32 %v7964_v54, %v7963_v41  ;;  %v7965_v19 = vld [vmem:[#allocation175_spill] sm:$0xff]  ;;  %v7970_v41 = vld [vmem:[#allocation176_spill] sm:$0xff] }
 0x2c2   : > { %1725 = vst [vmem:[%s6024_s12] sm:$0xff] %v1597_v17  ;;  %v1305_v0 = vmul.f32 %v7965_v19, %v5438_v11  ;;  %v6044_v17 = vld [vmem:[%s6839_s1 + $0x1c8] sm:$0xff]  ;;  %v1306_v54 = vmul.f32 %v7970_v41, %v5453_v62  ;;  %v7971_v19 = vld [vmem:[#allocation15_spill] sm:$0xff]  ;;  %v1431_v60 = vadd.f32 %v1303_v8, %v1175_v46  ;;  %v456_v8 = vld [vmem:[%s6839_s1 + $0x1e0] sm:$0xff] }
 0x2c3   : > { %1726 = vst [vmem:[%s6024_s12 + $0x8] sm:$0xff] %v1598_v25  ;;  %v1430_v32 = vadd.f32 %v7972_v56, %v7971_v19  ;;  %v7973_v25 = vld [vmem:[#allocation47_spill] sm:$0xff]  ;;  %v1604_v41 = vadd.f32 %v5982_v16, %v1427_v63  ;;  %v7979_v63 = vld [vmem:[#allocation57_spill] sm:$0xff]  ;;  %v7980_v46 = vld [vmem:[#allocation36_spill] sm:$0xff]  ;;  %v1309_v34 = vmul.f32 %v6044_v17, %v7981_v59 }
 0x2c4   : > { %1727 = vst [vmem:[%s6024_s12 + $0x10] sm:$0xff] %v1599_v61  ;;  %v1179_v24 = vadd.f32 %v7974_v3, %v7973_v25  ;;  %v455_v56 = vld [vmem:[%s6839_s1 + $0x1d8] sm:$0xff]  ;;  %v7977_v61 = vld [vmem:[#allocation53_spill] sm:$0xff]  ;;  %v1432_v25 = vadd.f32 %v1304_v53, %v1176_v44  ;;  %v1605_v3 = vadd.f32 %v5982_v16, %v1428_v27  ;;  %v7982_v53 = vld [vmem:[#allocation58_spill] sm:$0xff] }
 0x2c5   : > { %1728 = vst [vmem:[%s6024_s12 + $0x18] sm:$0xff] %v1600_v36  ;;  %v1180_v19 = vadd.f32 %v7977_v61, %v7976_v26  ;;  %v1181_v36 = vadd.f32 %v7980_v46, %v7979_v63  ;;  %v1433_v26 = vadd.f32 %v1305_v0, %v1177_v49  ;;  %v1606_v61 = vadd.f32 %v5982_v16, %v1429_v45  ;;  %v457_v27 = vld [vmem:[%s6839_s1 + $0x1e8] sm:$0xff]  ;;  %v7983_v44 = vld [vmem:[#allocation54_spill] sm:$0xff]  ;;  %v7985_v0 = vld [vmem:[#allocation59_spill] sm:$0xff] }
 0x2c6   : > { %1729 = vst [vmem:[%s6024_s12 + $0x20] sm:$0xff] %v1601_v37  ;;  %v1182_v37 = vadd.f32 %v7983_v44, %v7982_v53  ;;  %v1434_v63 = vadd.f32 %v1306_v54, %v1178_v7  ;;  %v1607_v46 = vadd.f32 %v5982_v16, %v1430_v32  ;;  %v458_v49 = vld [vmem:[%s6839_s1 + $0x1f0] sm:$0xff]  ;;  %v7986_v45 = vld [vmem:[#allocation37_spill] sm:$0xff]  ;;  %v1311_v15 = vmul.f32 %v455_v56, %v7987_v57  ;;  %v459_v7 = vld [vmem:[%s6839_s1 + $0x1f8] sm:$0xff] }
 0x2c7   : > { %1730 = vst [vmem:[%s6024_s12 + $0x28] sm:$0xff] %v1602_v52  ;;  %v1183_v52 = vadd.f32 %v7986_v45, %v7985_v0  ;;  %v1435_v13 = vadd.f32 %v1307_v14, %v1179_v24  ;;  %v1608_v53 = vadd.f32 %v5982_v16, %v1431_v60  ;;  %v7988_v32 = vld [vmem:[#allocation179_spill] sm:$0xff]  ;;  %v7990_v44 = vld [vmem:[#allocation9_spill] sm:$0xff]  ;;  %v1436_v2 = vadd.f32 %v1308_v33, %v1180_v19  ;;  %v6108_v45 = vpop.permute.xlu0 %1570  ;;  %v7991_v24 = vld [vmem:[#allocation180_spill] sm:$0xff] }
 0x2c8   : > { %1731 = vst [vmem:[%s6024_s12 + $0x30] sm:$0xff] %v1603_v48  ;;  %v7989_v54 = vld [vmem:[#allocation55_spill] sm:$0xff]  ;;  %v1312_v31 = vmul.f32 %v456_v8, %v7990_v44  ;;  %v1609_v0 = vadd.f32 %v5982_v16, %v1432_v25  ;;  %v7992_v60 = vld [vmem:[#allocation38_spill] sm:$0xff]  ;;  %v1437_v6 = vadd.f32 %v1309_v34, %v1181_v36  ;;  %v1610_v22 = vadd.f32 %v5982_v16, %v1433_v26  ;;  %v7996_v33 = vld [vmem:[#allocation12_spill] sm:$0xff] }
 0x2c9   : > { %1732 = vst [vmem:[%s6024_s12 + $0x38] sm:$0xff] %v1604_v41  ;;  %v1184_v48 = vadd.f32 %v7989_v54, %v7988_v32  ;;  %v1185_v14 = vadd.f32 %v7992_v60, %v7991_v24  ;;  %v7993_v41 = vld [vmem:[#allocation168_spill] sm:$0xff]  ;;  %v7994_v32 = vld [vmem:[#allocation13_spill] sm:$0xff]  ;;  %v1314_v19 = vmul.f32 %v458_v49, %v7996_v33  ;;  %v1438_v25 = vadd.f32 %v1310_v40, %v1182_v37 }
 0x2ca   : > { %1733 = vst [vmem:[%s6024_s12 + $0x40] sm:$0xff] %v1605_v3  ;;  %v1313_v5 = vmul.f32 %v457_v27, %v7993_v41  ;;  %v7995_v54 = vld [vmem:[#allocation93_spill] sm:$0xff]  ;;  %v1611_v3 = vadd.f32 %v5982_v16, %v1434_v63  ;;  %v1187_v24 = vadd.f32 %v7998_v30, %v7997_v55  ;;  %v1439_v34 = vadd.f32 %v1311_v15, %v1183_v52  ;;  %v8004_v52 = vld [vmem:[#allocation146_spill] sm:$0xff] }
 0x2cb   : > { %1734 = vst [vmem:[%s6024_s12 + $0x48] sm:$0xff] %v1606_v61  ;;  %v1186_v38 = vadd.f32 %v7995_v54, %v7994_v32  ;;  %v7999_v60 = vld [vmem:[#allocation169_spill] sm:$0xff]  ;;  %v1612_v36 = vadd.f32 %v5982_v16, %v1435_v13  ;;  %v8001_v61 = vld [vmem:[#allocation94_spill] sm:$0xff]  ;;  %v1316_v40 = vmul.f32 %v6030_v50, %v5277_v39  ;;  %v1440_v37 = vadd.f32 %v1312_v31, %v1184_v48  ;;  %v8006_v48 = vld [vmem:[#allocation28_spill] sm:$0xff] }
 0x2cc   : > { %1735 = vst [vmem:[%s6024_s12 + $0x50] sm:$0xff] %v1607_v46  ;;  %v1315_v47 = vmul.f32 %v459_v7, %v7999_v60  ;;  %v8000_v26 = vld [vmem:[#allocation89_spill] sm:$0xff]  ;;  %v1613_v63 = vadd.f32 %v6108_v45, %v1436_v2  ;;  %v8002_v46 = vld [vmem:[#allocation14_spill] sm:$0xff]  ;;  %v1317_v15 = vmul.f32 %v6044_v17, %v5298_v42  ;;  %v1441_v13 = vadd.f32 %v1313_v5, %v1185_v14  ;;  %v8009_v14 = vld [vmem:[#allocation96_spill] sm:$0xff] }
 0x2cd   : > { %1736 = vst [vmem:[%s6024_s12 + $0x58] sm:$0xff] %v1608_v53  ;;  %v1188_v32 = vadd.f32 %v8001_v61, %v8000_v26  ;;  %v8003_v30 = vld [vmem:[#allocation5_spill] sm:$0xff]  ;;  %v1614_v16 = vadd.f32 %v6108_v45, %v1437_v6  ;;  %v8005_v53 = vld [vmem:[#allocation95_spill] sm:$0xff]  ;;  %v1318_v31 = vmul.f32 %v6057_v1, %v5301_v35  ;;  %v1442_v2 = vadd.f32 %v1314_v19, %v1186_v38 }
 0x2ce   : > { %1737 = vst [vmem:[%s6024_s12 + $0x60] sm:$0xff] %v1609_v0  ;;  %v1189_v55 = vadd.f32 %v8003_v30, %v8002_v46  ;;  %v1190_v54 = vadd.f32 %v8005_v53, %v8004_v52  ;;  %v1615_v50 = vadd.f32 %v6108_v45, %v1438_v25  ;;  %v8007_v0 = vld [vmem:[#allocation6_spill] sm:$0xff]  ;;  %v1319_v5 = vmul.f32 %v455_v56, %v5432_v10  ;;  %v6156_v25 = vld [vmem:[%s6839_s1 + $0x2c0] sm:$0xff] }
 0x2cf   : > { %1738 = vst [vmem:[%s6024_s12 + $0x68] sm:$0xff] %v1610_v22  ;;  %v1191_v26 = vadd.f32 %v8007_v0, %v8006_v48  ;;  %v1443_v17 = vadd.f32 %v1315_v47, %v1187_v24  ;;  %v1616_v6 = vadd.f32 %v6108_v45, %v1439_v34  ;;  %v8008_v22 = vld [vmem:[#allocation74_spill] sm:$0xff]  ;;  %v1320_v1 = vmul.f32 %v456_v8, %v5435_v9  ;;  %v8011_v47 = vld [vmem:[#allocation7_spill] sm:$0xff]  ;;  %v6166_v8 = vld [vmem:[%s6839_s1 + $0x2c8] sm:$0xff] }
 0x2d0   : > { %1739 = vst [vmem:[%s6024_s12 + $0x70] sm:$0xff] %v1611_v3  ;;  %v1192_v61 = vadd.f32 %v8009_v14, %v8008_v22  ;;  %v1444_v38 = vadd.f32 %v1316_v40, %v1188_v32  ;;  %v1617_v19 = vadd.f32 %v6108_v45, %v1440_v37  ;;  %v8010_v56 = vld [vmem:[#allocation134_spill] sm:$0xff]  ;;  %v1321_v24 = vmul.f32 %v457_v27, %v5438_v11  ;;  %v8012_v32 = vld [vmem:[#allocation75_spill] sm:$0xff]  ;;  %v8013_v40 = vld [vmem:[#allocation97_spill] sm:$0xff] }
 0x2d1   : > { %1740 = vst [vmem:[%s6024_s12 + $0x78] sm:$0xff] %v1612_v36  ;;  %v1193_v3 = vadd.f32 %v8011_v47, %v8010_v56  ;;  %v1445_v34 = vadd.f32 %v1317_v15, %v1189_v55  ;;  %v1618_v36 = vadd.f32 %v6108_v45, %v1441_v13  ;;  %v1194_v37 = vadd.f32 %v8013_v40, %v8012_v32  ;;  %v6176_v27 = vld [vmem:[%s6839_s1 + $0x2d0] sm:$0xff]  ;;  %v8014_v55 = vld [vmem:[#allocation135_spill] sm:$0xff] }
 0x2d2   : > { %1741 = vst [vmem:[%s6024_s12 + $0x80] sm:$0xff] %v1613_v63  ;;  %v1322_v63 = vmul.f32 %v458_v49, %v5453_v62  ;;  %v1446_v46 = vadd.f32 %v1318_v31, %v1190_v54  ;;  %v1619_v30 = vadd.f32 %v6108_v45, %v1442_v2  ;;  %v8015_v15 = vld [vmem:[#allocation99_spill] sm:$0xff]  ;;  %v1447_v52 = vadd.f32 %v1319_v5, %v1191_v26  ;;  %v8016_v54 = vld [vmem:[#allocation76_spill] sm:$0xff] }
 0x2d3   : > { %1742 = vst [vmem:[%s6024_s12 + $0x88] sm:$0xff] %v1614_v16  ;;  %v1195_v13 = vadd.f32 %v8015_v15, %v8014_v55  ;;  %v1323_v16 = vmul.f32 %v459_v7, %v5498_v51  ;;  %v1620_v53 = vadd.f32 %v6108_v45, %v1443_v17  ;;  %v487_v49 = vld [vmem:[%s6839_s1 + $0x2d8] sm:$0xff]  ;;  %v1448_v48 = vadd.f32 %v1320_v1, %v1192_v61  ;;  %v488_v7 = vld [vmem:[%s6839_s1 + $0x2e0] sm:$0xff]  ;;  %v489_v61 = vld [vmem:[%s6839_s1 + $0x2e8] sm:$0xff] }
 0x2d4   : > { %1743 = vst [vmem:[%s6024_s12 + $0x90] sm:$0xff] %v1615_v50  ;;  %v8017_v31 = vld [vmem:[#allocation103_spill] sm:$0xff]  ;;  %v1324_v50 = vmul.f32 %v6156_v25, %v7978_v18  ;;  %v1621_v0 = vadd.f32 %v6108_v45, %v1444_v38  ;;  %v8018_v26 = vld [vmem:[#allocation136_spill] sm:$0xff]  ;;  %v1449_v22 = vadd.f32 %v1321_v24, %v1193_v3  ;;  %v1622_v14 = vadd.f32 %v6108_v45, %v1445_v34  ;;  %v8020_v1 = vld [vmem:[#allocation77_spill] sm:$0xff] }
 0x2d5   : > { %1744 = vst [vmem:[%s6024_s12 + $0x98] sm:$0xff] %v1616_v6  ;;  %v1196_v2 = vadd.f32 %v8017_v31, %v8016_v54  ;;  %v8019_v5 = vld [vmem:[#allocation100_spill] sm:$0xff]  ;;  %v1325_v6 = vmul.f32 %v6166_v8, %v7981_v59  ;;  %v1326_v56 = vmul.f32 %v6176_v27, %v7984_v58  ;;  %v1450_v47 = vadd.f32 %v1322_v63, %v1194_v37  ;;  %v490_v3 = vld [vmem:[%s6839_s1 + $0x2f0] sm:$0xff]  ;;  %v8022_v24 = vld [vmem:[#allocation137_spill] sm:$0xff] }
 0x2d6   : > { %1745 = vst [vmem:[%s6024_s12 + $0xa0] sm:$0xff] %v1617_v19  ;;  %v1197_v17 = vadd.f32 %v8019_v5, %v8018_v26  ;;  %v8021_v38 = vld [vmem:[#allocation104_spill] sm:$0xff]  ;;  %v1623_v32 = vadd.f32 %v6108_v45, %v1446_v46  ;;  %v8023_v34 = vld [vmem:[#allocation101_spill] sm:$0xff]  ;;  %v1327_v40 = vmul.f32 %v487_v49, %v7987_v57  ;;  %v1451_v55 = vadd.f32 %v1323_v16, %v1195_v13  ;;  %v491_v37 = vld [vmem:[%s6839_s1 + $0x2f8] sm:$0xff]  ;;  %v6226_v5 = vpop.permute.xlu1 %1574 }
 0x2d7   : > { %1746 = vst [vmem:[%s6024_s12 + $0xa8] sm:$0xff] %v1618_v36  ;;  %v1198_v19 = vadd.f32 %v8021_v38, %v8020_v1  ;;  %v1199_v36 = vadd.f32 %v8023_v34, %v8022_v24  ;;  %v1624_v15 = vadd.f32 %v6108_v45, %v1447_v52  ;;  %v8024_v63 = vld [vmem:[#allocation78_spill] sm:$0xff]  ;;  %v8025_v46 = vld [vmem:[#allocation105_spill] sm:$0xff]  ;;  %v1328_v54 = vmul.f32 %v488_v7, %v7990_v44  ;;  %v8028_v24 = vld [vmem:[#allocation79_spill] sm:$0xff] }
 0x2d8   : > { %1747 = vst [vmem:[%s6024_s12 + $0xb0] sm:$0xff] %v1619_v30  ;;  %v1200_v30 = vadd.f32 %v8025_v46, %v8024_v63  ;;  %v1452_v31 = vadd.f32 %v1324_v50, %v1196_v2  ;;  %v1625_v26 = vadd.f32 %v6108_v45, %v1448_v48  ;;  %v8026_v13 = vld [vmem:[#allocation138_spill] sm:$0xff]  ;;  %v1453_v1 = vadd.f32 %v1325_v6, %v1197_v17  ;;  %v8029_v34 = vld [vmem:[#allocation111_spill] sm:$0xff] }
 0x2d9   : > { %1748 = vst [vmem:[%s6024_s12 + $0xb8] sm:$0xff] %v1620_v53  ;;  %v8027_v16 = vld [vmem:[#allocation102_spill] sm:$0xff]  ;;  %v1329_v53 = vmul.f32 %v489_v61, %v7993_v41  ;;  %v1626_v38 = vadd.f32 %v6108_v45, %v1449_v22  ;;  %v1202_v63 = vadd.f32 %v8029_v34, %v8028_v24  ;;  %v1330_v2 = vmul.f32 %v490_v3, %v7996_v33  ;;  %v8031_v46 = vld [vmem:[#allocation107_spill] sm:$0xff]  ;;  %v8032_v22 = vld [vmem:[#allocation80_spill] sm:$0xff] }
 0x2da   : > { %1749 = vst [vmem:[%s6024_s12 + $0xc0] sm:$0xff] %v1621_v0  ;;  %v1201_v52 = vadd.f32 %v8027_v16, %v8026_v13  ;;  %v1454_v50 = vadd.f32 %v1326_v56, %v1198_v19  ;;  %v1627_v48 = vadd.f32 %v6108_v45, %v1450_v47  ;;  %v8030_v0 = vld [vmem:[#allocation139_spill] sm:$0xff]  ;;  %v1331_v16 = vmul.f32 %v491_v37, %v7999_v60  ;;  %v8035_v34 = vld [vmem:[#allocation108_spill] sm:$0xff] }
 0x2db   : > { %1750 = vst [vmem:[%s6024_s12 + $0xc8] sm:$0xff] %v1622_v14  ;;  %v1203_v13 = vadd.f32 %v8031_v46, %v8030_v0  ;;  %v1455_v17 = vadd.f32 %v1327_v40, %v1199_v36  ;;  %v1628_v6 = vadd.f32 %v6108_v45, %v1451_v55  ;;  %v8033_v14 = vld [vmem:[#allocation112_spill] sm:$0xff]  ;;  %v1332_v19 = vmul.f32 %v6156_v25, %v5277_v39  ;;  %v8036_v55 = vld [vmem:[#allocation83_spill] sm:$0xff] }
 0x2dc   : > { %1751 = vst [vmem:[%s6024_s12 + $0xd0] sm:$0xff] %v1623_v32  ;;  %v1204_v24 = vadd.f32 %v8033_v14, %v8032_v22  ;;  %v1456_v56 = vadd.f32 %v1328_v54, %v1200_v30  ;;  %v1629_v47 = vadd.f32 %v6226_v5, %v1452_v31  ;;  %v8034_v32 = vld [vmem:[#allocation140_spill] sm:$0xff]  ;;  %v1333_v36 = vmul.f32 %v6166_v8, %v5298_v42  ;;  %v8038_v31 = vld [vmem:[#allocation141_spill] sm:$0xff] }
 0x2dd   : > { %1752 = vst [vmem:[%s6024_s12 + $0xd8] sm:$0xff] %v1624_v15  ;;  %v1205_v0 = vadd.f32 %v8035_v34, %v8034_v32  ;;  %v1457_v45 = vadd.f32 %v1329_v53, %v1201_v52  ;;  %v1630_v40 = vadd.f32 %v6226_v5, %v1453_v1  ;;  %v8037_v15 = vld [vmem:[#allocation98_spill] sm:$0xff]  ;;  %v1334_v25 = vmul.f32 %v6176_v27, %v5301_v35  ;;  %v8040_v1 = vld [vmem:[#allocation84_spill] sm:$0xff] }
 0x2de   : > { %1753 = vst [vmem:[%s6024_s12 + $0xe0] sm:$0xff] %v1625_v26  ;;  %v1206_v46 = vadd.f32 %v8037_v15, %v8036_v55  ;;  %v1458_v30 = vadd.f32 %v1330_v2, %v1202_v63  ;;  %v1631_v54 = vadd.f32 %v6226_v5, %v1454_v50  ;;  %v8039_v26 = vld [vmem:[#allocation109_spill] sm:$0xff]  ;;  %v1335_v8 = vmul.f32 %v487_v49, %v5432_v10  ;;  %v6274_v50 = vld [vmem:[%s6839_s1 + $0x3c0] sm:$0xff]  ;;  %v8042_v49 = vld [vmem:[#allocation142_spill] sm:$0xff] }
 0x2df   : > { %1754 = vst [vmem:[%s6024_s12 + $0xe8] sm:$0xff] %v1626_v38  ;;  %v1207_v22 = vadd.f32 %v8039_v26, %v8038_v31  ;;  %v1459_v52 = vadd.f32 %v1331_v16, %v1203_v13  ;;  %v1632_v53 = vadd.f32 %v6226_v5, %v1455_v17  ;;  %v8041_v38 = vld [vmem:[#allocation106_spill] sm:$0xff]  ;;  %v1336_v27 = vmul.f32 %v488_v7, %v5435_v9  ;;  %v6284_v7 = vld [vmem:[%s6839_s1 + $0x3c8] sm:$0xff] }
 0x2e0   : > { %1755 = vst [vmem:[%s6024_s12 + $0xf0] sm:$0xff] %v1627_v48  ;;  %v1208_v14 = vadd.f32 %v8041_v38, %v8040_v1  ;;  %v1460_v63 = vadd.f32 %v1332_v19, %v1204_v24  ;;  %v1633_v2 = vadd.f32 %v6226_v5, %v1456_v56  ;;  %v8043_v48 = vld [vmem:[#allocation110_spill] sm:$0xff]  ;;  %v1337_v16 = vmul.f32 %v489_v61, %v5438_v11  ;;  %v8044_v24 = vld [vmem:[#allocation85_spill] sm:$0xff] }
 0x2e1   : > { %1756 = vst [vmem:[%s6024_s12 + $0xf8] sm:$0xff] %v1628_v6  ;;  %v1209_v13 = vadd.f32 %v8043_v48, %v8042_v49  ;;  %v1461_v17 = vadd.f32 %v1333_v36, %v1205_v0  ;;  %v1634_v6 = vadd.f32 %v6226_v5, %v1457_v45  ;;  %v8045_v19 = vld [vmem:[#allocation113_spill] sm:$0xff]  ;;  %v1462_v32 = vadd.f32 %v1334_v25, %v1206_v46  ;;  %v6294_v61 = vld [vmem:[%s6839_s1 + $0x3d0] sm:$0xff]  ;;  %v8046_v0 = vld [vmem:[#allocation143_spill] sm:$0xff] }
 0x2e2   : > { %1757 = vst [vmem:[%s6024_s12 + $0x100] sm:$0xff] %v1629_v47  ;;  %v1210_v56 = vadd.f32 %v8045_v19, %v8044_v24  ;;  %v1338_v47 = vmul.f32 %v490_v3, %v5453_v62  ;;  %v1635_v34 = vadd.f32 %v6226_v5, %v1458_v30  ;;  %v8047_v36 = vld [vmem:[#allocation159_spill] sm:$0xff]  ;;  %v1463_v55 = vadd.f32 %v1335_v8, %v1207_v22  ;;  %v8049_v25 = vld [vmem:[#allocation114_spill] sm:$0xff]  ;;  %v8050_v22 = vld [vmem:[#allocation144_spill] sm:$0xff] }
 0x2e3   : > { %1758 = vst [vmem:[%s6024_s12 + $0x108] sm:$0xff] %v1630_v40  ;;  %v1211_v45 = vadd.f32 %v8047_v36, %v8046_v0  ;;  %v1339_v40 = vmul.f32 %v491_v37, %v5498_v51  ;;  %v1636_v15 = vadd.f32 %v6226_v5, %v1459_v52  ;;  %v519_v3 = vld [vmem:[%s6839_s1 + $0x3d8] sm:$0xff]  ;;  %v1464_v31 = vadd.f32 %v1336_v27, %v1208_v14  ;;  %v520_v37 = vld [vmem:[%s6839_s1 + $0x3e0] sm:$0xff] }
 0x2e4   : > { %1759 = vst [vmem:[%s6024_s12 + $0x110] sm:$0xff] %v1631_v54  ;;  %v8048_v46 = vld [vmem:[#allocation87_spill] sm:$0xff]  ;;  %v1340_v54 = vmul.f32 %v6274_v50, %v7978_v18  ;;  %v1637_v26 = vadd.f32 %v6226_v5, %v1460_v63  ;;  %v8051_v8 = vld [vmem:[#allocation160_spill] sm:$0xff]  ;;  %v1465_v1 = vadd.f32 %v1337_v16, %v1209_v13  ;;  %v1638_v38 = vadd.f32 %v6226_v5, %v1461_v17  ;;  %v521_v18 = vld [vmem:[%s6839_s1 + $0x3e8] sm:$0xff] }
 0x2e5   : > { %1760 = vst [vmem:[%s6024_s12 + $0x118] sm:$0xff] %v1632_v53  ;;  %v1212_v30 = vadd.f32 %v8049_v25, %v8048_v46  ;;  %v1213_v52 = vadd.f32 %v8051_v8, %v8050_v22  ;;  %v1341_v53 = vmul.f32 %v6284_v7, %v7981_v59  ;;  %v8052_v14 = vld [vmem:[#allocation88_spill] sm:$0xff]  ;;  %v8053_v27 = vld [vmem:[#allocation115_spill] sm:$0xff]  ;;  %v1466_v49 = vadd.f32 %v1338_v47, %v1210_v56  ;;  %v522_v59 = vld [vmem:[%s6839_s1 + $0x3f0] sm:$0xff] }
 0x2e6   : > { %1761 = vst [vmem:[%s6024_s12 + $0x120] sm:$0xff] %v1633_v2  ;;  %v1214_v63 = vadd.f32 %v8053_v27, %v8052_v14  ;;  %v1342_v2 = vmul.f32 %v6294_v61, %v7984_v58  ;;  %v1639_v48 = vadd.f32 %v6226_v5, %v1462_v32  ;;  %v8054_v13 = vld [vmem:[#allocation86_spill] sm:$0xff]  ;;  %v8055_v16 = vld [vmem:[#allocation161_spill] sm:$0xff]  ;;  %v1467_v24 = vadd.f32 %v1339_v40, %v1211_v45  ;;  %v523_v58 = vld [vmem:[%s6839_s1 + $0x3f8] sm:$0xff] }
 0x2e7   : > { %1762 = vst [vmem:[%s6024_s12 + $0x128] sm:$0xff] %v1634_v6  ;;  %v1215_v17 = vadd.f32 %v8055_v16, %v8054_v13  ;;  %v1343_v6 = vmul.f32 %v519_v3, %v7987_v57  ;;  %v1640_v19 = vadd.f32 %v6226_v5, %v1463_v55  ;;  %v8056_v56 = vld [vmem:[#allocation16_spill] sm:$0xff]  ;;  %v8057_v47 = vld [vmem:[#allocation162_spill] sm:$0xff]  ;;  %v1468_v0 = vadd.f32 %v1340_v54, %v1212_v30  ;;  %v6344_v57 = vpop.permute.xlu1 %1578  ;;  %v8059_v40 = vld [vmem:[#allocation117_spill] sm:$0xff] }
 0x2e8   : > { %1763 = vst [vmem:[%s6024_s12 + $0x130] sm:$0xff] %v1635_v34  ;;  %v1216_v32 = vadd.f32 %v8057_v47, %v8056_v56  ;;  %v1344_v34 = vmul.f32 %v520_v37, %v7990_v44  ;;  %v1641_v36 = vadd.f32 %v6226_v5, %v1464_v31  ;;  %v8058_v45 = vld [vmem:[#allocation90_spill] sm:$0xff]  ;;  %v1469_v46 = vadd.f32 %v1341_v53, %v1213_v52  ;;  %v8060_v22 = vld [vmem:[#allocation17_spill] sm:$0xff]  ;;  %v8061_v8 = vld [vmem:[#allocation163_spill] sm:$0xff] }
 0x2e9   : > { %1764 = vst [vmem:[%s6024_s12 + $0x138] sm:$0xff] %v1636_v15  ;;  %v1217_v55 = vadd.f32 %v8059_v40, %v8058_v45  ;;  %v1345_v15 = vmul.f32 %v521_v18, %v7993_v41  ;;  %v1642_v25 = vadd.f32 %v6226_v5, %v1465_v1  ;;  %v1218_v44 = vadd.f32 %v8061_v8, %v8060_v22  ;;  %v8063_v14 = vld [vmem:[#allocation118_spill] sm:$0xff]  ;;  %v8070_v47 = vld [vmem:[#allocation48_spill] sm:$0xff]  ;;  %v8076_v8 = vld [vmem:[#allocation21_spill] sm:$0xff] }
 0x2ea   : > { %1765 = vst [vmem:[%s6024_s12 + $0x140] sm:$0xff] %v1637_v26  ;;  %v1346_v30 = vmul.f32 %v522_v59, %v7996_v33  ;;  %v1470_v54 = vadd.f32 %v1342_v2, %v1214_v63  ;;  %v1643_v31 = vadd.f32 %v6226_v5, %v1466_v49  ;;  %v8062_v26 = vld [vmem:[#allocation91_spill] sm:$0xff]  ;;  %v1347_v41 = vmul.f32 %v523_v58, %v7999_v60  ;;  %v8064_v1 = vld [vmem:[#allocation18_spill] sm:$0xff]  ;;  %v8066_v49 = vld [vmem:[#allocation92_spill] sm:$0xff] }
 0x2eb   : > { %1766 = vst [vmem:[%s6024_s12 + $0x148] sm:$0xff] %v1638_v38  ;;  %v1219_v27 = vadd.f32 %v8063_v14, %v8062_v26  ;;  %v1471_v52 = vadd.f32 %v1343_v6, %v1215_v17  ;;  %v1644_v53 = vadd.f32 %v6226_v5, %v1467_v24  ;;  %v8065_v38 = vld [vmem:[#allocation166_spill] sm:$0xff]  ;;  %v1348_v33 = vmul.f32 %v6274_v50, %v5277_v39  ;;  %v8068_v6 = vld [vmem:[#allocation19_spill] sm:$0xff]  ;;  %v8079_v26 = vld [vmem:[#allocation172_spill] sm:$0xff] }
 0x2ec   : > { %1767 = vst [vmem:[%s6024_s12 + $0x150] sm:$0xff] %v1639_v48  ;;  %v1220_v13 = vadd.f32 %v8065_v38, %v8064_v1  ;;  %v1472_v63 = vadd.f32 %v1344_v34, %v1216_v32  ;;  %v1645_v2 = vadd.f32 %v6344_v57, %v1468_v0  ;;  %v8067_v48 = vld [vmem:[#allocation10_spill] sm:$0xff]  ;;  %v1349_v60 = vmul.f32 %v6284_v7, %v5298_v42  ;;  %v8069_v24 = vld [vmem:[#allocation167_spill] sm:$0xff] }
 0x2ed   : > { %1768 = vst [vmem:[%s6024_s12 + $0x158] sm:$0xff] %v1640_v19  ;;  %v1221_v16 = vadd.f32 %v8067_v48, %v8066_v49  ;;  %v1473_v5 = vadd.f32 %v1345_v15, %v1217_v55  ;;  %v1646_v17 = vadd.f32 %v6344_v57, %v1469_v46  ;;  %v1222_v19 = vadd.f32 %v8069_v24, %v8068_v6  ;;  %v8071_v32 = vld [vmem:[#allocation11_spill] sm:$0xff]  ;;  %v8073_v45 = vld [vmem:[#allocation26_spill] sm:$0xff]  ;;  %v8074_v15 = vld [vmem:[#allocation49_spill] sm:$0xff] }
 0x2ee   : > { %1769 = vst [vmem:[%s6024_s12 + $0x160] sm:$0xff] %v1641_v36  ;;  %v1350_v39 = vmul.f32 %v6294_v61, %v5301_v35  ;;  %v1474_v50 = vadd.f32 %v1346_v30, %v1218_v44  ;;  %v1647_v56 = vadd.f32 %v6344_v57, %v1470_v54  ;;  %v1223_v34 = vadd.f32 %v8071_v32, %v8070_v47  ;;  %v8072_v36 = vld [vmem:[#allocation20_spill] sm:$0xff]  ;;  %v8075_v46 = vld [vmem:[#allocation170_spill] sm:$0xff]  ;;  %v8077_v44 = vld [vmem:[#allocation171_spill] sm:$0xff] }
 0x2ef   : > { %1770 = vst [vmem:[%s6024_s12 + $0x168] sm:$0xff] %v1642_v25  ;;  %v1351_v42 = vmul.f32 %v519_v3, %v5432_v10  ;;  %v1475_v7 = vadd.f32 %v1347_v41, %v1219_v27  ;;  %v1648_v0 = vadd.f32 %v6344_v57, %v1471_v52  ;;  %v1224_v40 = vadd.f32 %v8073_v45, %v8072_v36  ;;  %v8086_v47 = vld [vmem:[#allocation39_spill] sm:$0xff] }
 0x2f0   : > { %1771 = vst [vmem:[%s6024_s12 + $0x170] sm:$0xff] %v1643_v31  ;;  %v1352_v35 = vmul.f32 %v520_v37, %v5435_v9  ;;  %v1476_v61 = vadd.f32 %v1348_v33, %v1220_v13  ;;  %v1649_v55 = vadd.f32 %v6344_v57, %v1472_v63  ;;  %v1225_v25 = vadd.f32 %v8075_v46, %v8074_v15  ;;  %v8078_v31 = vld [vmem:[#allocation50_spill] sm:$0xff]  ;;  %v1583_v63 = vpop.permute.xlu2 %1582  ;;  %v8089_v36 = vld [vmem:[#allocation151_spill] sm:$0xff] }
 0x2f1   : > { %1772 = vst [vmem:[%s6024_s12 + $0x178] sm:$0xff] %v1644_v53  ;;  %v1353_v10 = vmul.f32 %v521_v18, %v5438_v11  ;;  %v1477_v3 = vadd.f32 %v1349_v60, %v1221_v16  ;;  %v1650_v22 = vadd.f32 %v6344_v57, %v1473_v5  ;;  %v1226_v30 = vadd.f32 %v8077_v44, %v8076_v8  ;;  %v8092_v15 = vld [vmem:[#allocation195_spill] sm:$0xff]  ;;  %v8095_v8 = vld [vmem:[#allocation154_spill] sm:$0xff] }
 0x2f2   : > { %1773 = vst [vmem:[%s6024_s12 + $0x180] sm:$0xff] %v1645_v2  ;;  %v1354_v9 = vmul.f32 %v522_v59, %v5453_v62  ;;  %v1478_v37 = vadd.f32 %v1350_v39, %v1222_v19  ;;  %v1651_v54 = vadd.f32 %v6344_v57, %v1474_v50  ;;  %v1227_v14 = vadd.f32 %v8079_v26, %v8078_v31  ;;  %v8084_v19 = vld [vmem:[#allocation35_spill] sm:$0xff]  ;;  %v8085_v50 = vld [vmem:[#allocation149_spill] sm:$0xff]  ;;  %v8098_v31 = vld [vmem:[#allocation198_spill] sm:$0xff] }
 0x2f3   : > { %1774 = vst [vmem:[%s6024_s12 + $0x188] sm:$0xff] %v1646_v17  ;;  %v1355_v11 = vmul.f32 %v523_v58, %v5498_v51  ;;  %v1479_v18 = vadd.f32 %v1351_v42, %v1223_v34  ;;  %v1652_v27 = vadd.f32 %v6344_v57, %v1475_v7  ;;  %v1480_v41 = vadd.f32 %v1352_v35, %v1224_v40  ;;  %v8087_v34 = vld [vmem:[#allocation150_spill] sm:$0xff]  ;;  %v8088_v7 = vld [vmem:[#allocation40_spill] sm:$0xff]  ;;  %v8090_v40 = vld [vmem:[#allocation41_spill] sm:$0xff] }
 0x2f4   : > { %1775 = vst [vmem:[%s6024_s12 + $0x190] sm:$0xff] %v1647_v56  ;;  %v1653_v62 = vadd.f32 %v6344_v57, %v1476_v61  ;;  %v1481_v59 = vadd.f32 %v1353_v10, %v1225_v25  ;;  %v1654_v52 = vadd.f32 %v6344_v57, %v1477_v3  ;;  %v1482_v53 = vadd.f32 %v1354_v9, %v1226_v30  ;;  %v8091_v61 = vld [vmem:[#allocation152_spill] sm:$0xff]  ;;  %v8093_v25 = vld [vmem:[#allocation153_spill] sm:$0xff] }
 0x2f5   : > { %1776 = vst [vmem:[%s6024_s12 + $0x198] sm:$0xff] %v1648_v0  ;;  %v1655_v51 = vadd.f32 %v6344_v57, %v1478_v37  ;;  %v1483_v58 = vadd.f32 %v1355_v11, %v1227_v14  ;;  %v1656_v1 = vadd.f32 %v6344_v57, %v1479_v18  ;;  %v1657_v38 = vadd.f32 %v6344_v57, %v1480_v41  ;;  %v8094_v3 = vld [vmem:[#allocation196_spill] sm:$0xff]  ;;  %v8096_v30 = vld [vmem:[#allocation197_spill] sm:$0xff]  ;;  %v8097_v37 = vld [vmem:[#allocation155_spill] sm:$0xff]  ;;  %v1591_v41 = vpop.permute.xlu0 %1590 }
 0x2f6   : > { %1777 = vst [vmem:[%s6024_s12 + $0x1a0] sm:$0xff] %v1649_v55  ;;  %v1658_v13 = vadd.f32 %v6344_v57, %v1481_v59  ;;  %v1659_v33 = vadd.f32 %v6344_v57, %v1482_v53  ;;  %v1661_v49 = vadd.f32 %v1583_v63, %v5742_v20  ;;  %v1662_v48 = vadd.f32 %v1583_v63, %v5746_v23  ;;  %v8099_v14 = vld [vmem:[#allocation156_spill] sm:$0xff]  ;;  %v8100_v18 = vld [vmem:[#allocation199_spill] sm:$0xff] }
 0x2f7   : > { %1778 = vst [vmem:[%s6024_s12 + $0x1a8] sm:$0xff] %v1650_v22  ;;  %v1660_v2 = vadd.f32 %v6344_v57, %v1483_v58  ;;  %v1663_v16 = vadd.f32 %v1583_v63, %v5750_v21  ;;  %v1664_v60 = vadd.f32 %v1583_v63, %v5754_v12  ;;  %v1665_v57 = vadd.f32 %v1583_v63, %v5758_v28  ;;  %v8080_v21 = vld [vmem:[#allocation33_spill] sm:$0xff]  ;;  %v8081_v12 = vld [vmem:[#allocation147_spill] sm:$0xff]  ;;  %v8082_v28 = vld [vmem:[#allocation34_spill] sm:$0xff] }
 0x2f8   : > { %1779 = vst [vmem:[%s6024_s12 + $0x1b0] sm:$0xff] %v1651_v54  ;;  %v1666_v20 = vadd.f32 %v1583_v63, %v5762_v4  ;;  %v1667_v5 = vadd.f32 %v1583_v63, %v5766_v43  ;;  %v1668_v23 = vadd.f32 %v1583_v63, %v5770_v29  ;;  %v1669_v17 = vadd.f32 %v1583_v63, %v8080_v21  ;;  %v8083_v4 = vld [vmem:[#allocation148_spill] sm:$0xff]  ;;  %v1587_v39 = vpop.permute.xlu2 %1586  ;;  %v8111_v21 = vld [vmem:[#allocation61_spill] sm:$0xff] }
 0x2f9   : > { %1780 = vst [vmem:[%s6024_s12 + $0x1b8] sm:$0xff] %v1652_v27  ;;  %v1670_v6 = vadd.f32 %v1583_v63, %v8081_v12  ;;  %v1671_v24 = vadd.f32 %v1583_v63, %v8082_v28  ;;  %v1672_v43 = vadd.f32 %v1583_v63, %v8083_v4  ;;  %v1673_v29 = vadd.f32 %v1583_v63, %v8084_v19  ;;  %v8112_v12 = vld [vmem:[#allocation205_spill] sm:$0xff]  ;;  %v8114_v4 = vld [vmem:[#allocation206_spill] sm:$0xff] }
 0x2fa   : > { %1781 = vst [vmem:[%s6024_s12 + $0x1c0] sm:$0xff] %v1653_v62  ;;  %v1674_v56 = vadd.f32 %v1583_v63, %v8085_v50  ;;  %v1675_v32 = vadd.f32 %v1583_v63, %v8086_v47  ;;  %v1676_v42 = vadd.f32 %v1583_v63, %v8087_v34  ;;  %v1677_v0 = vadd.f32 %v1587_v39, %v8088_v7  ;;  %v8101_v62 = vld [vmem:[#allocation157_spill] sm:$0xff]  ;;  %v8106_v63 = vld [vmem:[#allocation202_spill] sm:$0xff]  ;;  %v8118_v34 = vld [vmem:[#allocation208_spill] sm:$0xff] }
 0x2fb   : > { %1782 = vst [vmem:[%s6024_s12 + $0x1c8] sm:$0xff] %v1654_v52  ;;  %v1678_v45 = vadd.f32 %v1587_v39, %v8089_v36  ;;  %v1679_v35 = vadd.f32 %v1587_v39, %v8090_v40  ;;  %v1680_v55 = vadd.f32 %v1587_v39, %v8091_v61  ;;  %v1681_v46 = vadd.f32 %v1587_v39, %v8092_v15  ;;  %v8102_v52 = vld [vmem:[#allocation200_spill] sm:$0xff]  ;;  %v8113_v28 = vld [vmem:[#allocation121_spill] sm:$0xff]  ;;  %v8115_v19 = vld [vmem:[#allocation62_spill] sm:$0xff] }
 0x2fc   : > { %1783 = vst [vmem:[%s6024_s12 + $0x1d0] sm:$0xff] %v1655_v51  ;;  %v1682_v10 = vadd.f32 %v1587_v39, %v8093_v25  ;;  %v1683_v22 = vadd.f32 %v1587_v39, %v8094_v3  ;;  %v1684_v44 = vadd.f32 %v1587_v39, %v8095_v8  ;;  %v1685_v9 = vadd.f32 %v1587_v39, %v8096_v30  ;;  %v8103_v51 = vld [vmem:[#allocation158_spill] sm:$0xff]  ;;  %v8119_v7 = vld [vmem:[#allocation63_spill] sm:$0xff]  ;;  %v8120_v36 = vld [vmem:[#allocation209_spill] sm:$0xff] }
 0x2fd   : > { %1784 = vst [vmem:[%s6024_s12 + $0x1d8] sm:$0xff] %v1656_v1  ;;  %v1686_v54 = vadd.f32 %v1587_v39, %v8097_v37  ;;  %v1687_v26 = vadd.f32 %v1587_v39, %v8098_v31  ;;  %v1688_v11 = vadd.f32 %v1587_v39, %v8099_v14  ;;  %v1689_v27 = vadd.f32 %v1587_v39, %v8100_v18  ;;  %v8104_v1 = vld [vmem:[#allocation201_spill] sm:$0xff]  ;;  %v8117_v47 = vld [vmem:[#allocation122_spill] sm:$0xff]  ;;  %v8121_v40 = vld [vmem:[#allocation123_spill] sm:$0xff] }
 0x2fe   : > { %1785 = vst [vmem:[%s6024_s12 + $0x1e0] sm:$0xff] %v1657_v38  ;;  %v1690_v59 = vadd.f32 %v1587_v39, %v8101_v62  ;;  %v1691_v53 = vadd.f32 %v1587_v39, %v8102_v52  ;;  %v1692_v58 = vadd.f32 %v1587_v39, %v8103_v51  ;;  %v1693_v38 = vadd.f32 %v1591_v41, %v8104_v1  ;;  %v8116_v39 = vld [vmem:[#allocation207_spill] sm:$0xff]  ;;  %v8122_v61 = vld [vmem:[#allocation210_spill] sm:$0xff]  ;;  %v8123_v15 = vld [vmem:[#allocation64_spill] sm:$0xff] }
 0x2ff   : > { %1786 = vst [vmem:[%s6024_s12 + $0x1e8] sm:$0xff] %v1658_v13  ;;  %v8105_v13 = vld [vmem:[#allocation119_spill] sm:$0xff]  ;;  %v1705_v50 = vadd.f32 %v1591_v41, %v8116_v39  ;;  %v8125_v3 = vld [vmem:[#allocation124_spill] sm:$0xff]  ;;  %v8127_v30 = vld [vmem:[#allocation65_spill] sm:$0xff] }
 0x300   : > { %1787 = vst [vmem:[%s6024_s12 + $0x1f0] sm:$0xff] %v1659_v33  ;;  %v1694_v33 = vadd.f32 %v1591_v41, %v8105_v13  ;;  %v8124_v25 = vld [vmem:[#allocation211_spill] sm:$0xff]  ;;  %v8126_v8 = vld [vmem:[#allocation212_spill] sm:$0xff]  ;;  %v8128_v37 = vld [vmem:[#allocation213_spill] sm:$0xff] }
 0x301   : > { %1788 = vst [vmem:[%s6024_s12 + $0x1f8] sm:$0xff] %v1660_v2  ;;  %v1695_v2 = vadd.f32 %v1591_v41, %v8106_v63  ;;  %v8129_v31 = vld [vmem:[#allocation125_spill] sm:$0xff]  ;;  %v8130_v14 = vld [vmem:[#allocation214_spill] sm:$0xff]  ;;  %v8131_v18 = vld [vmem:[#allocation67_spill] sm:$0xff] }
 0x302   : > { %1789 = vst [vmem:[%s6024_s12 + $0x200] sm:$0xff] %v1661_v49  ;;  %v8107_v49 = vld [vmem:[#allocation60_spill] sm:$0xff]  ;;  %v1880_v13 = vld [vmem:[%s6024_s12 + $0x8] sm:$0xff] (%p2417_p6)  ;;  %v1884_v63 = vld [vmem:[%s6024_s12 + $0x18] sm:$0xff] (%p2417_p6) }
 0x303   : > { %1790 = vst [vmem:[%s6024_s12 + $0x208] sm:$0xff] %v1662_v48  ;;  %v1696_v48 = vadd.f32 %v1591_v41, %v8107_v49  ;;  %v1888_v49 = vld [vmem:[%s6024_s12 + $0x28] sm:$0xff] (%p2417_p6)  ;;  %v1924_v39 = vld [vmem:[%s6024_s12 + $0xb8] sm:$0xff] (%p2417_p6) }
 0x304   : > { %1791 = vst [vmem:[%s6024_s12 + $0x210] sm:$0xff] %v1663_v16  ;;  %v8108_v16 = vld [vmem:[#allocation203_spill] sm:$0xff] }
 0x305   : > { %1792 = vst [vmem:[%s6024_s12 + $0x218] sm:$0xff] %v1664_v60  ;;  %v1697_v60 = vadd.f32 %v1591_v41, %v8108_v16  ;;  %v1892_v16 = vld [vmem:[%s6024_s12 + $0x38] sm:$0xff] (%p2417_p6) }
 0x306   : > { %1793 = vst [vmem:[%s6024_s12 + $0x220] sm:$0xff] %v1665_v57  ;;  %v8109_v57 = vld [vmem:[#allocation120_spill] sm:$0xff] }
 0x307   : > { %1794 = vst [vmem:[%s6024_s12 + $0x228] sm:$0xff] %v1666_v20  ;;  %v1698_v20 = vadd.f32 %v1591_v41, %v8109_v57  ;;  %v1896_v57 = vld [vmem:[%s6024_s12 + $0x48] sm:$0xff] (%p2417_p6) }
 0x308   : > { %1795 = vst [vmem:[%s6024_s12 + $0x230] sm:$0xff] %v1667_v5  ;;  %v8110_v5 = vld [vmem:[#allocation204_spill] sm:$0xff] }
 0x309   : > { %1796 = vst [vmem:[%s6024_s12 + $0x238] sm:$0xff] %v1668_v23  ;;  %v1699_v23 = vadd.f32 %v1591_v41, %v8110_v5  ;;  %v1900_v5 = vld [vmem:[%s6024_s12 + $0x58] sm:$0xff] (%p2417_p6) }
 0x30a   : > { %1797 = vst [vmem:[%s6024_s12 + $0x240] sm:$0xff] %v1669_v17  ;;  %v1700_v17 = vadd.f32 %v1591_v41, %v8111_v21  ;;  %v1904_v21 = vld [vmem:[%s6024_s12 + $0x68] sm:$0xff] (%p2417_p6) }
 0x30b   : > { %1798 = vst [vmem:[%s6024_s12 + $0x248] sm:$0xff] %v1670_v6  ;;  %v1701_v6 = vadd.f32 %v1591_v41, %v8112_v12  ;;  %v1908_v12 = vld [vmem:[%s6024_s12 + $0x78] sm:$0xff] (%p2417_p6) }
 0x30c   : > { %1799 = vst [vmem:[%s6024_s12 + $0x250] sm:$0xff] %v1671_v24  ;;  %v1702_v24 = vadd.f32 %v1591_v41, %v8113_v28  ;;  %v1912_v28 = vld [vmem:[%s6024_s12 + $0x88] sm:$0xff] (%p2417_p6) }
 0x30d   : > { %1800 = vst [vmem:[%s6024_s12 + $0x258] sm:$0xff] %v1672_v43  ;;  %v1703_v43 = vadd.f32 %v1591_v41, %v8114_v4  ;;  %v1916_v4 = vld [vmem:[%s6024_s12 + $0x98] sm:$0xff] (%p2417_p6) }
 0x30e   : > { %1801 = vst [vmem:[%s6024_s12 + $0x260] sm:$0xff] %v1673_v29  ;;  %v1704_v29 = vadd.f32 %v1591_v41, %v8115_v19  ;;  %v1920_v19 = vld [vmem:[%s6024_s12 + $0xa8] sm:$0xff] (%p2417_p6) }
 0x30f   : > { %1802 = vst [vmem:[%s6024_s12 + $0x268] sm:$0xff] %v1674_v56  ;;  %v1595_v56 = vpop.permute.xlu1 %1594 }
 0x310   : > { %1803 = vst [vmem:[%s6024_s12 + $0x270] sm:$0xff] %v1675_v32  ;;  %v1706_v32 = vadd.f32 %v1591_v41, %v8117_v47  ;;  %v1930_v47 = vld [vmem:[%s6024_s12 + $0xd0] sm:$0xff] (%p2417_p6) }
 0x311   : > { %1804 = vst [vmem:[%s6024_s12 + $0x278] sm:$0xff] %v1676_v42  ;;  %v1707_v42 = vadd.f32 %v1591_v41, %v8118_v34  ;;  %v1934_v34 = vld [vmem:[%s6024_s12 + $0xe0] sm:$0xff] (%p2417_p6) }
 0x312   : > { %1805 = vst [vmem:[%s6024_s12 + $0x280] sm:$0xff] %v1677_v0  ;;  %v1708_v0 = vadd.f32 %v1591_v41, %v8119_v7  ;;  %v8132_v41 = vld [vmem:[#allocation215_spill] sm:$0xff]  ;;  %v1938_v7 = vld [vmem:[%s6024_s12 + $0xf0] sm:$0xff] (%p2417_p6) }
 0x313   : > { %1806 = vst [vmem:[%s6024_s12 + $0x288] sm:$0xff] %v1678_v45  ;;  %v1709_v45 = vadd.f32 %v1595_v56, %v8120_v36  ;;  %v1721_v62 = vadd.f32 %v1595_v56, %v8132_v41  ;;  %v1942_v36 = vld [vmem:[%s6024_s12 + $0x100] sm:$0xff] (%p2417_p6) }
 0x314   : > { %1807 = vst [vmem:[%s6024_s12 + $0x290] sm:$0xff] %v1679_v35  ;;  %v1710_v35 = vadd.f32 %v1595_v56, %v8121_v40  ;;  %v1946_v40 = vld [vmem:[%s6024_s12 + $0x110] sm:$0xff] (%p2417_p6)  ;;  %v1990_v41 = vld [vmem:[%s6024_s12 + $0x1c0] sm:$0xff] (%p2417_p6) }
 0x315   : > { %1808 = vst [vmem:[%s6024_s12 + $0x298] sm:$0xff] %v1680_v55  ;;  %v1711_v55 = vadd.f32 %v1595_v56, %v8122_v61  ;;  %v1950_v61 = vld [vmem:[%s6024_s12 + $0x120] sm:$0xff] (%p2417_p6) }
 0x316   : > { %1809 = vst [vmem:[%s6024_s12 + $0x2a0] sm:$0xff] %v1681_v46  ;;  %v1712_v46 = vadd.f32 %v1595_v56, %v8123_v15  ;;  %v1954_v15 = vld [vmem:[%s6024_s12 + $0x130] sm:$0xff] (%p2417_p6) }
 0x317   : > { %1810 = vst [vmem:[%s6024_s12 + $0x2a8] sm:$0xff] %v1682_v10  ;;  %v1713_v10 = vadd.f32 %v1595_v56, %v8124_v25  ;;  %v1958_v25 = vld [vmem:[%s6024_s12 + $0x140] sm:$0xff] (%p2417_p6) }
 0x318   : > { %1811 = vst [vmem:[%s6024_s12 + $0x2b0] sm:$0xff] %v1683_v22  ;;  %v1714_v22 = vadd.f32 %v1595_v56, %v8125_v3  ;;  %v1962_v3 = vld [vmem:[%s6024_s12 + $0x150] sm:$0xff] (%p2417_p6) }
 0x319   : > { %1812 = vst [vmem:[%s6024_s12 + $0x2b8] sm:$0xff] %v1684_v44  ;;  %v1715_v44 = vadd.f32 %v1595_v56, %v8126_v8  ;;  %v1966_v8 = vld [vmem:[%s6024_s12 + $0x160] sm:$0xff] (%p2417_p6) }
 0x31a   : > { %1813 = vst [vmem:[%s6024_s12 + $0x2c0] sm:$0xff] %v1685_v9  ;;  %v1716_v9 = vadd.f32 %v1595_v56, %v8127_v30  ;;  %v1970_v30 = vld [vmem:[%s6024_s12 + $0x170] sm:$0xff] (%p2417_p6) }
 0x31b   : > { %1814 = vst [vmem:[%s6024_s12 + $0x2c8] sm:$0xff] %v1686_v54  ;;  %v1717_v54 = vadd.f32 %v1595_v56, %v8128_v37  ;;  %v1974_v37 = vld [vmem:[%s6024_s12 + $0x180] sm:$0xff] (%p2417_p6) }
 0x31c   : > { %1815 = vst [vmem:[%s6024_s12 + $0x2d0] sm:$0xff] %v1687_v26  ;;  %v1718_v26 = vadd.f32 %v1595_v56, %v8129_v31  ;;  %v1978_v31 = vld [vmem:[%s6024_s12 + $0x190] sm:$0xff] (%p2417_p6) }
 0x31d   : > { %1816 = vst [vmem:[%s6024_s12 + $0x2d8] sm:$0xff] %v1688_v11  ;;  %v1719_v11 = vadd.f32 %v1595_v56, %v8130_v14  ;;  %v1982_v14 = vld [vmem:[%s6024_s12 + $0x1a0] sm:$0xff] (%p2417_p6) }
 0x31e   : > { %1817 = vst [vmem:[%s6024_s12 + $0x2e0] sm:$0xff] %v1689_v27  ;;  %v1720_v27 = vadd.f32 %v1595_v56, %v8131_v18  ;;  %v1986_v18 = vld [vmem:[%s6024_s12 + $0x1b0] sm:$0xff] (%p2417_p6) }
 0x31f   : > { %1818 = vst [vmem:[%s6024_s12 + $0x2e8] sm:$0xff] %v1690_v59  ;;  %v8133_v59 = vld [vmem:[#allocation82_spill] sm:$0xff] }
 0x320   : > { %1819 = vst [vmem:[%s6024_s12 + $0x2f0] sm:$0xff] %v1691_v53  ;;  %v1722_v52 = vadd.f32 %v1595_v56, %v8133_v59  ;;  %v8134_v53 = vld [vmem:[#allocation216_spill] sm:$0xff]  ;;  %v1994_v59 = vld [vmem:[%s6024_s12 + $0x1d0] sm:$0xff] (%p2417_p6) }
 0x321   : > { %1820 = vst [vmem:[%s6024_s12 + $0x2f8] sm:$0xff] %v1692_v58  ;;  %v1723_v51 = vadd.f32 %v1595_v56, %v8134_v53  ;;  %v8135_v58 = vld [vmem:[#allocation126_spill] sm:$0xff]  ;;  %v1998_v53 = vld [vmem:[%s6024_s12 + $0x1e0] sm:$0xff] (%p2417_p6) }
 0x322   : > { %1821 = vst [vmem:[%s6024_s12 + $0x300] sm:$0xff] %v1693_v38  ;;  %v1724_v1 = vadd.f32 %v1595_v56, %v8135_v58  ;;  %v1878_v38 = vld [vmem:[%s6024_s12] sm:$0xff] (%p2417_p6)  ;;  %v1928_v56 = vld [vmem:[%s6024_s12 + $0xc8] sm:$0xff] (%p2417_p6)  ;;  %v2002_v58 = vld [vmem:[%s6024_s12 + $0x1f0] sm:$0xff] (%p2417_p6) }
 0x323   : > { %1822 = vst [vmem:[%s6024_s12 + $0x308] sm:$0xff] %v1694_v33  ;;  %v1882_v33 = vld [vmem:[%s6024_s12 + $0x10] sm:$0xff] (%p2417_p6) }
 0x324   : > { %1823 = vst [vmem:[%s6024_s12 + $0x310] sm:$0xff] %v1695_v2  ;;  %v1886_v2 = vld [vmem:[%s6024_s12 + $0x20] sm:$0xff] (%p2417_p6) }
 0x325   : > { %1824 = vst [vmem:[%s6024_s12 + $0x318] sm:$0xff] %v1696_v48  ;;  %v1890_v48 = vld [vmem:[%s6024_s12 + $0x30] sm:$0xff] (%p2417_p6) }
 0x326   : > { %1825 = vst [vmem:[%s6024_s12 + $0x320] sm:$0xff] %v1697_v60  ;;  %v1894_v60 = vld [vmem:[%s6024_s12 + $0x40] sm:$0xff] (%p2417_p6) }
 0x327   : > { %1826 = vst [vmem:[%s6024_s12 + $0x328] sm:$0xff] %v1698_v20  ;;  %v1898_v20 = vld [vmem:[%s6024_s12 + $0x50] sm:$0xff] (%p2417_p6) }
 0x328   : > { %1827 = vst [vmem:[%s6024_s12 + $0x330] sm:$0xff] %v1699_v23  ;;  %v1902_v23 = vld [vmem:[%s6024_s12 + $0x60] sm:$0xff] (%p2417_p6) }
 0x329   : > { %1828 = vst [vmem:[%s6024_s12 + $0x338] sm:$0xff] %v1700_v17  ;;  %v1906_v17 = vld [vmem:[%s6024_s12 + $0x70] sm:$0xff] (%p2417_p6) }
 0x32a   : > { %1829 = vst [vmem:[%s6024_s12 + $0x340] sm:$0xff] %v1701_v6  ;;  %v1910_v6 = vld [vmem:[%s6024_s12 + $0x80] sm:$0xff] (%p2417_p6) }
 0x32b   : > { %1830 = vst [vmem:[%s6024_s12 + $0x348] sm:$0xff] %v1702_v24  ;;  %v1914_v24 = vld [vmem:[%s6024_s12 + $0x90] sm:$0xff] (%p2417_p6) }
 0x32c   : > { %1831 = vst [vmem:[%s6024_s12 + $0x350] sm:$0xff] %v1703_v43  ;;  %v1918_v43 = vld [vmem:[%s6024_s12 + $0xa0] sm:$0xff] (%p2417_p6) }
 0x32d   : > { %1832 = vst [vmem:[%s6024_s12 + $0x358] sm:$0xff] %v1704_v29  ;;  %v1922_v29 = vld [vmem:[%s6024_s12 + $0xb0] sm:$0xff] (%p2417_p6) }
 0x32e   : > { %1833 = vst [vmem:[%s6024_s12 + $0x360] sm:$0xff] %v1705_v50  ;;  %v1926_v50 = vld [vmem:[%s6024_s12 + $0xc0] sm:$0xff] (%p2417_p6) }
 0x32f   : > { %1834 = vst [vmem:[%s6024_s12 + $0x368] sm:$0xff] %v1706_v32  ;;  %v1932_v32 = vld [vmem:[%s6024_s12 + $0xd8] sm:$0xff] (%p2417_p6) }
 0x330   : > { %1835 = vst [vmem:[%s6024_s12 + $0x370] sm:$0xff] %v1707_v42  ;;  %v1936_v42 = vld [vmem:[%s6024_s12 + $0xe8] sm:$0xff] (%p2417_p6) }
 0x331   : > { %1836 = vst [vmem:[%s6024_s12 + $0x378] sm:$0xff] %v1708_v0  ;;  %v1940_v0 = vld [vmem:[%s6024_s12 + $0xf8] sm:$0xff] (%p2417_p6) }
 0x332   : > { %1837 = vst [vmem:[%s6024_s12 + $0x380] sm:$0xff] %v1709_v45  ;;  %v1944_v45 = vld [vmem:[%s6024_s12 + $0x108] sm:$0xff] (%p2417_p6) }
 0x333   : > { %1838 = vst [vmem:[%s6024_s12 + $0x388] sm:$0xff] %v1710_v35  ;;  %v1948_v35 = vld [vmem:[%s6024_s12 + $0x118] sm:$0xff] (%p2417_p6) }
 0x334   : > { %1839 = vst [vmem:[%s6024_s12 + $0x390] sm:$0xff] %v1711_v55  ;;  %v1952_v55 = vld [vmem:[%s6024_s12 + $0x128] sm:$0xff] (%p2417_p6) }
 0x335   : > { %1840 = vst [vmem:[%s6024_s12 + $0x398] sm:$0xff] %v1712_v46  ;;  %v1956_v46 = vld [vmem:[%s6024_s12 + $0x138] sm:$0xff] (%p2417_p6) }
 0x336   : > { %1841 = vst [vmem:[%s6024_s12 + $0x3a0] sm:$0xff] %v1713_v10  ;;  %v1960_v10 = vld [vmem:[%s6024_s12 + $0x148] sm:$0xff] (%p2417_p6) }
 0x337   : > { %1842 = vst [vmem:[%s6024_s12 + $0x3a8] sm:$0xff] %v1714_v22  ;;  %v1964_v22 = vld [vmem:[%s6024_s12 + $0x158] sm:$0xff] (%p2417_p6) }
 0x338   : > { %1843 = vst [vmem:[%s6024_s12 + $0x3b0] sm:$0xff] %v1715_v44  ;;  %v1968_v44 = vld [vmem:[%s6024_s12 + $0x168] sm:$0xff] (%p2417_p6) }
 0x339   : > { %1844 = vst [vmem:[%s6024_s12 + $0x3b8] sm:$0xff] %v1716_v9  ;;  %v1972_v9 = vld [vmem:[%s6024_s12 + $0x178] sm:$0xff] (%p2417_p6) }
 0x33a   : > { %1845 = vst [vmem:[%s6024_s12 + $0x3c0] sm:$0xff] %v1717_v54  ;;  %v1976_v54 = vld [vmem:[%s6024_s12 + $0x188] sm:$0xff] (%p2417_p6) }
 0x33b   : > { %1846 = vst [vmem:[%s6024_s12 + $0x3c8] sm:$0xff] %v1718_v26  ;;  %v1980_v26 = vld [vmem:[%s6024_s12 + $0x198] sm:$0xff] (%p2417_p6) }
 0x33c   : > { %1847 = vst [vmem:[%s6024_s12 + $0x3d0] sm:$0xff] %v1719_v11  ;;  %v1984_v11 = vld [vmem:[%s6024_s12 + $0x1a8] sm:$0xff] (%p2417_p6) }
 0x33d   : > { %1848 = vst [vmem:[%s6024_s12 + $0x3d8] sm:$0xff] %v1720_v27  ;;  %1859 = sbr.rel (!%p2417_p6) target bundleno = 962 (0x3c2), region = 59  ;;  %v1988_v27 = vld [vmem:[%s6024_s12 + $0x1b8] sm:$0xff] (%p2417_p6) }
 0x33e   : > { %1849 = vst [vmem:[%s6024_s12 + $0x3e0] sm:$0xff] %v1721_v62  ;;  %v1992_v62 = vld [vmem:[%s6024_s12 + $0x1c8] sm:$0xff] (%p2417_p6) }
 0x33f   : > { %1850 = vst [vmem:[%s6024_s12 + $0x3e8] sm:$0xff] %v1722_v52  ;;  %v1996_v52 = vld [vmem:[%s6024_s12 + $0x1d8] sm:$0xff] (%p2417_p6) }
 0x340   : > { %1851 = vst [vmem:[%s6024_s12 + $0x3f0] sm:$0xff] %v1723_v51  ;;  %v2000_v51 = vld [vmem:[%s6024_s12 + $0x1e8] sm:$0xff] (%p2417_p6) }
 0x341   : > { %1852 = vst [vmem:[%s6024_s12 + $0x3f8] sm:$0xff] %v1724_v1  ;;  %v2004_v1 = vld [vmem:[%s6024_s12 + $0x1f8] sm:$0xff] (%p2417_p6) }
 0x342   : > { %1879 = vst [vmem:[%s6561_s4] sm:$0xff] %v1878_v38  ;;  %v2006_v38 = vld [vmem:[%s6024_s12 + $0x200] sm:$0xff] }
 0x343   : > { %1881 = vst [vmem:[%s6561_s4 + $0x8] sm:$0xff] %v1880_v13  ;;  %v2008_v13 = vld [vmem:[%s6024_s12 + $0x208] sm:$0xff] }
 0x344   : > { %1883 = vst [vmem:[%s6561_s4 + $0x10] sm:$0xff] %v1882_v33  ;;  %v2010_v33 = vld [vmem:[%s6024_s12 + $0x210] sm:$0xff] }
 0x345   : > { %1885 = vst [vmem:[%s6561_s4 + $0x18] sm:$0xff] %v1884_v63  ;;  %v2012_v63 = vld [vmem:[%s6024_s12 + $0x218] sm:$0xff] }
 0x346   : > { %1887 = vst [vmem:[%s6561_s4 + $0x20] sm:$0xff] %v1886_v2  ;;  %v2014_v2 = vld [vmem:[%s6024_s12 + $0x220] sm:$0xff] }
 0x347   : > { %1889 = vst [vmem:[%s6561_s4 + $0x28] sm:$0xff] %v1888_v49  ;;  %v2016_v49 = vld [vmem:[%s6024_s12 + $0x228] sm:$0xff] }
 0x348   : > { %1891 = vst [vmem:[%s6561_s4 + $0x30] sm:$0xff] %v1890_v48  ;;  %v2018_v48 = vld [vmem:[%s6024_s12 + $0x230] sm:$0xff] }
 0x349   : > { %1893 = vst [vmem:[%s6561_s4 + $0x38] sm:$0xff] %v1892_v16  ;;  %v2020_v16 = vld [vmem:[%s6024_s12 + $0x238] sm:$0xff] }
 0x34a   : > { %1895 = vst [vmem:[%s6561_s4 + $0x40] sm:$0xff] %v1894_v60  ;;  %v2022_v60 = vld [vmem:[%s6024_s12 + $0x240] sm:$0xff] }
 0x34b   : > { %1897 = vst [vmem:[%s6561_s4 + $0x48] sm:$0xff] %v1896_v57  ;;  %v2024_v57 = vld [vmem:[%s6024_s12 + $0x248] sm:$0xff] }
 0x34c   : > { %1899 = vst [vmem:[%s6561_s4 + $0x50] sm:$0xff] %v1898_v20  ;;  %v2026_v20 = vld [vmem:[%s6024_s12 + $0x250] sm:$0xff] }
 0x34d   : > { %1901 = vst [vmem:[%s6561_s4 + $0x58] sm:$0xff] %v1900_v5  ;;  %v2028_v5 = vld [vmem:[%s6024_s12 + $0x258] sm:$0xff] }
 0x34e   : > { %1903 = vst [vmem:[%s6561_s4 + $0x60] sm:$0xff] %v1902_v23  ;;  %v2030_v23 = vld [vmem:[%s6024_s12 + $0x260] sm:$0xff] }
 0x34f   : > { %1905 = vst [vmem:[%s6561_s4 + $0x68] sm:$0xff] %v1904_v21  ;;  %v2032_v21 = vld [vmem:[%s6024_s12 + $0x268] sm:$0xff] }
 0x350   : > { %1907 = vst [vmem:[%s6561_s4 + $0x70] sm:$0xff] %v1906_v17  ;;  %v2034_v17 = vld [vmem:[%s6024_s12 + $0x270] sm:$0xff] }
 0x351   : > { %1909 = vst [vmem:[%s6561_s4 + $0x78] sm:$0xff] %v1908_v12  ;;  %v2036_v12 = vld [vmem:[%s6024_s12 + $0x278] sm:$0xff] }
 0x352   : > { %1911 = vst [vmem:[%s6561_s4 + $0x100] sm:$0xff] %v1910_v6  ;;  %v2038_v6 = vld [vmem:[%s6024_s12 + $0x280] sm:$0xff] }
 0x353   : > { %1913 = vst [vmem:[%s6561_s4 + $0x108] sm:$0xff] %v1912_v28  ;;  %v2040_v28 = vld [vmem:[%s6024_s12 + $0x288] sm:$0xff] }
 0x354   : > { %1915 = vst [vmem:[%s6561_s4 + $0x110] sm:$0xff] %v1914_v24  ;;  %v2042_v24 = vld [vmem:[%s6024_s12 + $0x290] sm:$0xff] }
 0x355   : > { %1917 = vst [vmem:[%s6561_s4 + $0x118] sm:$0xff] %v1916_v4  ;;  %v2044_v4 = vld [vmem:[%s6024_s12 + $0x298] sm:$0xff] }
 0x356   : > { %1919 = vst [vmem:[%s6561_s4 + $0x120] sm:$0xff] %v1918_v43  ;;  %v2046_v43 = vld [vmem:[%s6024_s12 + $0x2a0] sm:$0xff] }
 0x357   : > { %1921 = vst [vmem:[%s6561_s4 + $0x128] sm:$0xff] %v1920_v19  ;;  %v2048_v19 = vld [vmem:[%s6024_s12 + $0x2a8] sm:$0xff] }
 0x358   : > { %1923 = vst [vmem:[%s6561_s4 + $0x130] sm:$0xff] %v1922_v29  ;;  %v2050_v29 = vld [vmem:[%s6024_s12 + $0x2b0] sm:$0xff] }
 0x359   : > { %1925 = vst [vmem:[%s6561_s4 + $0x138] sm:$0xff] %v1924_v39  ;;  %v2052_v39 = vld [vmem:[%s6024_s12 + $0x2b8] sm:$0xff] }
 0x35a   : > { %1927 = vst [vmem:[%s6561_s4 + $0x140] sm:$0xff] %v1926_v50  ;;  %v2054_v50 = vld [vmem:[%s6024_s12 + $0x2c0] sm:$0xff] }
 0x35b   : > { %1929 = vst [vmem:[%s6561_s4 + $0x148] sm:$0xff] %v1928_v56  ;;  %v2056_v56 = vld [vmem:[%s6024_s12 + $0x2c8] sm:$0xff] }
 0x35c   : > { %1931 = vst [vmem:[%s6561_s4 + $0x150] sm:$0xff] %v1930_v47  ;;  %v2058_v47 = vld [vmem:[%s6024_s12 + $0x2d0] sm:$0xff] }
 0x35d   : > { %1933 = vst [vmem:[%s6561_s4 + $0x158] sm:$0xff] %v1932_v32  ;;  %v2060_v32 = vld [vmem:[%s6024_s12 + $0x2d8] sm:$0xff] }
 0x35e   : > { %1935 = vst [vmem:[%s6561_s4 + $0x160] sm:$0xff] %v1934_v34  ;;  %v2062_v34 = vld [vmem:[%s6024_s12 + $0x2e0] sm:$0xff] }
 0x35f   : > { %1937 = vst [vmem:[%s6561_s4 + $0x168] sm:$0xff] %v1936_v42  ;;  %v2064_v42 = vld [vmem:[%s6024_s12 + $0x2e8] sm:$0xff] }
 0x360   : > { %1939 = vst [vmem:[%s6561_s4 + $0x170] sm:$0xff] %v1938_v7  ;;  %v2066_v7 = vld [vmem:[%s6024_s12 + $0x2f0] sm:$0xff] }
 0x361   : > { %1941 = vst [vmem:[%s6561_s4 + $0x178] sm:$0xff] %v1940_v0  ;;  %v2068_v0 = vld [vmem:[%s6024_s12 + $0x2f8] sm:$0xff] }
 0x362   : > { %1943 = vst [vmem:[%s6561_s4 + $0x200] sm:$0xff] %v1942_v36  ;;  %v2070_v36 = vld [vmem:[%s6024_s12 + $0x300] sm:$0xff] }
 0x363   : > { %1945 = vst [vmem:[%s6561_s4 + $0x208] sm:$0xff] %v1944_v45  ;;  %v2072_v45 = vld [vmem:[%s6024_s12 + $0x308] sm:$0xff] }
 0x364   : > { %1947 = vst [vmem:[%s6561_s4 + $0x210] sm:$0xff] %v1946_v40  ;;  %v2074_v40 = vld [vmem:[%s6024_s12 + $0x310] sm:$0xff] }
 0x365   : > { %1949 = vst [vmem:[%s6561_s4 + $0x218] sm:$0xff] %v1948_v35  ;;  %v2076_v35 = vld [vmem:[%s6024_s12 + $0x318] sm:$0xff] }
 0x366   : > { %1951 = vst [vmem:[%s6561_s4 + $0x220] sm:$0xff] %v1950_v61  ;;  %v2078_v61 = vld [vmem:[%s6024_s12 + $0x320] sm:$0xff] }
 0x367   : > { %1953 = vst [vmem:[%s6561_s4 + $0x228] sm:$0xff] %v1952_v55  ;;  %v2080_v55 = vld [vmem:[%s6024_s12 + $0x328] sm:$0xff] }
 0x368   : > { %1955 = vst [vmem:[%s6561_s4 + $0x230] sm:$0xff] %v1954_v15  ;;  %v2082_v15 = vld [vmem:[%s6024_s12 + $0x330] sm:$0xff] }
 0x369   : > { %1957 = vst [vmem:[%s6561_s4 + $0x238] sm:$0xff] %v1956_v46  ;;  %v2084_v46 = vld [vmem:[%s6024_s12 + $0x338] sm:$0xff] }
 0x36a   : > { %1959 = vst [vmem:[%s6561_s4 + $0x240] sm:$0xff] %v1958_v25  ;;  %v2086_v25 = vld [vmem:[%s6024_s12 + $0x340] sm:$0xff] }
 0x36b   : > { %1961 = vst [vmem:[%s6561_s4 + $0x248] sm:$0xff] %v1960_v10  ;;  %v2088_v10 = vld [vmem:[%s6024_s12 + $0x348] sm:$0xff] }
 0x36c   : > { %1963 = vst [vmem:[%s6561_s4 + $0x250] sm:$0xff] %v1962_v3  ;;  %v2090_v3 = vld [vmem:[%s6024_s12 + $0x350] sm:$0xff] }
 0x36d   : > { %1965 = vst [vmem:[%s6561_s4 + $0x258] sm:$0xff] %v1964_v22  ;;  %v2092_v22 = vld [vmem:[%s6024_s12 + $0x358] sm:$0xff] }
 0x36e   : > { %1967 = vst [vmem:[%s6561_s4 + $0x260] sm:$0xff] %v1966_v8  ;;  %v2094_v8 = vld [vmem:[%s6024_s12 + $0x360] sm:$0xff] }
 0x36f   : > { %1969 = vst [vmem:[%s6561_s4 + $0x268] sm:$0xff] %v1968_v44  ;;  %v2096_v44 = vld [vmem:[%s6024_s12 + $0x368] sm:$0xff] }
 0x370   : > { %1971 = vst [vmem:[%s6561_s4 + $0x270] sm:$0xff] %v1970_v30  ;;  %v2098_v30 = vld [vmem:[%s6024_s12 + $0x370] sm:$0xff] }
 0x371   : > { %1973 = vst [vmem:[%s6561_s4 + $0x278] sm:$0xff] %v1972_v9  ;;  %v2100_v9 = vld [vmem:[%s6024_s12 + $0x378] sm:$0xff] }
 0x372   : > { %1975 = vst [vmem:[%s6561_s4 + $0x300] sm:$0xff] %v1974_v37  ;;  %v2102_v37 = vld [vmem:[%s6024_s12 + $0x380] sm:$0xff] }
 0x373   : > { %1977 = vst [vmem:[%s6561_s4 + $0x308] sm:$0xff] %v1976_v54  ;;  %v2104_v54 = vld [vmem:[%s6024_s12 + $0x388] sm:$0xff] }
 0x374   : > { %1979 = vst [vmem:[%s6561_s4 + $0x310] sm:$0xff] %v1978_v31  ;;  %v2106_v31 = vld [vmem:[%s6024_s12 + $0x390] sm:$0xff] }
 0x375   : > { %1981 = vst [vmem:[%s6561_s4 + $0x318] sm:$0xff] %v1980_v26  ;;  %v2108_v26 = vld [vmem:[%s6024_s12 + $0x398] sm:$0xff] }
 0x376   : > { %1983 = vst [vmem:[%s6561_s4 + $0x320] sm:$0xff] %v1982_v14  ;;  %v2110_v14 = vld [vmem:[%s6024_s12 + $0x3a0] sm:$0xff] }
 0x377   : > { %1985 = vst [vmem:[%s6561_s4 + $0x328] sm:$0xff] %v1984_v11  ;;  %v2112_v11 = vld [vmem:[%s6024_s12 + $0x3a8] sm:$0xff] }
 0x378   : > { %1987 = vst [vmem:[%s6561_s4 + $0x330] sm:$0xff] %v1986_v18  ;;  %v2114_v18 = vld [vmem:[%s6024_s12 + $0x3b0] sm:$0xff] }
 0x379   : > { %1989 = vst [vmem:[%s6561_s4 + $0x338] sm:$0xff] %v1988_v27  ;;  %v2116_v27 = vld [vmem:[%s6024_s12 + $0x3b8] sm:$0xff] }
 0x37a   : > { %1991 = vst [vmem:[%s6561_s4 + $0x340] sm:$0xff] %v1990_v41  ;;  %v2118_v41 = vld [vmem:[%s6024_s12 + $0x3c0] sm:$0xff] }
 0x37b   : > { %1993 = vst [vmem:[%s6561_s4 + $0x348] sm:$0xff] %v1992_v62  ;;  %v2120_v62 = vld [vmem:[%s6024_s12 + $0x3c8] sm:$0xff] }
 0x37c   : > { %1995 = vst [vmem:[%s6561_s4 + $0x350] sm:$0xff] %v1994_v59  ;;  %v2122_v59 = vld [vmem:[%s6024_s12 + $0x3d0] sm:$0xff] }
 0x37d   : > { %1997 = vst [vmem:[%s6561_s4 + $0x358] sm:$0xff] %v1996_v52  ;;  %v2124_v52 = vld [vmem:[%s6024_s12 + $0x3d8] sm:$0xff] }
 0x37e   : > { %1999 = vst [vmem:[%s6561_s4 + $0x360] sm:$0xff] %v1998_v53  ;;  %v2126_v53 = vld [vmem:[%s6024_s12 + $0x3e0] sm:$0xff] }
 0x37f   : > { %2001 = vst [vmem:[%s6561_s4 + $0x368] sm:$0xff] %v2000_v51  ;;  %v2128_v51 = vld [vmem:[%s6024_s12 + $0x3e8] sm:$0xff] }
 0x380   : > { %2003 = vst [vmem:[%s6561_s4 + $0x370] sm:$0xff] %v2002_v58  ;;  %v2130_v58 = vld [vmem:[%s6024_s12 + $0x3f0] sm:$0xff] }
 0x381   : > { %2005 = vst [vmem:[%s6561_s4 + $0x378] sm:$0xff] %v2004_v1  ;;  %v2132_v1 = vld [vmem:[%s6024_s12 + $0x3f8] sm:$0xff] }
 0x382   : > { %2007 = vst [vmem:[%s6561_s4 + $0x400] sm:$0xff] %v2006_v38 }
 0x383   : > { %2009 = vst [vmem:[%s6561_s4 + $0x408] sm:$0xff] %v2008_v13 }
 0x384   : > { %2011 = vst [vmem:[%s6561_s4 + $0x410] sm:$0xff] %v2010_v33 }
 0x385   : > { %2013 = vst [vmem:[%s6561_s4 + $0x418] sm:$0xff] %v2012_v63 }
 0x386   : > { %2015 = vst [vmem:[%s6561_s4 + $0x420] sm:$0xff] %v2014_v2 }
 0x387   : > { %2017 = vst [vmem:[%s6561_s4 + $0x428] sm:$0xff] %v2016_v49 }
 0x388   : > { %2019 = vst [vmem:[%s6561_s4 + $0x430] sm:$0xff] %v2018_v48 }
 0x389   : > { %2021 = vst [vmem:[%s6561_s4 + $0x438] sm:$0xff] %v2020_v16 }
 0x38a   : > { %2023 = vst [vmem:[%s6561_s4 + $0x440] sm:$0xff] %v2022_v60 }
 0x38b   : > { %2025 = vst [vmem:[%s6561_s4 + $0x448] sm:$0xff] %v2024_v57 }
 0x38c   : > { %2027 = vst [vmem:[%s6561_s4 + $0x450] sm:$0xff] %v2026_v20 }
 0x38d   : > { %2029 = vst [vmem:[%s6561_s4 + $0x458] sm:$0xff] %v2028_v5 }
 0x38e   : > { %2031 = vst [vmem:[%s6561_s4 + $0x460] sm:$0xff] %v2030_v23 }
 0x38f   : > { %2033 = vst [vmem:[%s6561_s4 + $0x468] sm:$0xff] %v2032_v21 }
 0x390   : > { %2035 = vst [vmem:[%s6561_s4 + $0x470] sm:$0xff] %v2034_v17 }
 0x391   : > { %2037 = vst [vmem:[%s6561_s4 + $0x478] sm:$0xff] %v2036_v12 }
 0x392   : > { %2039 = vst [vmem:[%s6561_s4 + $0x500] sm:$0xff] %v2038_v6 }
 0x393   : > { %2041 = vst [vmem:[%s6561_s4 + $0x508] sm:$0xff] %v2040_v28 }
 0x394   : > { %2043 = vst [vmem:[%s6561_s4 + $0x510] sm:$0xff] %v2042_v24 }
 0x395   : > { %2045 = vst [vmem:[%s6561_s4 + $0x518] sm:$0xff] %v2044_v4 }
 0x396   : > { %2047 = vst [vmem:[%s6561_s4 + $0x520] sm:$0xff] %v2046_v43 }
 0x397   : > { %2049 = vst [vmem:[%s6561_s4 + $0x528] sm:$0xff] %v2048_v19 }
 0x398   : > { %2051 = vst [vmem:[%s6561_s4 + $0x530] sm:$0xff] %v2050_v29 }
 0x399   : > { %2053 = vst [vmem:[%s6561_s4 + $0x538] sm:$0xff] %v2052_v39 }
 0x39a   : > { %2055 = vst [vmem:[%s6561_s4 + $0x540] sm:$0xff] %v2054_v50 }
 0x39b   : > { %2057 = vst [vmem:[%s6561_s4 + $0x548] sm:$0xff] %v2056_v56 }
 0x39c   : > { %2059 = vst [vmem:[%s6561_s4 + $0x550] sm:$0xff] %v2058_v47 }
 0x39d   : > { %2061 = vst [vmem:[%s6561_s4 + $0x558] sm:$0xff] %v2060_v32 }
 0x39e   : > { %2063 = vst [vmem:[%s6561_s4 + $0x560] sm:$0xff] %v2062_v34 }
 0x39f   : > { %2065 = vst [vmem:[%s6561_s4 + $0x568] sm:$0xff] %v2064_v42 }
 0x3a0   : > { %2067 = vst [vmem:[%s6561_s4 + $0x570] sm:$0xff] %v2066_v7 }
 0x3a1   : > { %2069 = vst [vmem:[%s6561_s4 + $0x578] sm:$0xff] %v2068_v0 }
 0x3a2   : > { %2071 = vst [vmem:[%s6561_s4 + $0x600] sm:$0xff] %v2070_v36 }
 0x3a3   : > { %2073 = vst [vmem:[%s6561_s4 + $0x608] sm:$0xff] %v2072_v45 }
 0x3a4   : > { %2075 = vst [vmem:[%s6561_s4 + $0x610] sm:$0xff] %v2074_v40 }
 0x3a5   : > { %2077 = vst [vmem:[%s6561_s4 + $0x618] sm:$0xff] %v2076_v35 }
 0x3a6   : > { %2079 = vst [vmem:[%s6561_s4 + $0x620] sm:$0xff] %v2078_v61 }
 0x3a7   : > { %2081 = vst [vmem:[%s6561_s4 + $0x628] sm:$0xff] %v2080_v55 }
 0x3a8   : > { %2083 = vst [vmem:[%s6561_s4 + $0x630] sm:$0xff] %v2082_v15 }
 0x3a9   : > { %2085 = vst [vmem:[%s6561_s4 + $0x638] sm:$0xff] %v2084_v46 }
 0x3aa   : > { %2087 = vst [vmem:[%s6561_s4 + $0x640] sm:$0xff] %v2086_v25 }
 0x3ab   : > { %2089 = vst [vmem:[%s6561_s4 + $0x648] sm:$0xff] %v2088_v10 }
 0x3ac   : > { %2091 = vst [vmem:[%s6561_s4 + $0x650] sm:$0xff] %v2090_v3 }
 0x3ad   : > { %2093 = vst [vmem:[%s6561_s4 + $0x658] sm:$0xff] %v2092_v22 }
 0x3ae   : > { %2095 = vst [vmem:[%s6561_s4 + $0x660] sm:$0xff] %v2094_v8 }
 0x3af   : > { %2097 = vst [vmem:[%s6561_s4 + $0x668] sm:$0xff] %v2096_v44 }
 0x3b0   : > { %2099 = vst [vmem:[%s6561_s4 + $0x670] sm:$0xff] %v2098_v30 }
 0x3b1   : > { %2101 = vst [vmem:[%s6561_s4 + $0x678] sm:$0xff] %v2100_v9 }
 0x3b2   : > { %2103 = vst [vmem:[%s6561_s4 + $0x700] sm:$0xff] %v2102_v37 }
 0x3b3   : > { %2105 = vst [vmem:[%s6561_s4 + $0x708] sm:$0xff] %v2104_v54 }
 0x3b4   : > { %2107 = vst [vmem:[%s6561_s4 + $0x710] sm:$0xff] %v2106_v31 }
 0x3b5   : > { %2109 = vst [vmem:[%s6561_s4 + $0x718] sm:$0xff] %v2108_v26 }
 0x3b6   : > { %2111 = vst [vmem:[%s6561_s4 + $0x720] sm:$0xff] %v2110_v14 }
 0x3b7   : > { %2113 = vst [vmem:[%s6561_s4 + $0x728] sm:$0xff] %v2112_v11 }
 0x3b8   : > { %2115 = vst [vmem:[%s6561_s4 + $0x730] sm:$0xff] %v2114_v18 }
 0x3b9   : > { %2117 = vst [vmem:[%s6561_s4 + $0x738] sm:$0xff] %v2116_v27 }
 0x3ba   : > { %2119 = vst [vmem:[%s6561_s4 + $0x740] sm:$0xff] %v2118_v41 }
 0x3bb   : > { %2121 = vst [vmem:[%s6561_s4 + $0x748] sm:$0xff] %v2120_v62 }
 0x3bc   : > { %2123 = vst [vmem:[%s6561_s4 + $0x750] sm:$0xff] %v2122_v59 }
 0x3bd   : > { %2125 = vst [vmem:[%s6561_s4 + $0x758] sm:$0xff] %v2124_v52 }
 0x3be   : > { %2127 = vst [vmem:[%s6561_s4 + $0x760] sm:$0xff] %v2126_v53 }
 0x3bf   : > { %2129 = vst [vmem:[%s6561_s4 + $0x768] sm:$0xff] %v2128_v51 }
 0x3c0   : > { %2131 = vst [vmem:[%s6561_s4 + $0x770] sm:$0xff] %v2130_v58 }
 0x3c1   : > { %2133 = vst [vmem:[%s6561_s4 + $0x778] sm:$0xff] %v2132_v1 }
 0x3c2 PF: > { %s13_s18 = sadd.s32 1, %s2346_s18   ;;  %s8136_s12 = smov %s2326_s13 }
 0x3c3   : > { %p10_p12 = scmp.ge.s32.totalorder %s13_s18, 6   ;;  %s8137_s13 = smov %s2425_s27 }
 0x3c4   : > { %s8138_s14 = smov %s2338_s16  ;;  %s8139_s15 = smov %s2342_s17 }
 0x3c5   : > { %s8140_s16 = smov %s8143_s19  ;;  %s8141_s17 = smov %s8147_s20 }
 0x3c6   :  { %12 = sbr.rel (!%p10_p12) target bundleno = 4 (0x4), region = 113 }

</bundles_post_ra>
